<compile_context>
chip_gen: v7x
topology: tpu7x:2x2x1
jax: 0.10.0
libtpu: 0.0.40
codegen_flags: <defaults>
</compile_context>

<pallas_src>
import numpy as np
import jax
import jax.numpy as jnp
from jax import lax
from jax.experimental import pallas as pl
from jax.experimental.pallas import tpu as pltpu


_DEFAULT_TILE_BYTES = 8 * 1024 * 1024   # ~8 MiB pb tile -> ~16-17 MiB double-buffered
_VMEM_LIMIT_BYTES = 48 * 1024 * 1024    # under v7x's 64 MiB physical VMEM, ample headroom
_FASTPATH_ELEMS = 100_000               # below this a pallas_call is pure launch overhead


def _cdiv(a: int, b: int) -> int:
    return (a + b - 1) // b


# ---------------------------------------------------------------------------
# Kernels.
# Both produce, for every batch row i < B:
#     out[i, 0] = -(rewards_z1[i] * 0.001 - bl) * sum_j pb[i, j]
# Rows >= B (ragged last batch tile: OOB garbage) are written but sliced off
# by the wrapper, so pb / rewards are NEVER padded in HBM.
# ---------------------------------------------------------------------------
def _rowtile_kernel(bl_ref, pb_ref, rew_ref, out_ref):
    # grid = (nb,): each pb tile (TB, S) covers full rows -> no seq axis, no
    # masking, no scratch; one XLU row-reduce + one per-row scale.
    rowsum = jnp.sum(pb_ref[...].astype(jnp.float32), axis=-1, keepdims=True)
    coef = -(rew_ref[...] * jnp.float32(0.001) - bl_ref[0])
    out_ref[...] = coef * rowsum


def _make_seqtiled_kernel(S: int, TS: int):
    # grid = (nb, ns): the (TB, 1) output block is resident across the
    # (innermost, "arbitrary") seq axis and doubles as the row-sum accumulator
    # (no extra scratch).  The column mask is emitted only when the last seq
    # tile is statically known to be ragged.
    ragged_cols = (S % TS) != 0

    def kernel(bl_ref, pb_ref, rew_ref, out_ref):
        j = pl.program_id(1)
        ns = pl.num_programs(1)

        x = pb_ref[...].astype(jnp.float32)
        if ragged_cols:
            col = lax.broadcasted_iota(jnp.int32, x.shape, 1)
            x = jnp.where(col < (S - j * TS), x, jnp.float32(0.0))
        part = jnp.sum(x, axis=-1, keepdims=True)          # (TB, 1) f32

        @pl.when(j == 0)
        def _init():
            out_ref[...] = part

        @pl.when(j > 0)
        def _accumulate():
            out_ref[...] += part

        @pl.when(j == ns - 1)
        def _apply_coef():
            coef = -(rew_ref[...] * jnp.float32(0.001) - bl_ref[0])
            out_ref[...] = coef * out_ref[...]

    return kernel


def _per_row_loss_terms(pb, rew_col, bl_arr, tile_bytes):
    """Pallas part: per-row loss terms for unpadded pb.

    pb      : (B, S) float (f32/bf16, native dtype).
    rew_col : (B, 1) f32 mismatch counts.
    bl_arr  : (1,)   f32 baseline (SMEM).
    Returns (nb*TB, 1) f32; rows >= B are garbage and must be sliced off.
    """
    B, S = pb.shape
    itemsize = pb.dtype.itemsize
    sub = 8 * max(1, 4 // itemsize)      # sublane multiple: 8 f32, 16 bf16, 32 int8
    row_bytes = S * itemsize

    smem_spec = pl.BlockSpec(memory_space=pltpu.MemorySpace.SMEM)

    if B * row_bytes <= tile_bytes or sub * row_bytes <= tile_bytes:
        # Whole rows fit in a tile -> single-seq-tile kernel, grid (nb,).
        if B * row_bytes <= tile_bytes:
            TB = B                                   # one tile (full-dim block)
        else:
            TB = min(B, (tile_bytes // row_bytes) // sub * sub)
        nb = _cdiv(B, TB)
        grid = (nb,)
        kernel = _rowtile_kernel
        in_specs = [smem_spec,
                    pl.BlockSpec((TB, S), lambda i: (i, 0)),
                    pl.BlockSpec((TB, 1), lambda i: (i, 0))]
        out_spec = pl.BlockSpec((TB, 1), lambda i: (i, 0))
        dim_sem = ("parallel",)
    else:
        # Rows too long -> tile the seq axis too, grid (nb, ns), ns innermost.
        TB = B if B <= 256 else 256
        TS = max(128, (tile_bytes // (TB * itemsize)) // 128 * 128)
        nb = _cdiv(B, TB)
        ns = _cdiv(S, TS)
        grid = (nb, ns)
        kernel = _make_seqtiled_kernel(S, TS)
        in_specs = [smem_spec,
                    pl.BlockSpec((TB, TS), lambda i, j: (i, j)),
                    pl.BlockSpec((TB, 1), lambda i, j: (i, 0))]
        out_spec = pl.BlockSpec((TB, 1), lambda i, j: (i, 0))
        dim_sem = ("parallel", "arbitrary")

    bytes_accessed = int(B * S * itemsize + B * 4 + nb * TB * 4 + 4)
    return pl.pallas_call(
        kernel,
        out_shape=jax.ShapeDtypeStruct((nb * TB, 1), jnp.float32),
        grid=grid,
        in_specs=in_specs,
        out_specs=out_spec,
        compiler_params=pltpu.CompilerParams(
            dimension_semantics=dim_sem,
            vmem_limit_bytes=_VMEM_LIMIT_BYTES),
        cost_estimate=pl.CostEstimate(
            flops=2 * B * S, transcendentals=0, bytes_accessed=bytes_accessed),
    )(bl_arr, pb, rew_col)


def rl_loss_pallas(pb, rewards_z1, bl, *, tile_bytes=_DEFAULT_TILE_BYTES):
    """Numeric part of departureLossRL_from_file.forward.

    pb         : (B, S) float array (f32 or bf16; kept in native dtype).
    rewards_z1 : (B,)   mismatch counts.
    bl         : python float baseline (pre-update value).
    Returns (loss, mean(rewards_z1)) as rank-0 f32 arrays.
    """
    pb = jnp.asarray(pb)
    if not jnp.issubdtype(pb.dtype, jnp.floating):
        pb = pb.astype(jnp.float32)
    B, S = pb.shape
    rew = jnp.asarray(rewards_z1, dtype=jnp.float32).reshape(B)

    if B * S <= _FASTPATH_ELEMS:
        # Tiny shapes: pallas_call launch/DMA overhead dwarfs the math.
        rowsum = jnp.sum(pb.astype(jnp.float32), axis=-1)
        coef = -(rew * jnp.float32(0.001) - jnp.float32(bl))
        loss = jnp.sum(coef * rowsum) / jnp.float32(B * S)
    else:
        bl_arr = jnp.asarray([bl], dtype=jnp.float32)
        terms = _per_row_loss_terms(pb, rew.reshape(B, 1), bl_arr, int(tile_bytes))
        loss = jnp.sum(terms[:B, 0]) / jnp.float32(B * S)

    ravg = jnp.mean(rew)
    return loss, ravg


class DepartureLossRLFromFile:
    """JAX/Pallas port.  Candidate sentences are synthesized in-script instead
    of being read from dev.txt files (deterministic, no file I/O)."""

    def __init__(self, models):
        self.bl = 0.0
        self.bn = 0
        self.models = models  # list (components) of list (per-id) of strings

    @staticmethod
    def _get_reward_departure(golden_out, departure_out):
        # 'number_counting': count token mismatches over the overlapping prefix
        dep = departure_out.strip().split(' ')
        stc_length = min(len(golden_out), len(dep))
        return sum(0 if golden_out[i] == dep[i] else 1 for i in range(stc_length))

    def forward(self, sel, pb, out_str, sample_ids):
        batch = sel.shape[0]
        model_preds = [np.array(self.models[m])[sample_ids]
                       for m in range(len(self.models))]
        rewards_z1 = []
        for i in range(batch):
            r = 0
            for j in range(len(model_preds)):
                r += self._get_reward_departure(out_str[i], model_preds[j][i])
            rewards_z1.append(r)
        rewards_z1 = np.asarray(rewards_z1, dtype=np.float32)

        # --- numeric hot path (Pallas kernel for large pb; uses pre-update bl) ---
        loss, rz1_avg = rl_loss_pallas(pb, rewards_z1, self.bl)

        # baseline update (stateful, stays in Python like the PyTorch module)
        rewards_ave3 = float(np.average(rewards_z1 * 0.001))
        self.bl = (self.bl * self.bn + rewards_ave3) / (self.bn + 1)
        self.bn += 1
        return loss, rz1_avg, None


if __name__ == "__main__":
    # ------------------------------------------------------------------
    # Primary check: module forward at the module-implied small shapes
    # (fast path: no pallas launch for 16 elements).
    # ------------------------------------------------------------------
    batch, seq = 2, 8
    key = jax.random.PRNGKey(0)
    k_pb, k_sel, k_pb2, k_rz = jax.random.split(key, 4)

    pb = jax.random.normal(k_pb, (batch, seq), dtype=jnp.float32)
    sel = jax.random.randint(k_sel, (batch, seq), 0, 16, dtype=jnp.int32)

    out_str = [
        ["the", "cat", "sat", "on", "mat"],
        ["a", "dog", "ran", "far", "away"],
    ]
    models = [
        ["the cat sat on rug", "a dog ran far home", "unused line"],
        ["the bat sat in mat", "a dog ran far away", "unused line"],
    ]
    sample_ids = [0, 1]

    mod = DepartureLossRLFromFile(models)
    loss, rz1_avg, _ = mod.forward(sel, pb, out_str, sample_ids)
    loss = jax.block_until_ready(loss)
    rz1_avg = jax.block_until_ready(rz1_avg)

    pb_np = np.asarray(pb, dtype=np.float64)
    rz1_np = np.array([
        sum(DepartureLossRLFromFile._get_reward_departure(out_str[i],
                                                          models[m][sample_ids[i]])
            for m in range(len(models)))
        for i in range(batch)
    ], dtype=np.float64)
    rewards_np = rz1_np * 0.001
    ls3, cnt3 = 0.0, 0
    for j in range(seq):
        wgt3 = np.ones(batch)
        ls3 += (-pb_np[:, j] * (rewards_np - 0.0) * wgt3).sum()
        cnt3 += wgt3.sum()
    ref_loss = ls3 / cnt3
    assert np.allclose(float(loss), ref_loss, rtol=1e-5, atol=1e-6)
    assert np.allclose(float(rz1_avg), np.average(rz1_np), rtol=1e-5, atol=1e-6)

    # ------------------------------------------------------------------
    # Kernel checks on a larger, deliberately tile-unaligned shape.
    # No padding anywhere: 300x4500 is streamed as-is.
    # ------------------------------------------------------------------
    B2, S2 = 300, 4500
    pb2 = jax.random.normal(k_pb2, (B2, S2), dtype=jnp.float32)
    rz1_2 = jax.random.randint(k_rz, (B2,), 0, 100).astype(jnp.float32)
    bl2 = 0.0123

    pb2_np = np.asarray(pb2, dtype=np.float64)
    rz1_2np = np.asarray(rz1_2, dtype=np.float64)
    coef_np = -(rz1_2np * 0.001 - bl2)
    ref2 = (coef_np[:, None] * pb2_np).sum() / (B2 * S2)
    ref_ravg = rz1_2np.mean()

    # (a) default tiles: whole array in one (300, 4500) block, grid (1,)
    loss2, ravg2 = rl_loss_pallas(pb2, rz1_2, bl2)
    loss2 = float(jax.block_until_ready(loss2))
    ravg2 = float(jax.block_until_ready(ravg2))
    assert np.allclose(loss2, ref2, rtol=1e-3, atol=1e-7), (loss2, ref2)
    assert np.allclose(ravg2, ref_ravg, rtol=1e-5, atol=1e-6)

    # (b) forced small tile budget: row-tile kernel, nb>1 with ragged last
    #     batch tile (TB=56, nb=6) -- exercises the unpadded ragged path.
    loss3, _ = rl_loss_pallas(pb2, rz1_2, bl2, tile_bytes=1 << 20)
    loss3 = float(jax.block_until_ready(loss3))
    assert np.allclose(loss3, ref2, rtol=1e-3, atol=1e-7), (loss3, ref2)

    # (c) even smaller budget: fully tiled (nb, ns) kernel with ragged batch
    #     AND seq tiles (TB=256, TS=128) -- exercises the in-kernel column mask
    #     and the resident row-sum accumulator.
    loss4, _ = rl_loss_pallas(pb2, rz1_2, bl2, tile_bytes=128 * 1024)
    loss4 = float(jax.block_until_ready(loss4))
    assert np.allclose(loss4, ref2, rtol=1e-3, atol=1e-7), (loss4, ref2)

    # (d) native bf16 pb: kernel DMAs bf16 tiles and casts to f32 in VMEM.
    pb2_bf = pb2.astype(jnp.bfloat16)
    pb2_bf_np = np.asarray(pb2_bf.astype(jnp.float32), dtype=np.float64)
    ref_bf = (coef_np[:, None] * pb2_bf_np).sum() / (B2 * S2)

    loss_bf, _ = rl_loss_pallas(pb2_bf, rz1_2, bl2)                       # single tile
    loss_bf = float(jax.block_until_ready(loss_bf))
    assert np.allclose(loss_bf, ref_bf, rtol=1e-3, atol=1e-7), (loss_bf, ref_bf)

    loss_bf2, _ = rl_loss_pallas(pb2_bf, rz1_2, bl2, tile_bytes=128 * 1024)  # tiled bf16
    loss_bf2 = float(jax.block_until_ready(loss_bf2))
    assert np.allclose(loss_bf2, ref_bf, rtol=1e-3, atol=1e-7), (loss_bf2, ref_bf)

    print("KERNEL_OK")
</pallas_src>

<mosaic_0001>
module attributes {stable_mosaic.version = 11 : i64} {
  func.func @_rowtile_kernel(%arg0: i32, %arg1: memref<1xf32, #tpu.memory_space<smem>>, %arg2: memref<300x4500xf32, #tpu.memory_space<vmem>>, %arg3: memref<300x1xf32, #tpu.memory_space<vmem>>, %arg4: memref<300x1xf32, #tpu.memory_space<vmem>>) attributes {dimension_semantics = [#tpu.dimension_semantics<parallel>], iteration_bounds = array<i64: 1>, scalar_prefetch = 0 : i64, scratch_operands = 0 : i64, tpu.core_type = #tpu.core_type<tc>, window_params = [{transform_indices = @transform_0, window_bounds = array<i64: 1>}, {transform_indices = @transform_1, window_bounds = array<i64: 300, 4500>}, {transform_indices = @transform_2, window_bounds = array<i64: 300, 1>}, {transform_indices = @transform_3, window_bounds = array<i64: 300, 1>}]} {
    %c0 = arith.constant 0 : index
    %c0_0 = arith.constant 0 : index
    %0 = vector.load %arg2[%c0, %c0_0] : memref<300x4500xf32, #tpu.memory_space<vmem>>, vector<300x4500xf32>
    %cst = arith.constant dense<0.000000e+00> : vector<300xf32>
    %1 = vector.multi_reduction <add>, %0, %cst [1] : vector<300x4500xf32> to vector<300xf32>
    %2 = vector.shape_cast %1 : vector<300xf32> to vector<300x1xf32>
    %c0_1 = arith.constant 0 : index
    %c0_2 = arith.constant 0 : index
    %3 = vector.load %arg3[%c0_1, %c0_2] : memref<300x1xf32, #tpu.memory_space<vmem>>, vector<300x1xf32>
    %cst_3 = arith.constant 1.000000e-03 : f32
    %4 = vector.broadcast %cst_3 : f32 to vector<300x1xf32>
    %5 = arith.mulf %3, %4 : vector<300x1xf32>
    %c0_4 = arith.constant 0 : index
    %6 = memref.load %arg1[%c0_4] : memref<1xf32, #tpu.memory_space<smem>>
    %7 = vector.broadcast %6 : f32 to vector<300x1xf32>
    %8 = arith.subf %5, %7 : vector<300x1xf32>
    %cst_5 = arith.constant 0.000000e+00 : f32
    %9 = vector.broadcast %cst_5 : f32 to vector<300x1xf32>
    %10 = arith.subf %9, %8 : vector<300x1xf32>
    %11 = arith.mulf %10, %2 : vector<300x1xf32>
    %c0_6 = arith.constant 0 : index
    %c0_7 = arith.constant 0 : index
    %12 = vector.load %arg4[%c0_6, %c0_7] : memref<300x1xf32, #tpu.memory_space<vmem>>, vector<300x1xf32>
    tpu.vector_store %arg4[%c0_6, %c0_7], %11 {strides = array<i32>} : memref<300x1xf32, #tpu.memory_space<vmem>>, vector<300x1xf32>,
    return
  }
  func.func @transform_0(%arg0: i32) -> i32 {
    %c0_i32 = arith.constant 0 : i32
    %c0_i32_0 = arith.constant 0 : i32
    return %c0_i32 : i32
  }
  func.func @transform_1(%arg0: i32) -> (i32, i32) {
    %c0_i32 = arith.constant 0 : i32
    %c0_i32_0 = arith.constant 0 : i32
    return %arg0, %c0_i32 : i32, i32
  }
  func.func @transform_2(%arg0: i32) -> (i32, i32) {
    %c0_i32 = arith.constant 0 : i32
    %c0_i32_0 = arith.constant 0 : i32
    return %arg0, %c0_i32 : i32, i32
  }
  func.func @transform_3(%arg0: i32) -> (i32, i32) {
    %c0_i32 = arith.constant 0 : i32
    %c0_i32_0 = arith.constant 0 : i32
    return %arg0, %c0_i32 : i32, i32
  }
}

</mosaic_0001>

<bundles_post_ra>
// kernel: tpu_custom_call.1
= control target key start
LH: loop header
LB: loop body
LE: loop exit
PB: predicated region body
PF: predicated region fallthrough
CT: control target
= control target key end

     0   :  { %9 = vsyncpa [#allocation4], 0  ;;  %s3143_s12 = smov [#allocation3]   ;;  %s3705_s0 = inlined_call_operand.<no memory space> [shape: f32[1], index: 0, kind: input, shape index: {}]   ;;  %s3706_s1 = inlined_call_operand.hbm [shape: f32[300,4500], index: 1, kind: input, shape index: {}]   ;;  %s3707_s2 = inlined_call_operand.vmem [shape: f32[300,1], index: 2, kind: input, shape index: {}]   ;;  %s3708_s3 = inlined_call_operand.vmem [shape: f32[300,1], index: 3, kind: output, shape index: {}]  }
   0x1   :  { %s17_s13 = sshll.u32 %s3143_s12, 4  ;;  %s3119_s16 = scalar_lea.hbm %s3706_s1, 175104  ;;  %s18_s13 = int_to_ptr.vmem [resolvable:$true] %s17_s13 }
   0x2   :  { %p3120_p0 = scmp.ne.s32.totalorder %s3706_s1, %s3119_s16  ;;  %p3123_p1 = scmp.lt.u32.totalorder %s3119_s16, %s3706_s1 }
   0x4   :  { %p3125_p2 = pnand %p3123_p1, %p3120_p0 }
   0x6   :  { %3128 = shalt.err (!%p3125_p2)
}
   0x7   :  { %s3129_s21 = scalar_lea.vmem %s18_s13, 175104  ;;  %p3134_p4 = scmp.lt.s32.totalorder %s18_s13, %s18_s13 }
   0x8   :  { %p3130_p3 = scmp.ne.s32.totalorder %s18_s13, %s3129_s21  ;;  %p3135_p5 = scmp.lt.s32.totalorder %s3129_s21, %s3129_s21 }
   0xa   :  { %p3136_p6 = por %p3135_p5, %p3134_p4 }
   0xc   :  { %p3137_p7 = pnand %p3136_p6, %p3130_p3 }
   0xe   :  { %3140 = shalt.err (!%p3137_p7)
}
   0xf   :  { %s3144_s22 = smov 4608   ;;  %s3145_s23 = smov 288  }
  0x10   :  { %23 = dma.hbm_to_vmem [thread:$0]  %s3706_s1, 175104, %s18_s13, [#allocation4], %s3144_s22, %s3144_s22, %s3145_s23  }
  0x11   :  { %3141 = dma.done.wait [#allocation4], 175104  }
  0x12   :  { %3142 = vsyncadd [#allocation4], 4294792192  ;;  %v101_v0 = vld [vmem:[#allocation3 + $0x240] sm:$0xff]  ;;  %v102_v1 = vld [vmem:[#allocation3 + $0x248] sm:$0xff]  ;;  %vm1431_vm0 = vcmask 162816   ;;  %vm2804_vm1 = vcmask 1043456  }
  0x13   :  { %v103_v2 = vld [vmem:[#allocation3 + $0x250] sm:$0xff]  ;;  %v1474_v3 = vadd.f32 %v102_v1, %v101_v0  ;;  %v104_v4 = vld [vmem:[#allocation3 + $0x258] sm:$0xff]  ;;  %v105_v6 = vld [vmem:[#allocation3 + $0x260] sm:$0xff]  ;;  %vm3071_vm2 = vcmask 7168   ;;  %vm2874_vm3 = vcmask 158720   ;;  %vm3109_vm4 = vcmask 3072  }
  0x14   :  { %v106_v8 = vld [vmem:[#allocation3 + $0x268] sm:$0xff]  ;;  %v107_v10 = vld [vmem:[#allocation3 + $0x270] sm:$0xff]  ;;  %v108_v12 = vld [vmem:[#allocation3 + $0x278] sm:$0xff] }
  0x15   :  { %v1475_v5 = vadd.f32 %v1474_v3, %v103_v2  ;;  %v109_v13 = vld [vmem:[#allocation3 + $0x280] sm:$0xff]  ;;  %v30_v16 = vld [vmem:[#allocation3 + $0x8] sm:$0xff]  ;;  %v31_v17 = vld [vmem:[#allocation3 + $0x10] sm:$0xff] }
  0x16   :  { %v29_v15 = vld [vmem:[#allocation3] sm:$0xff]  ;;  %v110_v20 = vld [vmem:[#allocation3 + $0x288] sm:$0xff]  ;;  %v32_v21 = vld [vmem:[#allocation3 + $0x18] sm:$0xff] }
  0x17   :  { %v1476_v7 = vadd.f32 %v1475_v5, %v104_v4  ;;  %v1397_v19 = vadd.f32 %v30_v16, %v29_v15  ;;  %v111_v24 = vld [vmem:[#allocation3 + $0x290] sm:$0xff]  ;;  %v33_v25 = vld [vmem:[#allocation3 + $0x20] sm:$0xff]  ;;  %v112_v28 = vld [vmem:[#allocation3 + $0x298] sm:$0xff] }
  0x18   :  { %v34_v29 = vld [vmem:[#allocation3 + $0x28] sm:$0xff]  ;;  %v113_v32 = vld [vmem:[#allocation3 + $0x2a0] sm:$0xff]  ;;  %v35_v33 = vld [vmem:[#allocation3 + $0x30] sm:$0xff] }
  0x19   :  { %v1477_v9 = vadd.f32 %v1476_v7, %v105_v6  ;;  %v1398_v23 = vadd.f32 %v1397_v19, %v31_v17  ;;  %v114_v36 = vld [vmem:[#allocation3 + $0x2a8] sm:$0xff]  ;;  %v36_v37 = vld [vmem:[#allocation3 + $0x38] sm:$0xff]  ;;  %v115_v38 = vld [vmem:[#allocation3 + $0x2b0] sm:$0xff] }
  0x1a   :  { %v37_v40 = vld [vmem:[#allocation3 + $0x40] sm:$0xff]  ;;  %v138_v43 = vld [vmem:[#allocation3 + $0x368] sm:$0xff]  ;;  %v139_v44 = vld [vmem:[#allocation3 + $0x370] sm:$0xff] }
  0x1b   :  { %v1478_v11 = vadd.f32 %v1477_v9, %v106_v8  ;;  %v1399_v27 = vadd.f32 %v1398_v23, %v32_v21  ;;  %v137_v42 = vld [vmem:[#allocation3 + $0x360] sm:$0xff]  ;;  %v116_v48 = vld [vmem:[#allocation3 + $0x2b8] sm:$0xff]  ;;  %v38_v49 = vld [vmem:[#allocation3 + $0x48] sm:$0xff] }
  0x1c   :  { %v1512_v47 = vadd.f32 %v138_v43, %v137_v42  ;;  %v140_v50 = vld [vmem:[#allocation3 + $0x378] sm:$0xff]  ;;  %v117_v54 = vld [vmem:[#allocation3 + $0x2c0] sm:$0xff]  ;;  %v39_v55 = vld [vmem:[#allocation3 + $0x50] sm:$0xff] }
  0x1d   :  { %v1479_v14 = vadd.f32 %v1478_v11, %v107_v10  ;;  %v1400_v31 = vadd.f32 %v1399_v27, %v33_v25  ;;  %v141_v56 = vld [vmem:[#allocation3 + $0x380] sm:$0xff]  ;;  %v118_v60 = vld [vmem:[#allocation3 + $0x2c8] sm:$0xff]  ;;  %v40_v61 = vld [vmem:[#allocation3 + $0x58] sm:$0xff] }
  0x1e   :  { %v1513_v53 = vadd.f32 %v1512_v47, %v139_v44  ;;  %v142_v62 = vld [vmem:[#allocation3 + $0x388] sm:$0xff]  ;;  %v119_v2 = vld [vmem:[#allocation3 + $0x2d0] sm:$0xff]  ;;  %v41_v3 = vld [vmem:[#allocation3 + $0x60] sm:$0xff] }
  0x1f   :  { %v1480_v18 = vadd.f32 %v1479_v14, %v108_v12  ;;  %v1401_v35 = vadd.f32 %v1400_v31, %v34_v29  ;;  %v143_v4 = vld [vmem:[#allocation3 + $0x390] sm:$0xff]  ;;  %v120_v8 = vld [vmem:[#allocation3 + $0x2d8] sm:$0xff]  ;;  %v42_v9 = vld [vmem:[#allocation3 + $0x68] sm:$0xff] }
  0x20   :  { %v1514_v59 = vadd.f32 %v1513_v53, %v140_v50  ;;  %v144_v10 = vld [vmem:[#allocation3 + $0x398] sm:$0xff]  ;;  %v121_v11 = vld [vmem:[#allocation3 + $0x2e0] sm:$0xff]  ;;  %v67_v19 = vld [vmem:[#allocation3 + $0x130] sm:$0xff] }
  0x21   :  { %v1481_v22 = vadd.f32 %v1480_v18, %v109_v13  ;;  %v1402_v41 = vadd.f32 %v1401_v35, %v35_v33  ;;  %v43_v13 = vld [vmem:[#allocation3 + $0x70] sm:$0xff]  ;;  %v145_v15 = vld [vmem:[#allocation3 + $0x3a0] sm:$0xff]  ;;  %v66_v18 = vld [vmem:[#allocation3 + $0x128] sm:$0xff] }
  0x22   :  { %v1515_v1 = vadd.f32 %v1514_v59, %v141_v56  ;;  %v65_v17 = vld [vmem:[#allocation3 + $0x120] sm:$0xff]  ;;  %v44_v25 = vld [vmem:[#allocation3 + $0x78] sm:$0xff]  ;;  %v70_v43 = vld [vmem:[#allocation3 + $0x148] sm:$0xff] }
  0x23   :  { %v1482_v26 = vadd.f32 %v1481_v22, %v110_v20  ;;  %v1403_v46 = vadd.f32 %v1402_v41, %v36_v37  ;;  %v122_v20 = vld [vmem:[#allocation3 + $0x2e8] sm:$0xff]  ;;  %v68_v27 = vld [vmem:[#allocation3 + $0x138] sm:$0xff]  ;;  %v45_v33 = vld [vmem:[#allocation3 + $0x80] sm:$0xff] }
  0x24   :  { %v1516_v7 = vadd.f32 %v1515_v1, %v142_v62  ;;  %v69_v35 = vld [vmem:[#allocation3 + $0x140] sm:$0xff]  ;;  %v46_v41 = vld [vmem:[#allocation3 + $0x88] sm:$0xff]  ;;  %v148_v42 = vld [vmem:[#allocation3 + $0x3b8] sm:$0xff] }
  0x25   :  { %v1483_v30 = vadd.f32 %v1482_v26, %v111_v24  ;;  %v1404_v52 = vadd.f32 %v1403_v46, %v37_v40  ;;  %v1436_v24 = vadd.f32 %v66_v18, %v65_v17  ;;  %v146_v26 = vld [vmem:[#allocation3 + $0x3a8] sm:$0xff]  ;;  %v125_v44 = vld [vmem:[#allocation3 + $0x300] sm:$0xff]  ;;  %v72_v59 = vld [vmem:[#allocation3 + $0x158] sm:$0xff] }
  0x26   :  { %v1517_v16 = vadd.f32 %v1516_v7, %v143_v4  ;;  %v149_v50 = vld [vmem:[#allocation3 + $0x3c0] sm:$0xff] }
  0x27   :  { %v1484_v34 = vadd.f32 %v1483_v30, %v112_v28  ;;  %v1405_v58 = vadd.f32 %v1404_v52, %v38_v49  ;;  %v123_v28 = vld [vmem:[#allocation3 + $0x2f0] sm:$0xff]  ;;  %v126_v52 = vld [vmem:[#allocation3 + $0x308] sm:$0xff]  ;;  %v49_v62 = vld [vmem:[#allocation3 + $0xa0] sm:$0xff] }
  0x28   :  { %v1518_v23 = vadd.f32 %v1517_v16, %v144_v10  ;;  %v47_v49 = vld [vmem:[#allocation3 + $0x90] sm:$0xff]  ;;  %v209_v4 = vld [vmem:[#allocation3 + $0x5a0] sm:$0xff] }
  0x29   :  { %v1485_v39 = vadd.f32 %v1484_v34, %v113_v32  ;;  %v1406_v0 = vadd.f32 %v1405_v58, %v39_v55  ;;  %v1437_v32 = vadd.f32 %v1436_v24, %v67_v19  ;;  %v147_v34 = vld [vmem:[#allocation3 + $0x3b0] sm:$0xff]  ;;  %v150_v58 = vld [vmem:[#allocation3 + $0x3c8] sm:$0xff]  ;;  %v129_v16 = vld [vmem:[#allocation3 + $0x320] sm:$0xff] }
  0x2a   :  { %v1519_v31 = vadd.f32 %v1518_v23, %v145_v15  ;;  %v153_v23 = vld [vmem:[#allocation3 + $0x3e0] sm:$0xff]  ;;  %v75_v24 = vld [vmem:[#allocation3 + $0x170] sm:$0xff] }
  0x2b   :  { %v1486_v45 = vadd.f32 %v1485_v39, %v114_v36  ;;  %v1407_v6 = vadd.f32 %v1406_v0, %v40_v61  ;;  %v124_v36 = vld [vmem:[#allocation3 + $0x2f8] sm:$0xff]  ;;  %v1438_v40 = vadd.f32 %v1437_v32, %v68_v27  ;;  %v151_v0 = vld [vmem:[#allocation3 + $0x3d0] sm:$0xff] }
  0x2c   :  { %v1520_v39 = vadd.f32 %v1519_v31, %v146_v26  ;;  %v130_v26 = vld [vmem:[#allocation3 + $0x328] sm:$0xff]  ;;  %v213_v31 = vld [vmem:[#allocation3 + $0x5c0] sm:$0xff]  ;;  %v52_v32 = vld [vmem:[#allocation3 + $0xb8] sm:$0xff] }
  0x2d   :  { %v1487_v51 = vadd.f32 %v1486_v45, %v115_v38  ;;  %v1408_v14 = vadd.f32 %v1407_v6, %v41_v3  ;;  %v73_v3 = vld [vmem:[#allocation3 + $0x160] sm:$0xff]  ;;  %v128_v6 = vld [vmem:[#allocation3 + $0x318] sm:$0xff] }
  0x2e   :  { %v1521_v47 = vadd.f32 %v1520_v39, %v147_v34  ;;  %v76_v34 = vld [vmem:[#allocation3 + $0x178] sm:$0xff] }
  0x2f   :  { %v1488_v57 = vadd.f32 %v1487_v51, %v116_v48  ;;  %v1409_v22 = vadd.f32 %v1408_v14, %v42_v9  ;;  %v1439_v48 = vadd.f32 %v1438_v40, %v69_v35  ;;  %v71_v51 = vld [vmem:[#allocation3 + $0x150] sm:$0xff]  ;;  %v74_v14 = vld [vmem:[#allocation3 + $0x168] sm:$0xff] }
  0x30   :  { %v1522_v55 = vadd.f32 %v1521_v47, %v148_v42  ;;  %v53_v42 = vld [vmem:[#allocation3 + $0xc0] sm:$0xff] }
  0x31   :  { %v1489_v63 = vadd.f32 %v1488_v57, %v117_v54  ;;  %v1410_v30 = vadd.f32 %v1409_v22, %v43_v13  ;;  %v1440_v56 = vadd.f32 %v1439_v48, %v70_v43  ;;  %v48_v57 = vld [vmem:[#allocation3 + $0x98] sm:$0xff]  ;;  %v51_v22 = vld [vmem:[#allocation3 + $0xb0] sm:$0xff] }
  0x32   :  { %v1523_v1 = vadd.f32 %v1522_v55, %v149_v50  ;;  %v152_v13 = vld [vmem:[#allocation3 + $0x3d8] sm:$0xff]  ;;  %v155_v43 = vld [vmem:[#allocation3 + $0x3f0] sm:$0xff]  ;;  %v78_v55 = vld [vmem:[#allocation3 + $0x188] sm:$0xff] }
  0x33   :  { %v1490_v5 = vadd.f32 %v1489_v63, %v118_v60  ;;  %v1411_v38 = vadd.f32 %v1410_v30, %v44_v25  ;;  %v127_v60 = vld [vmem:[#allocation3 + $0x310] sm:$0xff] }
  0x34   :  { %v1524_v9 = vadd.f32 %v1523_v1, %v150_v58  ;;  %v55_v58 = vld [vmem:[#allocation3 + $0xd0] sm:$0xff] }
  0x35   :  { %v1491_v12 = vadd.f32 %v1490_v5, %v119_v2  ;;  %v1412_v46 = vadd.f32 %v1411_v38, %v45_v33  ;;  %v1441_v2 = vadd.f32 %v1440_v56, %v71_v51  ;;  %v210_v5 = vld [vmem:[#allocation3 + $0x5a8] sm:$0xff]  ;;  %v215_v51 = vld [vmem:[#allocation3 + $0x5d0] sm:$0xff] }
  0x36   :  { %v1588_v15 = vadd.f32 %v210_v5, %v209_v4  ;;  %v1525_v19 = vadd.f32 %v1524_v9, %v151_v0  ;;  %v154_v33 = vld [vmem:[#allocation3 + $0x3e8] sm:$0xff]  ;;  %v79_v0 = vld [vmem:[#allocation3 + $0x190] sm:$0xff]  ;;  %v217_v9 = vld [vmem:[#allocation3 + $0x5e0] sm:$0xff] }
  0x37   :  { %v1492_v21 = vadd.f32 %v1491_v12, %v120_v8  ;;  %v1413_v54 = vadd.f32 %v1412_v46, %v46_v41  ;;  %v1442_v10 = vadd.f32 %v1441_v2, %v72_v59  ;;  %v50_v12 = vld [vmem:[#allocation3 + $0xa8] sm:$0xff]  ;;  %v132_v46 = vld [vmem:[#allocation3 + $0x338] sm:$0xff]  ;;  %v173_v2 = vld [vmem:[#allocation3 + $0x480] sm:$0xff] }
  0x38   :  { %v214_v41 = vld [vmem:[#allocation3 + $0x5c8] sm:$0xff] }
  0x39   :  { %v1493_v29 = vadd.f32 %v1492_v21, %v121_v11  ;;  %v1414_v63 = vadd.f32 %v1413_v54, %v47_v49  ;;  %v211_v11 = vld [vmem:[#allocation3 + $0x5b0] sm:$0xff]  ;;  %v212_v21 = vld [vmem:[#allocation3 + $0x5b8] sm:$0xff]  ;;  %v134_v4 = vld [vmem:[#allocation3 + $0x348] sm:$0xff] }
  0x3a   :  { %v1589_v25 = vadd.f32 %v1588_v15, %v211_v11  ;;  %v156_v54 = vld [vmem:[#allocation3 + $0x3f8] sm:$0xff]  ;;  %v135_v11 = vld [vmem:[#allocation3 + $0x350] sm:$0xff] }
  0x3b   :  { %v1494_v37 = vadd.f32 %v1493_v29, %v122_v20  ;;  %v1415_v8 = vadd.f32 %v1414_v63, %v48_v57  ;;  %v1443_v20 = vadd.f32 %v1442_v10, %v73_v3  ;;  %v1526_v29 = vadd.f32 %v1525_v19, %v152_v13  ;;  %v216_v63 = vld [vmem:[#allocation3 + $0x5d8] sm:$0xff]  ;;  %v174_v3 = vld [vmem:[#allocation3 + $0x488] sm:$0xff]  ;;  %v175_v10 = vld [vmem:[#allocation3 + $0x490] sm:$0xff] }
  0x3c   :  { %v1590_v35 = vadd.f32 %v1589_v25, %v212_v21  ;;  %v158_v13 = vld [vmem:[#allocation3 + $0x408] sm:$0xff]  ;;  %v159_v25 = vld [vmem:[#allocation3 + $0x410] sm:$0xff] }
  0x3d   :  { %v1495_v45 = vadd.f32 %v1494_v37, %v123_v28  ;;  %v1416_v18 = vadd.f32 %v1415_v8, %v49_v62  ;;  %v1444_v30 = vadd.f32 %v1443_v20, %v74_v14  ;;  %v1527_v39 = vadd.f32 %v1526_v29, %v153_v23  ;;  %v80_v14 = vld [vmem:[#allocation3 + $0x198] sm:$0xff] }
  0x3e   :  { %v176_v23 = vld [vmem:[#allocation3 + $0x498] sm:$0xff] }
  0x3f   :  { %v1496_v53 = vadd.f32 %v1495_v45, %v124_v36  ;;  %v1417_v28 = vadd.f32 %v1416_v18, %v50_v12  ;;  %v131_v36 = vld [vmem:[#allocation3 + $0x330] sm:$0xff]  ;;  %v1445_v40 = vadd.f32 %v1444_v30, %v75_v24  ;;  %v1591_v45 = vadd.f32 %v1590_v35, %v213_v31  ;;  %v56_v12 = vld [vmem:[#allocation3 + $0xd8] sm:$0xff]  ;;  %v57_v24 = vld [vmem:[#allocation3 + $0xe0] sm:$0xff] }
  0x40   :  { %v1528_v49 = vadd.f32 %v1527_v39, %v154_v33  ;;  %v219_v33 = vld [vmem:[#allocation3 + $0x5f0] sm:$0xff] }
  0x41   :  { %v1497_v61 = vadd.f32 %v1496_v53, %v125_v44  ;;  %v1418_v38 = vadd.f32 %v1417_v28, %v51_v22  ;;  %v77_v44 = vld [vmem:[#allocation3 + $0x180] sm:$0xff]  ;;  %v1446_v50 = vadd.f32 %v1445_v40, %v76_v34  ;;  %v54_v53 = vld [vmem:[#allocation3 + $0xc8] sm:$0xff]  ;;  %v1592_v56 = vadd.f32 %v1591_v45, %v214_v41  ;;  %v220_v45 = vld [vmem:[#allocation3 + $0x5f8] sm:$0xff] }
  0x42   :  { %v218_v22 = vld [vmem:[#allocation3 + $0x5e8] sm:$0xff]  ;;  %v177_v34 = vld [vmem:[#allocation3 + $0x4a0] sm:$0xff] }
  0x43   :  { %v1498_v7 = vadd.f32 %v1497_v61, %v126_v52  ;;  %v1419_v48 = vadd.f32 %v1418_v38, %v52_v32  ;;  %v133_v52 = vld [vmem:[#allocation3 + $0x340] sm:$0xff]  ;;  %v1529_v61 = vadd.f32 %v1528_v49, %v155_v43  ;;  %v1447_v62 = vadd.f32 %v1446_v50, %v77_v44  ;;  %v82_v38 = vld [vmem:[#allocation3 + $0x1a8] sm:$0xff]  ;;  %v83_v49 = vld [vmem:[#allocation3 + $0x1b0] sm:$0xff] }
  0x44   :  { %v1593_v1 = vadd.f32 %v1592_v56, %v215_v51 }
  0x45   :  { %v1499_v17 = vadd.f32 %v1498_v7, %v127_v60  ;;  %v1420_v59 = vadd.f32 %v1419_v48, %v53_v42  ;;  %v157_v60 = vld [vmem:[#allocation3 + $0x400] sm:$0xff]  ;;  %v1530_v7 = vadd.f32 %v1529_v61, %v156_v54  ;;  %v1448_v8 = vadd.f32 %v1447_v62, %v78_v55  ;;  %v163_v61 = vld [vmem:[#allocation3 + $0x430] sm:$0xff]  ;;  %v84_v62 = vld [vmem:[#allocation3 + $0x1b8] sm:$0xff] }
  0x46   :  { %v1594_v15 = vadd.f32 %v1593_v1, %v216_v63  ;;  %v161_v48 = vld [vmem:[#allocation3 + $0x420] sm:$0xff] }
  0x47   :  { %v1500_v27 = vadd.f32 %v1499_v17, %v128_v6  ;;  %v1421_v6 = vadd.f32 %v1420_v59, %v54_v53  ;;  %v136_v17 = vld [vmem:[#allocation3 + $0x358] sm:$0xff]  ;;  %v1531_v20 = vadd.f32 %v1530_v7, %v157_v60  ;;  %v1449_v21 = vadd.f32 %v1448_v8, %v79_v0  ;;  %v61_v59 = vld [vmem:[#allocation3 + $0x100] sm:$0xff]  ;;  %v162_v60 = vld [vmem:[#allocation3 + $0x428] sm:$0xff] }
  0x48   :  { %v1508_v35 = vsel %vm1431_vm0, %v136_v17, 0.0  ;;  %v60_v53 = vld [vmem:[#allocation3 + $0xf8] sm:$0xff]  ;;  %v181_v17 = vld [vmem:[#allocation3 + $0x4c0] sm:$0xff] }
  0x49   :  { %v1501_v37 = vadd.f32 %v1500_v27, %v129_v16  ;;  %v1550_v16 = vadd.f32 %v174_v3, %v173_v2  ;;  %v1422_v19 = vadd.f32 %v1421_v6, %v55_v58  ;;  %v1595_v27 = vadd.f32 %v1594_v15, %v217_v9  ;;  %v179_v58 = vld [vmem:[#allocation3 + $0x4b0] sm:$0xff]  ;;  %v85_v3 = vld [vmem:[#allocation3 + $0x1c0] sm:$0xff]  ;;  %v180_v6 = vld [vmem:[#allocation3 + $0x4b8] sm:$0xff] }
  0x4a   :  { %v1532_v31 = vadd.f32 %v1531_v20, %v158_v13  ;;  %v1450_v32 = vadd.f32 %v1449_v21, %v80_v14  ;;  %v281_v9 = vld [vmem:[#allocation3 + $0x7e0] sm:$0xff]  ;;  %v164_v20 = vld [vmem:[#allocation3 + $0x438] sm:$0xff]  ;;  %v86_v21 = vld [vmem:[#allocation3 + $0x1c8] sm:$0xff] }
  0x4b   :  { %v1502_v47 = vadd.f32 %v1501_v37, %v130_v26  ;;  %v81_v26 = vld [vmem:[#allocation3 + $0x1a0] sm:$0xff]  ;;  %v1551_v28 = vadd.f32 %v1550_v16, %v175_v10  ;;  %v1423_v30 = vadd.f32 %v1422_v19, %v56_v12  ;;  %v160_v37 = vld [vmem:[#allocation3 + $0x418] sm:$0xff]  ;;  %v1596_v39 = vadd.f32 %v1595_v27, %v218_v22  ;;  %v282_v10 = vld [vmem:[#allocation3 + $0x7e8] sm:$0xff] }
  0x4c   :  { %v1533_v43 = vadd.f32 %v1532_v31, %v159_v25  ;;  %v1451_v44 = vadd.f32 %v1450_v32, %v81_v26  ;;  %v62_v12 = vld [vmem:[#allocation3 + $0x108] sm:$0xff]  ;;  %v223_v16 = vld [vmem:[#allocation3 + $0x610] sm:$0xff]  ;;  %v64_v25 = vld [vmem:[#allocation3 + $0x118] sm:$0xff] }
  0x4d   :  { %v1503_v57 = vadd.f32 %v1502_v47, %v131_v36  ;;  %v58_v36 = vld [vmem:[#allocation3 + $0xe8] sm:$0xff]  ;;  %v1552_v40 = vadd.f32 %v1551_v28, %v176_v23  ;;  %v1424_v42 = vadd.f32 %v1423_v30, %v57_v24  ;;  %v59_v47 = vld [vmem:[#allocation3 + $0xf0] sm:$0xff]  ;;  %v1597_v50 = vadd.f32 %v1596_v39, %v219_v33  ;;  %v284_v24 = vld [vmem:[#allocation3 + $0x7f8] sm:$0xff] }
  0x4e   :  { %v1534_v55 = vadd.f32 %v1533_v43, %v160_v37  ;;  %v1452_v56 = vadd.f32 %v1451_v44, %v82_v38  ;;  %v63_v19 = vld [vmem:[#allocation3 + $0x110] sm:$0xff]  ;;  %v182_v30 = vld [vmem:[#allocation3 + $0x4c8] sm:$0xff]  ;;  %v165_v32 = vld [vmem:[#allocation3 + $0x440] sm:$0xff]  ;;  %v1432_v43 = vsel %vm1431_vm0, %v64_v25, 0.0 }
  0x4f   :  { %v1504_v5 = vadd.f32 %v1503_v57, %v132_v46  ;;  %v178_v46 = vld [vmem:[#allocation3 + $0x4a8] sm:$0xff]  ;;  %v1553_v51 = vadd.f32 %v1552_v40, %v177_v34  ;;  %v1425_v54 = vadd.f32 %v1424_v42, %v58_v36  ;;  %v221_v57 = vld [vmem:[#allocation3 + $0x600] sm:$0xff]  ;;  %v1598_v63 = vadd.f32 %v1597_v50, %v220_v45  ;;  %v87_v33 = vld [vmem:[#allocation3 + $0x1d0] sm:$0xff] }
  0x50   :  { %v1535_v2 = vadd.f32 %v1534_v55, %v161_v48  ;;  %v285_v36 = vld [vmem:[#allocation3 + $0x800] sm:$0xff]  ;;  %v166_v44 = vld [vmem:[#allocation3 + $0x448] sm:$0xff]  ;;  %v88_v45 = vld [vmem:[#allocation3 + $0x1d8] sm:$0xff] }
  0x51   :  { %v1505_v18 = vadd.f32 %v1504_v5, %v133_v52  ;;  %v1554_v0 = vadd.f32 %v1553_v51, %v178_v46  ;;  %v1426_v1 = vadd.f32 %v1425_v54, %v59_v47  ;;  %v222_v5 = vld [vmem:[#allocation3 + $0x608] sm:$0xff]  ;;  %v1599_v7 = vadd.f32 %v1598_v63, %v221_v57  ;;  %v225_v40 = vld [vmem:[#allocation3 + $0x620] sm:$0xff]  ;;  %v167_v55 = vld [vmem:[#allocation3 + $0x450] sm:$0xff] }
  0x52   :  { %v1536_v14 = vadd.f32 %v1535_v2, %v162_v60  ;;  %v286_v48 = vld [vmem:[#allocation3 + $0x808] sm:$0xff] }
  0x53   :  { %v1506_v29 = vadd.f32 %v1505_v18, %v134_v4  ;;  %v1453_v4 = vadd.f32 %v1452_v56, %v83_v49  ;;  %v1555_v8 = vadd.f32 %v1554_v0, %v179_v58  ;;  %v1427_v13 = vadd.f32 %v1426_v1, %v60_v53  ;;  %v184_v53 = vld [vmem:[#allocation3 + $0x4d8] sm:$0xff]  ;;  %v89_v56 = vld [vmem:[#allocation3 + $0x1e0] sm:$0xff]  ;;  %v227_v0 = vld [vmem:[#allocation3 + $0x630] sm:$0xff] }
  0x54   :  { %v1664_v18 = vadd.f32 %v282_v10, %v281_v9  ;;  %v1600_v22 = vadd.f32 %v1599_v7, %v222_v5  ;;  %v1537_v27 = vadd.f32 %v1536_v14, %v163_v61  ;;  %v168_v61 = vld [vmem:[#allocation3 + $0x458] sm:$0xff]  ;;  %v185_v1 = vld [vmem:[#allocation3 + $0x4e0] sm:$0xff]  ;;  %v91_v5 = vld [vmem:[#allocation3 + $0x1f0] sm:$0xff] }
  0x55   :  { %v1507_v41 = vadd.f32 %v1506_v29, %v135_v11  ;;  %v283_v11 = vld [vmem:[#allocation3 + $0x7f0] sm:$0xff]  ;;  %v1454_v15 = vadd.f32 %v1453_v4, %v84_v62  ;;  %v1556_v23 = vadd.f32 %v1555_v8, %v180_v6  ;;  %v1428_v26 = vadd.f32 %v1427_v13, %v61_v59  ;;  %v224_v29 = vld [vmem:[#allocation3 + $0x618] sm:$0xff]  ;;  %v90_v4 = vld [vmem:[#allocation3 + $0x1e8] sm:$0xff] }
  0x56   :  { %v1665_v31 = vadd.f32 %v1664_v18, %v283_v11  ;;  %v1601_v34 = vadd.f32 %v1600_v22, %v223_v16  ;;  %v1538_v38 = vadd.f32 %v1537_v27, %v164_v20  ;;  %v287_v59 = vld [vmem:[#allocation3 + $0x810] sm:$0xff]  ;;  %v288_v8 = vld [vmem:[#allocation3 + $0x818] sm:$0xff]  ;;  %v289_v13 = vld [vmem:[#allocation3 + $0x820] sm:$0xff] }
  0x57   :  { %v1509_v52 = vadd.f32 %v1508_v35, %v1507_v41  ;;  %v1455_v28 = vadd.f32 %v1454_v15, %v85_v3  ;;  %v1557_v35 = vadd.f32 %v1556_v23, %v181_v17  ;;  %v1429_v37 = vadd.f32 %v1428_v26, %v62_v12  ;;  %v183_v41 = vld [vmem:[#allocation3 + $0x4d0] sm:$0xff]  ;;  %v169_v3 = vld [vmem:[#allocation3 + $0x460] sm:$0xff]  ;;  %v228_v11 = vld [vmem:[#allocation3 + $0x638] sm:$0xff] }
  0x58   :  { %v1666_v42 = vadd.f32 %v1665_v31, %v284_v24  ;;  %v1602_v46 = vadd.f32 %v1601_v34, %v224_v29  ;;  %v1539_v50 = vadd.f32 %v1538_v38, %v165_v32  ;;  %v186_v12 = vld [vmem:[#allocation3 + $0x4e8] sm:$0xff]  ;;  %v245_v17 = vld [vmem:[#allocation3 + $0x6c0] sm:$0xff]  ;;  %v187_v24 = vld [vmem:[#allocation3 + $0x4f0] sm:$0xff] }
  0x59   :  { %1510 = vadd.xlane.f32.xlu1 %v1509_v52  ;;  %v1456_v39 = vadd.f32 %v1455_v28, %v86_v21  ;;  %v1558_v47 = vadd.f32 %v1557_v35, %v182_v30  ;;  %v1430_v49 = vadd.f32 %v1429_v37, %v63_v19  ;;  %v226_v52 = vld [vmem:[#allocation3 + $0x628] sm:$0xff]  ;;  %v247_v19 = vld [vmem:[#allocation3 + $0x6d0] sm:$0xff]  ;;  %v229_v23 = vld [vmem:[#allocation3 + $0x640] sm:$0xff] }
  0x5a   :  { %v1667_v54 = vadd.f32 %v1666_v42, %v285_v36  ;;  %v1603_v57 = vadd.f32 %v1602_v46, %v225_v40  ;;  %v1540_v62 = vadd.f32 %v1539_v50, %v166_v44  ;;  %v246_v18 = vld [vmem:[#allocation3 + $0x6c8] sm:$0xff]  ;;  %v171_v27 = vld [vmem:[#allocation3 + $0x470] sm:$0xff]  ;;  %v92_v28 = vld [vmem:[#allocation3 + $0x1f8] sm:$0xff] }
  0x5b   :  { %v1457_v51 = vadd.f32 %v1456_v39, %v87_v33  ;;  %v1559_v58 = vadd.f32 %v1558_v47, %v183_v41  ;;  %v1433_v60 = vadd.f32 %v1432_v43, %v1430_v49  ;;  %v170_v20 = vld [vmem:[#allocation3 + $0x468] sm:$0xff]  ;;  %v1626_v26 = vadd.f32 %v246_v18, %v245_v17  ;;  %v248_v32 = vld [vmem:[#allocation3 + $0x6d8] sm:$0xff]  ;;  %v93_v40 = vld [vmem:[#allocation3 + $0x200] sm:$0xff] }
  0x5c   :  { %v1668_v2 = vadd.f32 %v1667_v54, %v286_v48  ;;  %v1604_v6 = vadd.f32 %v1603_v57, %v226_v52  ;;  %v1541_v9 = vadd.f32 %v1540_v62, %v167_v55  ;;  %v290_v31 = vld [vmem:[#allocation3 + $0x828] sm:$0xff]  ;;  %v172_v33 = vld [vmem:[#allocation3 + $0x478] sm:$0xff]  ;;  %v291_v43 = vld [vmem:[#allocation3 + $0x830] sm:$0xff] }
  0x5d   :  { %v1458_v63 = vadd.f32 %v1457_v51, %v88_v45  ;;  %v1560_v7 = vadd.f32 %v1559_v58, %v184_v53  ;;  %1434 = vadd.xlane.f32.xlu0 %v1433_v60  ;;  %v230_v36 = vld [vmem:[#allocation3 + $0x648] sm:$0xff]  ;;  %v188_v37 = vld [vmem:[#allocation3 + $0x4f8] sm:$0xff]  ;;  %v1627_v39 = vadd.f32 %v1626_v26, %v247_v19  ;;  %v249_v44 = vld [vmem:[#allocation3 + $0x6e0] sm:$0xff]  ;;  %v1546_v51 = vsel %vm1431_vm0, %v172_v33, 0.0 }
  0x5e   :  { %v1669_v14 = vadd.f32 %v1668_v2, %v287_v59  ;;  %v1605_v15 = vadd.f32 %v1604_v6, %v227_v0  ;;  %v1542_v21 = vadd.f32 %v1541_v9, %v168_v61  ;;  %v231_v47 = vld [vmem:[#allocation3 + $0x650] sm:$0xff]  ;;  %v189_v48 = vld [vmem:[#allocation3 + $0x500] sm:$0xff]  ;;  %v94_v52 = vld [vmem:[#allocation3 + $0x208] sm:$0xff] }
  0x5f   :  { %v1459_v10 = vadd.f32 %v1458_v63, %v89_v56  ;;  %v1561_v16 = vadd.f32 %v1560_v7, %v185_v1  ;;  %v1628_v50 = vadd.f32 %v1627_v39, %v248_v32  ;;  %v292_v55 = vld [vmem:[#allocation3 + $0x838] sm:$0xff]  ;;  %v250_v56 = vld [vmem:[#allocation3 + $0x6e8] sm:$0xff]  ;;  %v95_v63 = vld [vmem:[#allocation3 + $0x210] sm:$0xff] }
  0x60   :  { %v1670_v25 = vadd.f32 %v1669_v14, %v288_v8  ;;  %v1606_v29 = vadd.f32 %v1605_v15, %v228_v11  ;;  %v1543_v34 = vadd.f32 %v1542_v21, %v169_v3  ;;  %v232_v59 = vld [vmem:[#allocation3 + $0x658] sm:$0xff]  ;;  %v190_v60 = vld [vmem:[#allocation3 + $0x508] sm:$0xff]  ;;  %v293_v2 = vld [vmem:[#allocation3 + $0x840] sm:$0xff] }
  0x61   :  { %v1460_v22 = vadd.f32 %v1459_v10, %v90_v4  ;;  %v1562_v30 = vadd.f32 %v1561_v16, %v186_v12  ;;  %v1629_v62 = vadd.f32 %v1628_v50, %v249_v44  ;;  %v251_v3 = vld [vmem:[#allocation3 + $0x6f0] sm:$0xff]  ;;  %v233_v7 = vld [vmem:[#allocation3 + $0x660] sm:$0xff]  ;;  %v234_v12 = vld [vmem:[#allocation3 + $0x668] sm:$0xff] }
  0x62   :  { %v1671_v38 = vadd.f32 %v1670_v25, %v289_v13  ;;  %v1607_v41 = vadd.f32 %v1606_v29, %v229_v23  ;;  %v1544_v45 = vadd.f32 %v1543_v34, %v170_v20  ;;  %v191_v8 = vld [vmem:[#allocation3 + $0x510] sm:$0xff]  ;;  %v97_v11 = vld [vmem:[#allocation3 + $0x220] sm:$0xff]  ;;  %v294_v15 = vld [vmem:[#allocation3 + $0x848] sm:$0xff] }
  0x63   :  { %v1461_v35 = vadd.f32 %v1460_v22, %v91_v5  ;;  %v1563_v42 = vadd.f32 %v1562_v30, %v187_v24  ;;  %v96_v5 = vld [vmem:[#allocation3 + $0x218] sm:$0xff]  ;;  %v1630_v10 = vadd.f32 %v1629_v62, %v250_v56  ;;  %v295_v19 = vld [vmem:[#allocation3 + $0x850] sm:$0xff]  ;;  %v253_v21 = vld [vmem:[#allocation3 + $0x700] sm:$0xff] }
  0x64   :  { %v1672_v49 = vadd.f32 %v1671_v38, %v290_v31  ;;  %v1608_v53 = vadd.f32 %v1607_v41, %v230_v36  ;;  %v1545_v57 = vadd.f32 %v1544_v45, %v171_v27  ;;  %v252_v16 = vld [vmem:[#allocation3 + $0x6f8] sm:$0xff]  ;;  %v353_v25 = vld [vmem:[#allocation3 + $0xa20] sm:$0xff]  ;;  %v354_v26 = vld [vmem:[#allocation3 + $0xa28] sm:$0xff] }
  0x65   :  { %v1462_v46 = vadd.f32 %v1461_v35, %v92_v28  ;;  %v1564_v54 = vadd.f32 %v1563_v42, %v188_v37  ;;  %v192_v18 = vld [vmem:[#allocation3 + $0x518] sm:$0xff]  ;;  %v1631_v22 = vadd.f32 %v1630_v10, %v251_v3  ;;  %v355_v27 = vld [vmem:[#allocation3 + $0xa30] sm:$0xff]  ;;  %v98_v28 = vld [vmem:[#allocation3 + $0x228] sm:$0xff]  ;;  %v1740_v34 = vadd.f32 %v354_v26, %v353_v25 }
  0x66   :  { %v1673_v61 = vadd.f32 %v1672_v49, %v291_v43  ;;  %v1609_v0 = vadd.f32 %v1608_v53, %v231_v47  ;;  %v1547_v4 = vadd.f32 %v1546_v51, %v1545_v57  ;;  %v235_v30 = vld [vmem:[#allocation3 + $0x670] sm:$0xff]  ;;  %v193_v31 = vld [vmem:[#allocation3 + $0x520] sm:$0xff]  ;;  %v296_v38 = vld [vmem:[#allocation3 + $0x858] sm:$0xff] }
  0x67   :  { %v1463_v58 = vadd.f32 %v1462_v46, %v93_v40  ;;  %v1565_v1 = vadd.f32 %v1564_v54, %v189_v48  ;;  %v1632_v33 = vadd.f32 %v1631_v22, %v252_v16  ;;  %v99_v35 = vld [vmem:[#allocation3 + $0x230] sm:$0xff]  ;;  %v254_v39 = vld [vmem:[#allocation3 + $0x708] sm:$0xff]  ;;  %v356_v40 = vld [vmem:[#allocation3 + $0xa38] sm:$0xff]  ;;  %v1741_v47 = vadd.f32 %v1740_v34, %v355_v27 }
  0x68   :  { %v1674_v9 = vadd.f32 %v1673_v61, %v292_v55  ;;  %v1610_v13 = vadd.f32 %v1609_v0, %v232_v59  ;;  %1548 = vadd.xlane.f32.xlu1 %v1547_v4  ;;  %v100_v41 = vld [vmem:[#allocation3 + $0x238] sm:$0xff]  ;;  %v194_v44 = vld [vmem:[#allocation3 + $0x528] sm:$0xff]  ;;  %v297_v50 = vld [vmem:[#allocation3 + $0x860] sm:$0xff] }
  0x69   :  { %v1464_v6 = vadd.f32 %v1463_v58, %v94_v52  ;;  %v1566_v14 = vadd.f32 %v1565_v1, %v190_v60  ;;  %v236_v43 = vld [vmem:[#allocation3 + $0x678] sm:$0xff]  ;;  %v1633_v46 = vadd.f32 %v1632_v33, %v253_v21  ;;  %v255_v51 = vld [vmem:[#allocation3 + $0x710] sm:$0xff]  ;;  %v357_v52 = vld [vmem:[#allocation3 + $0xa40] sm:$0xff]  ;;  %v1742_v58 = vadd.f32 %v1741_v47, %v356_v40 }
  0x6a   :  { %v1675_v20 = vadd.f32 %v1674_v9, %v293_v2  ;;  %v1611_v23 = vadd.f32 %v1610_v13, %v233_v7  ;;  %v237_v54 = vld [vmem:[#allocation3 + $0x680] sm:$0xff]  ;;  %v195_v55 = vld [vmem:[#allocation3 + $0x530] sm:$0xff]  ;;  %v1470_v59 = vsel %vm1431_vm0, %v100_v41, 0.0  ;;  %v298_v62 = vld [vmem:[#allocation3 + $0x868] sm:$0xff] }
  0x6b   :  { %v1465_v17 = vadd.f32 %v1464_v6, %v95_v63  ;;  %v1567_v24 = vadd.f32 %v1566_v14, %v191_v8  ;;  %v1634_v57 = vadd.f32 %v1633_v46, %v254_v39  ;;  %v256_v63 = vld [vmem:[#allocation3 + $0x718] sm:$0xff]  ;;  %v358_v0 = vld [vmem:[#allocation3 + $0xa48] sm:$0xff]  ;;  %v239_v3 = vld [vmem:[#allocation3 + $0x690] sm:$0xff]  ;;  %v1743_v7 = vadd.f32 %v1742_v58, %v357_v52 }
  0x6c   :  { %v1676_v32 = vadd.f32 %v1675_v20, %v294_v15  ;;  %v1612_v36 = vadd.f32 %v1611_v23, %v234_v12  ;;  %v238_v2 = vld [vmem:[#allocation3 + $0x688] sm:$0xff]  ;;  %v196_v4 = vld [vmem:[#allocation3 + $0x538] sm:$0xff]  ;;  %v299_v10 = vld [vmem:[#allocation3 + $0x870] sm:$0xff] }
  0x6d   :  { %v1466_v29 = vadd.f32 %v1465_v17, %v96_v5  ;;  %v1568_v37 = vadd.f32 %v1567_v24, %v192_v18  ;;  %v1635_v6 = vadd.f32 %v1634_v57, %v255_v51  ;;  %v359_v12 = vld [vmem:[#allocation3 + $0xa50] sm:$0xff]  ;;  %v240_v14 = vld [vmem:[#allocation3 + $0x698] sm:$0xff]  ;;  %v197_v15 = vld [vmem:[#allocation3 + $0x540] sm:$0xff] }
  0x6e   :  { %v1677_v45 = vadd.f32 %v1676_v32, %v295_v19  ;;  %v1613_v48 = vadd.f32 %v1612_v36, %v235_v30  ;;  %v198_v16 = vld [vmem:[#allocation3 + $0x548] sm:$0xff]  ;;  %v1744_v19 = vadd.f32 %v1743_v7, %v358_v0  ;;  %v300_v22 = vld [vmem:[#allocation3 + $0x878] sm:$0xff]  ;;  %v241_v25 = vld [vmem:[#allocation3 + $0x6a0] sm:$0xff] }
  0x6f   :  { %v1467_v42 = vadd.f32 %v1466_v29, %v97_v11  ;;  %v1569_v49 = vadd.f32 %v1568_v37, %v193_v31  ;;  %v257_v11 = vld [vmem:[#allocation3 + $0x720] sm:$0xff]  ;;  %v1636_v18 = vadd.f32 %v1635_v6, %v256_v63  ;;  %v258_v23 = vld [vmem:[#allocation3 + $0x728] sm:$0xff]  ;;  %v360_v24 = vld [vmem:[#allocation3 + $0xa58] sm:$0xff] }
  0x70   :  { %v1678_v56 = vadd.f32 %v1677_v45, %v296_v38  ;;  %v1614_v60 = vadd.f32 %v1613_v48, %v236_v43  ;;  %v301_v26 = vld [vmem:[#allocation3 + $0x880] sm:$0xff]  ;;  %v1745_v31 = vadd.f32 %v1744_v19, %v359_v12  ;;  %v319_v36 = vld [vmem:[#allocation3 + $0x910] sm:$0xff]  ;;  %v242_v37 = vld [vmem:[#allocation3 + $0x6a8] sm:$0xff] }
  0x71   :  { %v1468_v53 = vadd.f32 %v1467_v42, %v98_v28  ;;  %v1570_v61 = vadd.f32 %v1569_v49, %v194_v44  ;;  %v259_v28 = vld [vmem:[#allocation3 + $0x730] sm:$0xff]  ;;  %v1637_v29 = vadd.f32 %v1636_v18, %v257_v11  ;;  %v361_v30 = vld [vmem:[#allocation3 + $0xa60] sm:$0xff]  ;;  %v302_v39 = vld [vmem:[#allocation3 + $0x888] sm:$0xff] }
  0x72   :  { %v1679_v5 = vadd.f32 %v1678_v56, %v297_v50  ;;  %v1615_v8 = vadd.f32 %v1614_v60, %v237_v54  ;;  %v317_v34 = vld [vmem:[#allocation3 + $0x900] sm:$0xff]  ;;  %v199_v38 = vld [vmem:[#allocation3 + $0x550] sm:$0xff]  ;;  %v1746_v42 = vadd.f32 %v1745_v31, %v360_v24  ;;  %v260_v46 = vld [vmem:[#allocation3 + $0x738] sm:$0xff] }
  0x73   :  { %v1469_v1 = vadd.f32 %v1468_v53, %v99_v35  ;;  %v1571_v9 = vadd.f32 %v1570_v61, %v195_v55  ;;  %v318_v35 = vld [vmem:[#allocation3 + $0x908] sm:$0xff]  ;;  %v1638_v41 = vadd.f32 %v1637_v29, %v258_v23  ;;  %v320_v48 = vld [vmem:[#allocation3 + $0x918] sm:$0xff]  ;;  %v303_v51 = vld [vmem:[#allocation3 + $0x890] sm:$0xff] }
  0x74   :  { %v1680_v17 = vadd.f32 %v1679_v5, %v298_v62  ;;  %v1616_v20 = vadd.f32 %v1615_v8, %v238_v2  ;;  %v1702_v43 = vadd.f32 %v318_v35, %v317_v34  ;;  %v362_v47 = vld [vmem:[#allocation3 + $0xa68] sm:$0xff]  ;;  %v244_v49 = vld [vmem:[#allocation3 + $0x6b8] sm:$0xff]  ;;  %v1747_v54 = vadd.f32 %v1746_v42, %v361_v30  ;;  %v261_v58 = vld [vmem:[#allocation3 + $0x740] sm:$0xff] }
  0x75   :  { %v1471_v13 = vadd.f32 %v1470_v59, %v1469_v1  ;;  %v1572_v21 = vadd.f32 %v1571_v9, %v196_v4  ;;  %v200_v50 = vld [vmem:[#allocation3 + $0x558] sm:$0xff]  ;;  %v1639_v53 = vadd.f32 %v1638_v41, %v259_v28  ;;  %v363_v59 = vld [vmem:[#allocation3 + $0xa70] sm:$0xff]  ;;  %v321_v60 = vld [vmem:[#allocation3 + $0x920] sm:$0xff]  ;;  %v1622_v5 = vsel %vm1431_vm0, %v244_v49, 0.0 }
  0x76   :  { %v1681_v27 = vadd.f32 %v1680_v17, %v299_v10  ;;  %v1617_v32 = vadd.f32 %v1616_v20, %v239_v3  ;;  %v1703_v55 = vadd.f32 %v1702_v43, %v319_v36  ;;  %v243_v61 = vld [vmem:[#allocation3 + $0x6b0] sm:$0xff]  ;;  %v201_v62 = vld [vmem:[#allocation3 + $0x560] sm:$0xff]  ;;  %v304_v63 = vld [vmem:[#allocation3 + $0x898] sm:$0xff]  ;;  %v1748_v2 = vadd.f32 %v1747_v54, %v362_v47 }
  0x77   :  { %1472 = vadd.xlane.f32.xlu0 %v1471_v13  ;;  %v1573_v33 = vadd.f32 %v1572_v21, %v197_v15  ;;  %v1640_v1 = vadd.f32 %v1639_v53, %v260_v46  ;;  %v262_v7 = vld [vmem:[#allocation3 + $0x748] sm:$0xff]  ;;  %v364_v8 = vld [vmem:[#allocation3 + $0xa78] sm:$0xff]  ;;  %v305_v11 = vld [vmem:[#allocation3 + $0x8a0] sm:$0xff] }
  0x78   :  { %v1682_v40 = vadd.f32 %v1681_v27, %v300_v22  ;;  %v1618_v44 = vadd.f32 %v1617_v32, %v240_v14  ;;  %v1704_v3 = vadd.f32 %v1703_v55, %v320_v48  ;;  %v322_v9 = vld [vmem:[#allocation3 + $0x928] sm:$0xff]  ;;  %v1749_v14 = vadd.f32 %v1748_v2, %v363_v59  ;;  %v263_v18 = vld [vmem:[#allocation3 + $0x750] sm:$0xff]  ;;  %v365_v19 = vld [vmem:[#allocation3 + $0xa80] sm:$0xff] }
  0x79   :  { %v1574_v45 = vadd.f32 %v1573_v33, %v198_v16  ;;  %v202_v10 = vld [vmem:[#allocation3 + $0x568] sm:$0xff]  ;;  %v1641_v13 = vadd.f32 %v1640_v1, %v261_v58  ;;  %v323_v20 = vld [vmem:[#allocation3 + $0x930] sm:$0xff]  ;;  %v204_v22 = vld [vmem:[#allocation3 + $0x578] sm:$0xff] }
  0x7a   :  { %v1683_v52 = vadd.f32 %v1682_v40, %v301_v26  ;;  %v1619_v56 = vadd.f32 %v1618_v44, %v241_v25  ;;  %v1705_v15 = vadd.f32 %v1704_v3, %v321_v60  ;;  %v203_v21 = vld [vmem:[#allocation3 + $0x570] sm:$0xff]  ;;  %v306_v23 = vld [vmem:[#allocation3 + $0x8a8] sm:$0xff]  ;;  %v1750_v26 = vadd.f32 %v1749_v14, %v364_v8  ;;  %v264_v30 = vld [vmem:[#allocation3 + $0x758] sm:$0xff] }
  0x7b   :  { %v1575_v57 = vadd.f32 %v1574_v45, %v199_v38  ;;  %v1642_v25 = vadd.f32 %v1641_v13, %v262_v7  ;;  %v366_v31 = vld [vmem:[#allocation3 + $0xa88] sm:$0xff]  ;;  %v324_v32 = vld [vmem:[#allocation3 + $0x938] sm:$0xff]  ;;  %v205_v33 = vld [vmem:[#allocation3 + $0x580] sm:$0xff] }
  0x7c   :  { %v1684_v0 = vadd.f32 %v1683_v52, %v302_v39  ;;  %v1620_v4 = vadd.f32 %v1619_v56, %v242_v37  ;;  %v1706_v27 = vadd.f32 %v1705_v15, %v322_v9  ;;  %v307_v34 = vld [vmem:[#allocation3 + $0x8b0] sm:$0xff]  ;;  %v265_v36 = vld [vmem:[#allocation3 + $0x760] sm:$0xff]  ;;  %v1751_v39 = vadd.f32 %v1750_v26, %v365_v19  ;;  %v426_v44 = vld [vmem:[#allocation3 + $0xc68] sm:$0xff] }
  0x7d   :  { %v1576_v6 = vadd.f32 %v1575_v57, %v200_v50  ;;  %v1643_v37 = vadd.f32 %v1642_v25, %v263_v18  ;;  %v367_v38 = vld [vmem:[#allocation3 + $0xa90] sm:$0xff]  ;;  %v325_v42 = vld [vmem:[#allocation3 + $0x940] sm:$0xff]  ;;  %v206_v45 = vld [vmem:[#allocation3 + $0x588] sm:$0xff] }
  0x7e   :  { %v1685_v12 = vadd.f32 %v1684_v0, %v303_v51  ;;  %v1621_v16 = vadd.f32 %v1620_v4, %v243_v61  ;;  %v1707_v40 = vadd.f32 %v1706_v27, %v323_v20  ;;  %v425_v43 = vld [vmem:[#allocation3 + $0xc60] sm:$0xff]  ;;  %v308_v46 = vld [vmem:[#allocation3 + $0x8b8] sm:$0xff]  ;;  %v1752_v49 = vadd.f32 %v1751_v39, %v366_v31  ;;  %v427_v51 = vld [vmem:[#allocation3 + $0xc70] sm:$0xff] }
  0x7f   :  { %v1577_v17 = vadd.f32 %v1576_v6, %v201_v62  ;;  %v1644_v48 = vadd.f32 %v1643_v37, %v264_v30  ;;  %v266_v53 = vld [vmem:[#allocation3 + $0x768] sm:$0xff]  ;;  %v368_v54 = vld [vmem:[#allocation3 + $0xa98] sm:$0xff]  ;;  %v1816_v56 = vadd.f32 %v426_v44, %v425_v43  ;;  %v309_v58 = vld [vmem:[#allocation3 + $0x8c0] sm:$0xff] }
  0x80   :  { %v1686_v24 = vadd.f32 %v1685_v12, %v304_v63  ;;  %v1623_v28 = vadd.f32 %v1622_v5, %v1621_v16  ;;  %v1708_v50 = vadd.f32 %v1707_v40, %v324_v32  ;;  %v326_v55 = vld [vmem:[#allocation3 + $0x948] sm:$0xff]  ;;  %v208_v57 = vld [vmem:[#allocation3 + $0x598] sm:$0xff]  ;;  %v1753_v61 = vadd.f32 %v1752_v49, %v367_v38  ;;  %v267_v1 = vld [vmem:[#allocation3 + $0x770] sm:$0xff] }
  0x81   :  { %v1578_v29 = vadd.f32 %v1577_v17, %v202_v10  ;;  %v1645_v60 = vadd.f32 %v1644_v48, %v265_v36  ;;  %v428_v63 = vld [vmem:[#allocation3 + $0xc78] sm:$0xff]  ;;  %v369_v2 = vld [vmem:[#allocation3 + $0xaa0] sm:$0xff]  ;;  %v327_v3 = vld [vmem:[#allocation3 + $0x950] sm:$0xff]  ;;  %v1817_v4 = vadd.f32 %v1816_v56, %v427_v51  ;;  %v1584_v13 = vsel %vm1431_vm0, %v208_v57, 0.0 }
  0x82   :  { %v1687_v35 = vadd.f32 %v1686_v24, %v305_v11  ;;  %1624 = vadd.xlane.f32.xlu1 %v1623_v28  ;;  %v1709_v62 = vadd.f32 %v1708_v50, %v325_v42  ;;  %v207_v5 = vld [vmem:[#allocation3 + $0x590] sm:$0xff]  ;;  %v310_v6 = vld [vmem:[#allocation3 + $0x8c8] sm:$0xff]  ;;  %v1754_v9 = vadd.f32 %v1753_v61, %v368_v54  ;;  %v429_v11 = vld [vmem:[#allocation3 + $0xc80] sm:$0xff] }
  0x83   :  { %v1579_v41 = vadd.f32 %v1578_v29, %v203_v21  ;;  %v1646_v8 = vadd.f32 %v1645_v60, %v266_v53  ;;  %v268_v14 = vld [vmem:[#allocation3 + $0x778] sm:$0xff]  ;;  %v370_v15 = vld [vmem:[#allocation3 + $0xaa8] sm:$0xff]  ;;  %v1818_v17 = vadd.f32 %v1817_v4, %v428_v63  ;;  %v311_v18 = vld [vmem:[#allocation3 + $0x8d0] sm:$0xff] }
  0x84   :  { %v1688_v47 = vadd.f32 %v1687_v35, %v306_v23  ;;  %v1710_v10 = vadd.f32 %v1709_v62, %v326_v55  ;;  %v328_v16 = vld [vmem:[#allocation3 + $0x958] sm:$0xff]  ;;  %v1755_v21 = vadd.f32 %v1754_v9, %v369_v2  ;;  %v430_v23 = vld [vmem:[#allocation3 + $0xc88] sm:$0xff]  ;;  %v269_v25 = vld [vmem:[#allocation3 + $0x780] sm:$0xff] }
  0x85   :  { %v1580_v52 = vadd.f32 %v1579_v41, %v204_v22  ;;  %v1647_v20 = vadd.f32 %v1646_v8, %v267_v1  ;;  %v371_v26 = vld [vmem:[#allocation3 + $0xab0] sm:$0xff]  ;;  %v329_v27 = vld [vmem:[#allocation3 + $0x960] sm:$0xff]  ;;  %v1819_v28 = vadd.f32 %v1818_v17, %v429_v11  ;;  %v312_v29 = vld [vmem:[#allocation3 + $0x8d8] sm:$0xff] }
  0x86   :  { %v1689_v59 = vadd.f32 %v1688_v47, %v307_v34  ;;  %v1711_v22 = vadd.f32 %v1710_v10, %v327_v3  ;;  %v1756_v32 = vadd.f32 %v1755_v21, %v370_v15  ;;  %v431_v34 = vld [vmem:[#allocation3 + $0xc90] sm:$0xff]  ;;  %v313_v36 = vld [vmem:[#allocation3 + $0x8e0] sm:$0xff]  ;;  %v270_v37 = vld [vmem:[#allocation3 + $0x788] sm:$0xff] }
  0x87   :  { %v1581_v0 = vadd.f32 %v1580_v52, %v205_v33  ;;  %v1648_v31 = vadd.f32 %v1647_v20, %v268_v14  ;;  %v372_v38 = vld [vmem:[#allocation3 + $0xab8] sm:$0xff]  ;;  %v330_v39 = vld [vmem:[#allocation3 + $0x968] sm:$0xff]  ;;  %v1820_v40 = vadd.f32 %v1819_v28, %v430_v23  ;;  %v271_v42 = vld [vmem:[#allocation3 + $0x790] sm:$0xff] }
  0x88   :  { %v1690_v7 = vadd.f32 %v1689_v59, %v308_v46  ;;  %v1712_v33 = vadd.f32 %v1711_v22, %v328_v16  ;;  %v373_v44 = vld [vmem:[#allocation3 + $0xac0] sm:$0xff]  ;;  %v432_v47 = vld [vmem:[#allocation3 + $0xc98] sm:$0xff]  ;;  %v331_v48 = vld [vmem:[#allocation3 + $0x970] sm:$0xff] }
  0x89   :  { %v1582_v12 = vadd.f32 %v1581_v0, %v206_v45  ;;  %v1649_v43 = vadd.f32 %v1648_v31, %v269_v25  ;;  %v1757_v45 = vadd.f32 %v1756_v32, %v371_v26  ;;  %v1821_v49 = vadd.f32 %v1820_v40, %v431_v34  ;;  %v389_v50 = vld [vmem:[#allocation3 + $0xb40] sm:$0xff]  ;;  %v390_v51 = vld [vmem:[#allocation3 + $0xb48] sm:$0xff]  ;;  %v315_v59 = vld [vmem:[#allocation3 + $0x8f0] sm:$0xff] }
  0x8a   :  { %v1691_v19 = vadd.f32 %v1690_v7, %v309_v58  ;;  %v1713_v46 = vadd.f32 %v1712_v33, %v329_v27  ;;  %v314_v52 = vld [vmem:[#allocation3 + $0x8e8] sm:$0xff]  ;;  %v433_v57 = vld [vmem:[#allocation3 + $0xca0] sm:$0xff]  ;;  %v391_v58 = vld [vmem:[#allocation3 + $0xb50] sm:$0xff]  ;;  %v1778_v0 = vadd.f32 %v390_v51, %v389_v50 }
  0x8b   :  { %v1583_v24 = vadd.f32 %v1582_v12, %v207_v5  ;;  %v1650_v54 = vadd.f32 %v1649_v43, %v270_v37  ;;  %v1758_v55 = vadd.f32 %v1757_v45, %v372_v38  ;;  %v272_v60 = vld [vmem:[#allocation3 + $0x798] sm:$0xff]  ;;  %v374_v61 = vld [vmem:[#allocation3 + $0xac8] sm:$0xff]  ;;  %v1822_v63 = vadd.f32 %v1821_v49, %v432_v47  ;;  %v273_v8 = vld [vmem:[#allocation3 + $0x7a0] sm:$0xff] }
  0x8c   :  { %v1692_v30 = vadd.f32 %v1691_v19, %v310_v6  ;;  %v1714_v56 = vadd.f32 %v1713_v46, %v330_v39  ;;  %v332_v62 = vld [vmem:[#allocation3 + $0x978] sm:$0xff]  ;;  %v434_v6 = vld [vmem:[#allocation3 + $0xca8] sm:$0xff]  ;;  %v375_v9 = vld [vmem:[#allocation3 + $0xad0] sm:$0xff]  ;;  %v1779_v12 = vadd.f32 %v1778_v0, %v391_v58 }
  0x8d   :  { %v1585_v35 = vadd.f32 %v1584_v13, %v1583_v24  ;;  %v316_v1 = vld [vmem:[#allocation3 + $0x8f8] sm:$0xff]  ;;  %v1651_v3 = vadd.f32 %v1650_v54, %v271_v42  ;;  %v1759_v4 = vadd.f32 %v1758_v55, %v373_v44  ;;  %v333_v10 = vld [vmem:[#allocation3 + $0x980] sm:$0xff]  ;;  %v1823_v11 = vadd.f32 %v1822_v63, %v433_v57  ;;  %v435_v17 = vld [vmem:[#allocation3 + $0xcb0] sm:$0xff] }
  0x8e   :  { %v1693_v41 = vadd.f32 %v1692_v30, %v311_v18  ;;  %v1715_v5 = vadd.f32 %v1714_v56, %v331_v48  ;;  %v392_v7 = vld [vmem:[#allocation3 + $0xb58] sm:$0xff]  ;;  %v393_v18 = vld [vmem:[#allocation3 + $0xb60] sm:$0xff]  ;;  %v1698_v19 = vsel %vm1431_vm0, %v316_v1, 0.0  ;;  %v274_v20 = vld [vmem:[#allocation3 + $0x7a8] sm:$0xff] }
  0x8f   :  { %1586 = vadd.xlane.f32.xlu0 %v1585_v35  ;;  %v1652_v14 = vadd.f32 %v1651_v3, %v272_v60  ;;  %v1760_v15 = vadd.f32 %v1759_v4, %v374_v61  ;;  %v376_v21 = vld [vmem:[#allocation3 + $0xad8] sm:$0xff]  ;;  %v334_v22 = vld [vmem:[#allocation3 + $0x988] sm:$0xff]  ;;  %v1824_v23 = vadd.f32 %v1823_v11, %v434_v6  ;;  %v1780_v24 = vadd.f32 %v1779_v12, %v392_v7  ;;  %v275_v31 = vld [vmem:[#allocation3 + $0x7b0] sm:$0xff] }
  0x90   :  { %v1694_v53 = vadd.f32 %v1693_v41, %v312_v29  ;;  %v1716_v16 = vadd.f32 %v1715_v5, %v332_v62  ;;  %v436_v29 = vld [vmem:[#allocation3 + $0xcb8] sm:$0xff]  ;;  %v394_v30 = vld [vmem:[#allocation3 + $0xb68] sm:$0xff]  ;;  %v377_v32 = vld [vmem:[#allocation3 + $0xae0] sm:$0xff] }
  0x91   :  { %v1653_v26 = vadd.f32 %v1652_v14, %v273_v8  ;;  %v1761_v27 = vadd.f32 %v1760_v15, %v375_v9  ;;  %v335_v33 = vld [vmem:[#allocation3 + $0x990] sm:$0xff]  ;;  %v1825_v34 = vadd.f32 %v1824_v23, %v435_v17  ;;  %v1781_v35 = vadd.f32 %v1780_v24, %v393_v18  ;;  %v276_v37 = vld [vmem:[#allocation3 + $0x7b8] sm:$0xff]  ;;  %v437_v41 = vld [vmem:[#allocation3 + $0xcc0] sm:$0xff] }
  0x92   :  { %v1695_v2 = vadd.f32 %v1694_v53, %v313_v36  ;;  %v1717_v28 = vadd.f32 %v1716_v16, %v333_v10  ;;  %v395_v42 = vld [vmem:[#allocation3 + $0xb70] sm:$0xff]  ;;  %v277_v43 = vld [vmem:[#allocation3 + $0x7c0] sm:$0xff]  ;;  %v378_v44 = vld [vmem:[#allocation3 + $0xae8] sm:$0xff] }
  0x93   :  { %v1654_v38 = vadd.f32 %v1653_v26, %v274_v20  ;;  %v1762_v39 = vadd.f32 %v1761_v27, %v376_v21  ;;  %v379_v45 = vld [vmem:[#allocation3 + $0xaf0] sm:$0xff]  ;;  %v336_v46 = vld [vmem:[#allocation3 + $0x998] sm:$0xff]  ;;  %v1826_v47 = vadd.f32 %v1825_v34, %v436_v29  ;;  %v1782_v48 = vadd.f32 %v1781_v35, %v394_v30  ;;  %v337_v51 = vld [vmem:[#allocation3 + $0x9a0] sm:$0xff] }
  0x94   :  { %v1696_v13 = vadd.f32 %v1695_v2, %v314_v52  ;;  %v1718_v40 = vadd.f32 %v1717_v28, %v334_v22  ;;  %v438_v53 = vld [vmem:[#allocation3 + $0xcc8] sm:$0xff]  ;;  %v396_v54 = vld [vmem:[#allocation3 + $0xb78] sm:$0xff]  ;;  %v497_v57 = vld [vmem:[#allocation3 + $0xea0] sm:$0xff] }
  0x95   :  { %v1655_v49 = vadd.f32 %v1654_v38, %v275_v31  ;;  %v1763_v50 = vadd.f32 %v1762_v39, %v377_v32  ;;  %v1827_v55 = vadd.f32 %v1826_v47, %v437_v41  ;;  %v1783_v56 = vadd.f32 %v1782_v48, %v395_v42  ;;  %v498_v58 = vld [vmem:[#allocation3 + $0xea8] sm:$0xff]  ;;  %v439_v0 = vld [vmem:[#allocation3 + $0xcd0] sm:$0xff]  ;;  %v397_v1 = vld [vmem:[#allocation3 + $0xb80] sm:$0xff] }
  0x96   :  { %v1697_v25 = vadd.f32 %v1696_v13, %v315_v59  ;;  %v1719_v52 = vadd.f32 %v1718_v40, %v335_v33  ;;  %v499_v59 = vld [vmem:[#allocation3 + $0xeb0] sm:$0xff]  ;;  %v278_v60 = vld [vmem:[#allocation3 + $0x7c8] sm:$0xff]  ;;  %v1892_v2 = vadd.f32 %v498_v58, %v497_v57  ;;  %v380_v4 = vld [vmem:[#allocation3 + $0xaf8] sm:$0xff] }
  0x97   :  { %v1656_v61 = vadd.f32 %v1655_v49, %v276_v37  ;;  %v1764_v62 = vadd.f32 %v1763_v50, %v378_v44  ;;  %v279_v3 = vld [vmem:[#allocation3 + $0x7d0] sm:$0xff]  ;;  %v338_v5 = vld [vmem:[#allocation3 + $0x9a8] sm:$0xff]  ;;  %v1828_v6 = vadd.f32 %v1827_v55, %v438_v53  ;;  %v1784_v7 = vadd.f32 %v1783_v56, %v396_v54  ;;  %v500_v8 = vld [vmem:[#allocation3 + $0xeb8] sm:$0xff] }
  0x98   :  { %v1699_v36 = vadd.f32 %v1698_v19, %v1697_v25  ;;  %v1720_v63 = vadd.f32 %v1719_v52, %v336_v46  ;;  %v280_v9 = vld [vmem:[#allocation3 + $0x7d8] sm:$0xff]  ;;  %v398_v14 = vld [vmem:[#allocation3 + $0xb88] sm:$0xff]  ;;  %v1893_v15 = vadd.f32 %v1892_v2, %v499_v59  ;;  %v381_v16 = vld [vmem:[#allocation3 + $0xb00] sm:$0xff] }
  0x99   :  { %v1657_v10 = vadd.f32 %v1656_v61, %v277_v43  ;;  %v1765_v11 = vadd.f32 %v1764_v62, %v379_v45  ;;  %v440_v13 = vld [vmem:[#allocation3 + $0xcd8] sm:$0xff]  ;;  %v339_v17 = vld [vmem:[#allocation3 + $0x9b0] sm:$0xff]  ;;  %v1829_v18 = vadd.f32 %v1828_v6, %v439_v0  ;;  %v1785_v19 = vadd.f32 %v1784_v7, %v397_v1  ;;  %v501_v20 = vld [vmem:[#allocation3 + $0xec0] sm:$0xff] }
  0x9a   :  { %1700 = vadd.xlane.f32.xlu1 %v1699_v36  ;;  %v1721_v12 = vadd.f32 %v1720_v63, %v337_v51  ;;  %v441_v24 = vld [vmem:[#allocation3 + $0xce0] sm:$0xff]  ;;  %v399_v25 = vld [vmem:[#allocation3 + $0xb90] sm:$0xff]  ;;  %v1894_v26 = vadd.f32 %v1893_v15, %v500_v8  ;;  %v1660_v27 = vsel %vm1431_vm0, %v280_v9, 0.0  ;;  %v382_v28 = vld [vmem:[#allocation3 + $0xb08] sm:$0xff] }
  0x9b   :  { %v1658_v21 = vadd.f32 %v1657_v10, %v278_v60  ;;  %v1766_v22 = vadd.f32 %v1765_v11, %v380_v4  ;;  %v340_v29 = vld [vmem:[#allocation3 + $0x9b8] sm:$0xff]  ;;  %v1830_v30 = vadd.f32 %v1829_v18, %v440_v13  ;;  %v1786_v31 = vadd.f32 %v1785_v19, %v398_v14  ;;  %v502_v32 = vld [vmem:[#allocation3 + $0xec8] sm:$0xff]  ;;  %v383_v39 = vld [vmem:[#allocation3 + $0xb10] sm:$0xff] }
  0x9c   :  { %v1722_v23 = vadd.f32 %v1721_v12, %v338_v5  ;;  %v442_v36 = vld [vmem:[#allocation3 + $0xce8] sm:$0xff]  ;;  %v400_v37 = vld [vmem:[#allocation3 + $0xb98] sm:$0xff]  ;;  %v1895_v38 = vadd.f32 %v1894_v26, %v501_v20  ;;  %v341_v40 = vld [vmem:[#allocation3 + $0x9c0] sm:$0xff] }
  0x9d   :  { %v1659_v33 = vadd.f32 %v1658_v21, %v279_v3  ;;  %v1767_v34 = vadd.f32 %v1766_v22, %v381_v16  ;;  %v1831_v41 = vadd.f32 %v1830_v30, %v441_v24  ;;  %v1787_v42 = vadd.f32 %v1786_v31, %v399_v25  ;;  %v503_v43 = vld [vmem:[#allocation3 + $0xed0] sm:$0xff]  ;;  %v384_v45 = vld [vmem:[#allocation3 + $0xb18] sm:$0xff]  ;;  %v401_v49 = vld [vmem:[#allocation3 + $0xba0] sm:$0xff] }
  0x9e   :  { %v1723_v35 = vadd.f32 %v1722_v23, %v339_v17  ;;  %v443_v48 = vld [vmem:[#allocation3 + $0xcf0] sm:$0xff]  ;;  %v1896_v50 = vadd.f32 %v1895_v38, %v502_v32  ;;  %v385_v51 = vld [vmem:[#allocation3 + $0xb20] sm:$0xff]  ;;  %v342_v52 = vld [vmem:[#allocation3 + $0x9c8] sm:$0xff] }
  0x9f   :  { %v1661_v44 = vadd.f32 %v1660_v27, %v1659_v33  ;;  %v1768_v46 = vadd.f32 %v1767_v34, %v382_v28  ;;  %v343_v53 = vld [vmem:[#allocation3 + $0x9d0] sm:$0xff]  ;;  %v1832_v54 = vadd.f32 %v1831_v41, %v442_v36  ;;  %v1788_v55 = vadd.f32 %v1787_v42, %v400_v37  ;;  %v504_v56 = vld [vmem:[#allocation3 + $0xed8] sm:$0xff]  ;;  %v402_v60 = vld [vmem:[#allocation3 + $0xba8] sm:$0xff] }
  0xa0   :  { %v1724_v47 = vadd.f32 %v1723_v35, %v340_v29  ;;  %v444_v59 = vld [vmem:[#allocation3 + $0xcf8] sm:$0xff]  ;;  %v505_v61 = vld [vmem:[#allocation3 + $0xee0] sm:$0xff]  ;;  %v1897_v62 = vadd.f32 %v1896_v50, %v503_v43  ;;  %v462_v2 = vld [vmem:[#allocation3 + $0xd88] sm:$0xff] }
  0xa1   :  { %1662 = vadd.xlane.f32.xlu0 %v1661_v44  ;;  %v1769_v57 = vadd.f32 %v1768_v46, %v383_v39  ;;  %v1833_v63 = vadd.f32 %v1832_v54, %v443_v48  ;;  %v1789_v0 = vadd.f32 %v1788_v55, %v401_v49  ;;  %v461_v1 = vld [vmem:[#allocation3 + $0xd80] sm:$0xff]  ;;  %v463_v3 = vld [vmem:[#allocation3 + $0xd90] sm:$0xff]  ;;  %v386_v4 = vld [vmem:[#allocation3 + $0xb28] sm:$0xff] }
  0xa2   :  { %v1725_v58 = vadd.f32 %v1724_v47, %v341_v40  ;;  %v445_v7 = vld [vmem:[#allocation3 + $0xd00] sm:$0xff]  ;;  %v403_v8 = vld [vmem:[#allocation3 + $0xbb0] sm:$0xff]  ;;  %v1898_v9 = vadd.f32 %v1897_v62, %v504_v56  ;;  %v1854_v10 = vadd.f32 %v462_v2, %v461_v1  ;;  %v344_v12 = vld [vmem:[#allocation3 + $0x9d8] sm:$0xff] }
  0xa3   :  { %v1770_v5 = vadd.f32 %v1769_v57, %v384_v45  ;;  %v387_v11 = vld [vmem:[#allocation3 + $0xb30] sm:$0xff]  ;;  %v1834_v13 = vadd.f32 %v1833_v63, %v444_v59  ;;  %v1790_v14 = vadd.f32 %v1789_v0, %v402_v60  ;;  %v506_v15 = vld [vmem:[#allocation3 + $0xee8] sm:$0xff]  ;;  %v464_v16 = vld [vmem:[#allocation3 + $0xd98] sm:$0xff] }
  0xa4   :  { %v1726_v6 = vadd.f32 %v1725_v58, %v342_v52  ;;  %v388_v17 = vld [vmem:[#allocation3 + $0xb38] sm:$0xff]  ;;  %v446_v20 = vld [vmem:[#allocation3 + $0xd08] sm:$0xff]  ;;  %v1899_v22 = vadd.f32 %v1898_v9, %v505_v61  ;;  %v1855_v23 = vadd.f32 %v1854_v10, %v463_v3  ;;  %v345_v24 = vld [vmem:[#allocation3 + $0x9e0] sm:$0xff] }
  0xa5   :  { %v1771_v18 = vadd.f32 %v1770_v5, %v385_v51  ;;  %v404_v21 = vld [vmem:[#allocation3 + $0xbb8] sm:$0xff]  ;;  %v1835_v25 = vadd.f32 %v1834_v13, %v445_v7  ;;  %v1791_v26 = vadd.f32 %v1790_v14, %v403_v8  ;;  %v507_v27 = vld [vmem:[#allocation3 + $0xef0] sm:$0xff]  ;;  %v465_v28 = vld [vmem:[#allocation3 + $0xda0] sm:$0xff]  ;;  %v1774_v35 = vsel %vm1431_vm0, %v388_v17, 0.0 }
  0xa6   :  { %v1727_v19 = vadd.f32 %v1726_v6, %v343_v53  ;;  %v447_v31 = vld [vmem:[#allocation3 + $0xd10] sm:$0xff]  ;;  %v405_v32 = vld [vmem:[#allocation3 + $0xbc0] sm:$0xff]  ;;  %v1900_v33 = vadd.f32 %v1899_v22, %v506_v15  ;;  %v1856_v34 = vadd.f32 %v1855_v23, %v464_v16  ;;  %v346_v36 = vld [vmem:[#allocation3 + $0x9e8] sm:$0xff] }
  0xa7   :  { %v1772_v29 = vadd.f32 %v1771_v18, %v386_v4  ;;  %v1836_v37 = vadd.f32 %v1835_v25, %v446_v20  ;;  %v1792_v38 = vadd.f32 %v1791_v26, %v404_v21  ;;  %v508_v39 = vld [vmem:[#allocation3 + $0xef8] sm:$0xff]  ;;  %v466_v40 = vld [vmem:[#allocation3 + $0xda8] sm:$0xff]  ;;  %v347_v47 = vld [vmem:[#allocation3 + $0x9f0] sm:$0xff] }
  0xa8   :  { %v1728_v30 = vadd.f32 %v1727_v19, %v344_v12  ;;  %v448_v43 = vld [vmem:[#allocation3 + $0xd18] sm:$0xff]  ;;  %v406_v44 = vld [vmem:[#allocation3 + $0xbc8] sm:$0xff]  ;;  %v1901_v45 = vadd.f32 %v1900_v33, %v507_v27  ;;  %v1857_v46 = vadd.f32 %v1856_v34, %v465_v28  ;;  %v509_v50 = vld [vmem:[#allocation3 + $0xf00] sm:$0xff] }
  0xa9   :  { %v1773_v41 = vadd.f32 %v1772_v29, %v387_v11  ;;  %v1837_v48 = vadd.f32 %v1836_v37, %v447_v31  ;;  %v1793_v49 = vadd.f32 %v1792_v38, %v405_v32  ;;  %v467_v51 = vld [vmem:[#allocation3 + $0xdb0] sm:$0xff]  ;;  %v348_v53 = vld [vmem:[#allocation3 + $0x9f8] sm:$0xff]  ;;  %v449_v55 = vld [vmem:[#allocation3 + $0xd20] sm:$0xff] }
  0xaa   :  { %v1729_v42 = vadd.f32 %v1728_v30, %v345_v24  ;;  %v407_v56 = vld [vmem:[#allocation3 + $0xbd0] sm:$0xff]  ;;  %v1902_v57 = vadd.f32 %v1901_v45, %v508_v39  ;;  %v1858_v58 = vadd.f32 %v1857_v46, %v466_v40  ;;  %v349_v59 = vld [vmem:[#allocation3 + $0xa00] sm:$0xff]  ;;  %v450_v60 = vld [vmem:[#allocation3 + $0xd28] sm:$0xff] }
  0xab   :  { %v1775_v52 = vadd.f32 %v1774_v35, %v1773_v41  ;;  %v1838_v61 = vadd.f32 %v1837_v48, %v448_v43  ;;  %v1794_v62 = vadd.f32 %v1793_v49, %v406_v44  ;;  %v510_v63 = vld [vmem:[#allocation3 + $0xf08] sm:$0xff]  ;;  %v468_v0 = vld [vmem:[#allocation3 + $0xdb8] sm:$0xff]  ;;  %v511_v3 = vld [vmem:[#allocation3 + $0xf10] sm:$0xff] }
  0xac   :  { %v1730_v54 = vadd.f32 %v1729_v42, %v346_v36  ;;  %v408_v2 = vld [vmem:[#allocation3 + $0xbd8] sm:$0xff]  ;;  %v1903_v4 = vadd.f32 %v1902_v57, %v509_v50  ;;  %v469_v5 = vld [vmem:[#allocation3 + $0xdc0] sm:$0xff]  ;;  %v1859_v6 = vadd.f32 %v1858_v58, %v467_v51  ;;  %v570_v10 = vld [vmem:[#allocation3 + $0x10e8] sm:$0xff] }
  0xad   :  { %1776 = vadd.xlane.f32.xlu1 %v1775_v52  ;;  %v1839_v7 = vadd.f32 %v1838_v61, %v449_v55  ;;  %v1795_v8 = vadd.f32 %v1794_v62, %v407_v56  ;;  %v569_v9 = vld [vmem:[#allocation3 + $0x10e0] sm:$0xff]  ;;  %v571_v11 = vld [vmem:[#allocation3 + $0x10f0] sm:$0xff]  ;;  %v350_v12 = vld [vmem:[#allocation3 + $0xa08] sm:$0xff] }
  0xae   :  { %v1731_v1 = vadd.f32 %v1730_v54, %v347_v47  ;;  %v451_v14 = vld [vmem:[#allocation3 + $0xd30] sm:$0xff]  ;;  %v409_v15 = vld [vmem:[#allocation3 + $0xbe0] sm:$0xff]  ;;  %v1904_v16 = vadd.f32 %v1903_v4, %v510_v63  ;;  %v1860_v17 = vadd.f32 %v1859_v6, %v468_v0  ;;  %v1968_v18 = vadd.f32 %v570_v10, %v569_v9  ;;  %v512_v22 = vld [vmem:[#allocation3 + $0xf18] sm:$0xff] }
  0xaf   :  { %v351_v19 = vld [vmem:[#allocation3 + $0xa10] sm:$0xff]  ;;  %v1840_v20 = vadd.f32 %v1839_v7, %v450_v60  ;;  %v1796_v21 = vadd.f32 %v1795_v8, %v408_v2  ;;  %v470_v23 = vld [vmem:[#allocation3 + $0xdc8] sm:$0xff]  ;;  %v572_v24 = vld [vmem:[#allocation3 + $0x10f8] sm:$0xff] }
  0xb0   :  { %v1732_v13 = vadd.f32 %v1731_v1, %v348_v53  ;;  %v352_v25 = vld [vmem:[#allocation3 + $0xa18] sm:$0xff]  ;;  %v410_v28 = vld [vmem:[#allocation3 + $0xbe8] sm:$0xff]  ;;  %v1905_v29 = vadd.f32 %v1904_v16, %v511_v3  ;;  %v1861_v30 = vadd.f32 %v1860_v17, %v469_v5  ;;  %v1969_v31 = vadd.f32 %v1968_v18, %v571_v11  ;;  %v513_v34 = vld [vmem:[#allocation3 + $0xf20] sm:$0xff] }
  0xb1   :  { %v452_v27 = vld [vmem:[#allocation3 + $0xd38] sm:$0xff]  ;;  %v1841_v32 = vadd.f32 %v1840_v20, %v451_v14  ;;  %v1797_v33 = vadd.f32 %v1796_v21, %v409_v15  ;;  %v471_v35 = vld [vmem:[#allocation3 + $0xdd0] sm:$0xff]  ;;  %v573_v36 = vld [vmem:[#allocation3 + $0x1100] sm:$0xff]  ;;  %v1736_v43 = vsel %vm1431_vm0, %v352_v25, 0.0 }
  0xb2   :  { %v1733_v26 = vadd.f32 %v1732_v13, %v349_v59  ;;  %v453_v38 = vld [vmem:[#allocation3 + $0xd40] sm:$0xff]  ;;  %v411_v39 = vld [vmem:[#allocation3 + $0xbf0] sm:$0xff]  ;;  %v1906_v40 = vadd.f32 %v1905_v29, %v512_v22  ;;  %v1862_v41 = vadd.f32 %v1861_v30, %v470_v23  ;;  %v1970_v42 = vadd.f32 %v1969_v31, %v572_v24  ;;  %v514_v46 = vld [vmem:[#allocation3 + $0xf28] sm:$0xff] }
  0xb3   :  { %v1842_v44 = vadd.f32 %v1841_v32, %v452_v27  ;;  %v1798_v45 = vadd.f32 %v1797_v33, %v410_v28  ;;  %v472_v47 = vld [vmem:[#allocation3 + $0xdd8] sm:$0xff]  ;;  %v574_v48 = vld [vmem:[#allocation3 + $0x1108] sm:$0xff]  ;;  %v455_v51 = vld [vmem:[#allocation3 + $0xd50] sm:$0xff] }
  0xb4   :  { %v1734_v37 = vadd.f32 %v1733_v26, %v350_v12  ;;  %v454_v50 = vld [vmem:[#allocation3 + $0xd48] sm:$0xff]  ;;  %v412_v52 = vld [vmem:[#allocation3 + $0xbf8] sm:$0xff]  ;;  %v1907_v53 = vadd.f32 %v1906_v40, %v513_v34  ;;  %v1863_v54 = vadd.f32 %v1862_v41, %v471_v35  ;;  %v1971_v55 = vadd.f32 %v1970_v42, %v573_v36  ;;  %v515_v58 = vld [vmem:[#allocation3 + $0xf30] sm:$0xff] }
  0xb5   :  { %v1843_v56 = vadd.f32 %v1842_v44, %v453_v38  ;;  %v1799_v57 = vadd.f32 %v1798_v45, %v411_v39  ;;  %v473_v59 = vld [vmem:[#allocation3 + $0xde0] sm:$0xff]  ;;  %v575_v60 = vld [vmem:[#allocation3 + $0x1110] sm:$0xff]  ;;  %v456_v62 = vld [vmem:[#allocation3 + $0xd58] sm:$0xff] }
  0xb6   :  { %v1735_v49 = vadd.f32 %v1734_v37, %v351_v19  ;;  %v413_v63 = vld [vmem:[#allocation3 + $0xc00] sm:$0xff]  ;;  %v414_v0 = vld [vmem:[#allocation3 + $0xc08] sm:$0xff]  ;;  %v1908_v1 = vadd.f32 %v1907_v53, %v514_v46  ;;  %v1864_v2 = vadd.f32 %v1863_v54, %v472_v47  ;;  %v1972_v3 = vadd.f32 %v1971_v55, %v574_v48  ;;  %v516_v6 = vld [vmem:[#allocation3 + $0xf38] sm:$0xff] }
  0xb7   :  { %v1844_v4 = vadd.f32 %v1843_v56, %v454_v50  ;;  %v1800_v5 = vadd.f32 %v1799_v57, %v412_v52  ;;  %v474_v7 = vld [vmem:[#allocation3 + $0xde8] sm:$0xff]  ;;  %v576_v8 = vld [vmem:[#allocation3 + $0x1118] sm:$0xff]  ;;  %v457_v9 = vld [vmem:[#allocation3 + $0xd60] sm:$0xff] }
  0xb8   :  { %v1737_v61 = vadd.f32 %v1736_v43, %v1735_v49  ;;  %v517_v10 = vld [vmem:[#allocation3 + $0xf40] sm:$0xff]  ;;  %v1909_v11 = vadd.f32 %v1908_v1, %v515_v58  ;;  %v475_v12 = vld [vmem:[#allocation3 + $0xdf0] sm:$0xff]  ;;  %v1865_v13 = vadd.f32 %v1864_v2, %v473_v59  ;;  %v1973_v15 = vadd.f32 %v1972_v3, %v575_v60  ;;  %v534_v19 = vld [vmem:[#allocation3 + $0xfc8] sm:$0xff] }
  0xb9   :  { %v577_v14 = vld [vmem:[#allocation3 + $0x1120] sm:$0xff]  ;;  %v1845_v16 = vadd.f32 %v1844_v4, %v455_v51  ;;  %v1801_v17 = vadd.f32 %v1800_v5, %v413_v63  ;;  %v535_v20 = vld [vmem:[#allocation3 + $0xfd0] sm:$0xff]  ;;  %v458_v21 = vld [vmem:[#allocation3 + $0xd68] sm:$0xff] }
  0xba   :  { %1738 = vadd.xlane.f32.xlu0 %v1737_v61  ;;  %v533_v18 = vld [vmem:[#allocation3 + $0xfc0] sm:$0xff]  ;;  %v415_v22 = vld [vmem:[#allocation3 + $0xc10] sm:$0xff]  ;;  %v518_v23 = vld [vmem:[#allocation3 + $0xf48] sm:$0xff]  ;;  %v1910_v24 = vadd.f32 %v1909_v11, %v516_v6  ;;  %v1866_v25 = vadd.f32 %v1865_v13, %v474_v7  ;;  %v1974_v26 = vadd.f32 %v1973_v15, %v576_v8 }
  0xbb   :  { %v1930_v27 = vadd.f32 %v534_v19, %v533_v18  ;;  %v1846_v28 = vadd.f32 %v1845_v16, %v456_v62  ;;  %v1802_v29 = vadd.f32 %v1801_v17, %v414_v0  ;;  %v476_v30 = vld [vmem:[#allocation3 + $0xdf8] sm:$0xff]  ;;  %v578_v31 = vld [vmem:[#allocation3 + $0x1128] sm:$0xff]  ;;  %v519_v35 = vld [vmem:[#allocation3 + $0xf50] sm:$0xff] }
  0xbc   :  { %v536_v32 = vld [vmem:[#allocation3 + $0xfd8] sm:$0xff]  ;;  %v1911_v36 = vadd.f32 %v1910_v24, %v517_v10  ;;  %v1867_v37 = vadd.f32 %v1866_v25, %v475_v12  ;;  %v1975_v38 = vadd.f32 %v1974_v26, %v577_v14  ;;  %v477_v42 = vld [vmem:[#allocation3 + $0xe00] sm:$0xff]  ;;  %v579_v43 = vld [vmem:[#allocation3 + $0x1130] sm:$0xff] }
  0xbd   :  { %v460_v33 = vld [vmem:[#allocation3 + $0xd78] sm:$0xff]  ;;  %v1931_v39 = vadd.f32 %v1930_v27, %v535_v20  ;;  %v1847_v40 = vadd.f32 %v1846_v28, %v457_v9  ;;  %v1803_v41 = vadd.f32 %v1802_v29, %v415_v22  ;;  %v537_v44 = vld [vmem:[#allocation3 + $0xfe0] sm:$0xff]  ;;  %v459_v45 = vld [vmem:[#allocation3 + $0xd70] sm:$0xff] }
  0xbe   :  { %v416_v34 = vld [vmem:[#allocation3 + $0xc18] sm:$0xff]  ;;  %v417_v46 = vld [vmem:[#allocation3 + $0xc20] sm:$0xff]  ;;  %v1912_v48 = vadd.f32 %v1911_v36, %v518_v23  ;;  %v1868_v49 = vadd.f32 %v1867_v37, %v476_v30  ;;  %v1976_v50 = vadd.f32 %v1975_v38, %v578_v31  ;;  %v1850_v53 = vsel %vm1431_vm0, %v460_v33, 0.0  ;;  %v478_v55 = vld [vmem:[#allocation3 + $0xe08] sm:$0xff] }
  0xbf   :  { %v520_v47 = vld [vmem:[#allocation3 + $0xf58] sm:$0xff]  ;;  %v1932_v51 = vadd.f32 %v1931_v39, %v536_v32  ;;  %v1848_v52 = vadd.f32 %v1847_v40, %v458_v21  ;;  %v1804_v54 = vadd.f32 %v1803_v41, %v416_v34  ;;  %v538_v57 = vld [vmem:[#allocation3 + $0xfe8] sm:$0xff]  ;;  %v521_v59 = vld [vmem:[#allocation3 + $0xf60] sm:$0xff] }
  0xc0   :  { %v580_v56 = vld [vmem:[#allocation3 + $0x1138] sm:$0xff]  ;;  %v418_v58 = vld [vmem:[#allocation3 + $0xc28] sm:$0xff]  ;;  %v1913_v60 = vadd.f32 %v1912_v48, %v519_v35  ;;  %v1869_v61 = vadd.f32 %v1868_v49, %v477_v42  ;;  %v1977_v62 = vadd.f32 %v1976_v50, %v579_v43  ;;  %v479_v2 = vld [vmem:[#allocation3 + $0xe10] sm:$0xff] }
  0xc1   :  { %v1933_v63 = vadd.f32 %v1932_v51, %v537_v44  ;;  %v1849_v0 = vadd.f32 %v1848_v52, %v459_v45  ;;  %v1805_v1 = vadd.f32 %v1804_v54, %v417_v46  ;;  %v581_v3 = vld [vmem:[#allocation3 + $0x1140] sm:$0xff]  ;;  %v539_v4 = vld [vmem:[#allocation3 + $0xff0] sm:$0xff]  ;;  %v420_v6 = vld [vmem:[#allocation3 + $0xc38] sm:$0xff] }
  0xc2   :  { %v419_v5 = vld [vmem:[#allocation3 + $0xc30] sm:$0xff]  ;;  %v522_v7 = vld [vmem:[#allocation3 + $0xf68] sm:$0xff]  ;;  %v1914_v8 = vadd.f32 %v1913_v60, %v520_v47  ;;  %v1870_v9 = vadd.f32 %v1869_v61, %v478_v55  ;;  %v1978_v10 = vadd.f32 %v1977_v62, %v580_v56  ;;  %v480_v14 = vld [vmem:[#allocation3 + $0xe18] sm:$0xff] }
  0xc3   :  { %v1934_v11 = vadd.f32 %v1933_v63, %v538_v57  ;;  %v1851_v12 = vadd.f32 %v1850_v53, %v1849_v0  ;;  %v1806_v13 = vadd.f32 %v1805_v1, %v418_v58  ;;  %v582_v15 = vld [vmem:[#allocation3 + $0x1148] sm:$0xff]  ;;  %v540_v16 = vld [vmem:[#allocation3 + $0xff8] sm:$0xff]  ;;  %v421_v17 = vld [vmem:[#allocation3 + $0xc40] sm:$0xff] }
  0xc4   :  { %v523_v18 = vld [vmem:[#allocation3 + $0xf70] sm:$0xff]  ;;  %v1915_v19 = vadd.f32 %v1914_v8, %v521_v59  ;;  %v481_v20 = vld [vmem:[#allocation3 + $0xe20] sm:$0xff]  ;;  %v1871_v21 = vadd.f32 %v1870_v9, %v479_v2  ;;  %v1979_v23 = vadd.f32 %v1978_v10, %v581_v3  ;;  %v642_v28 = vld [vmem:[#allocation3 + $0x1328] sm:$0xff] }
  0xc5   :  { %v583_v22 = vld [vmem:[#allocation3 + $0x1150] sm:$0xff]  ;;  %v1935_v24 = vadd.f32 %v1934_v11, %v539_v4  ;;  %1852 = vadd.xlane.f32.xlu1 %v1851_v12  ;;  %v1807_v25 = vadd.f32 %v1806_v13, %v419_v5  ;;  %v541_v26 = vld [vmem:[#allocation3 + $0x1000] sm:$0xff]  ;;  %v422_v29 = vld [vmem:[#allocation3 + $0xc48] sm:$0xff] }
  0xc6   :  { %v641_v27 = vld [vmem:[#allocation3 + $0x1320] sm:$0xff]  ;;  %v524_v30 = vld [vmem:[#allocation3 + $0xf78] sm:$0xff]  ;;  %v1916_v31 = vadd.f32 %v1915_v19, %v522_v7  ;;  %v1872_v32 = vadd.f32 %v1871_v21, %v480_v14  ;;  %v1980_v33 = vadd.f32 %v1979_v23, %v582_v15  ;;  %v643_v35 = vld [vmem:[#allocation3 + $0x1330] sm:$0xff] }
  0xc7   :  { %v1936_v34 = vadd.f32 %v1935_v24, %v540_v16  ;;  %v1808_v36 = vadd.f32 %v1807_v25, %v420_v6  ;;  %v482_v37 = vld [vmem:[#allocation3 + $0xe28] sm:$0xff]  ;;  %v584_v38 = vld [vmem:[#allocation3 + $0x1158] sm:$0xff]  ;;  %v2044_v40 = vadd.f32 %v642_v28, %v641_v27  ;;  %v525_v42 = vld [vmem:[#allocation3 + $0xf80] sm:$0xff] }
  0xc8   :  { %v542_v39 = vld [vmem:[#allocation3 + $0x1008] sm:$0xff]  ;;  %v424_v41 = vld [vmem:[#allocation3 + $0xc58] sm:$0xff]  ;;  %v1917_v43 = vadd.f32 %v1916_v31, %v523_v18  ;;  %v1873_v44 = vadd.f32 %v1872_v32, %v481_v20  ;;  %v1981_v45 = vadd.f32 %v1980_v33, %v583_v22  ;;  %v483_v49 = vld [vmem:[#allocation3 + $0xe30] sm:$0xff] }
  0xc9   :  { %v1937_v46 = vadd.f32 %v1936_v34, %v541_v26  ;;  %v644_v47 = vld [vmem:[#allocation3 + $0x1338] sm:$0xff]  ;;  %v1809_v48 = vadd.f32 %v1808_v36, %v421_v17  ;;  %v585_v50 = vld [vmem:[#allocation3 + $0x1160] sm:$0xff]  ;;  %v543_v51 = vld [vmem:[#allocation3 + $0x1010] sm:$0xff]  ;;  %v2045_v52 = vadd.f32 %v2044_v40, %v643_v35  ;;  %v1812_v61 = vsel %vm1431_vm0, %v424_v41, 0.0 }
  0xca   :  { %v423_v53 = vld [vmem:[#allocation3 + $0xc50] sm:$0xff]  ;;  %v526_v54 = vld [vmem:[#allocation3 + $0xf88] sm:$0xff]  ;;  %v1918_v55 = vadd.f32 %v1917_v43, %v524_v30  ;;  %v1874_v56 = vadd.f32 %v1873_v44, %v482_v37  ;;  %v1982_v57 = vadd.f32 %v1981_v45, %v584_v38  ;;  %v645_v59 = vld [vmem:[#allocation3 + $0x1340] sm:$0xff] }
  0xcb   :  { %v1938_v58 = vadd.f32 %v1937_v46, %v542_v39  ;;  %v1810_v60 = vadd.f32 %v1809_v48, %v422_v29  ;;  %v484_v62 = vld [vmem:[#allocation3 + $0xe38] sm:$0xff]  ;;  %v586_v63 = vld [vmem:[#allocation3 + $0x1168] sm:$0xff]  ;;  %v2046_v1 = vadd.f32 %v2045_v52, %v644_v47  ;;  %v527_v2 = vld [vmem:[#allocation3 + $0xf90] sm:$0xff] }
  0xcc   :  { %v544_v0 = vld [vmem:[#allocation3 + $0x1018] sm:$0xff]  ;;  %v1919_v3 = vadd.f32 %v1918_v55, %v525_v42  ;;  %v1875_v4 = vadd.f32 %v1874_v56, %v483_v49  ;;  %v1983_v5 = vadd.f32 %v1982_v57, %v585_v50  ;;  %v646_v7 = vld [vmem:[#allocation3 + $0x1348] sm:$0xff]  ;;  %v485_v9 = vld [vmem:[#allocation3 + $0xe40] sm:$0xff] }
  0xcd   :  { %v1939_v6 = vadd.f32 %v1938_v58, %v543_v51  ;;  %v1811_v8 = vadd.f32 %v1810_v60, %v423_v53  ;;  %v587_v10 = vld [vmem:[#allocation3 + $0x1170] sm:$0xff]  ;;  %v545_v11 = vld [vmem:[#allocation3 + $0x1020] sm:$0xff]  ;;  %v2047_v12 = vadd.f32 %v2046_v1, %v645_v59  ;;  %v528_v13 = vld [vmem:[#allocation3 + $0xf98] sm:$0xff] }
  0xce   :  { %v1920_v14 = vadd.f32 %v1919_v3, %v526_v54  ;;  %v1876_v15 = vadd.f32 %v1875_v4, %v484_v62  ;;  %v1984_v16 = vadd.f32 %v1983_v5, %v586_v63  ;;  %v647_v18 = vld [vmem:[#allocation3 + $0x1350] sm:$0xff]  ;;  %v529_v20 = vld [vmem:[#allocation3 + $0xfa0] sm:$0xff]  ;;  %v486_v21 = vld [vmem:[#allocation3 + $0xe48] sm:$0xff] }
  0xcf   :  { %v1940_v17 = vadd.f32 %v1939_v6, %v544_v0  ;;  %v1813_v19 = vadd.f32 %v1812_v61, %v1811_v8  ;;  %v588_v22 = vld [vmem:[#allocation3 + $0x1178] sm:$0xff]  ;;  %v546_v23 = vld [vmem:[#allocation3 + $0x1028] sm:$0xff]  ;;  %v2048_v24 = vadd.f32 %v2047_v12, %v646_v7  ;;  %v487_v26 = vld [vmem:[#allocation3 + $0xe50] sm:$0xff] }
  0xd0   :  { %v1921_v25 = vadd.f32 %v1920_v14, %v527_v2  ;;  %v1877_v27 = vadd.f32 %v1876_v15, %v485_v9  ;;  %v589_v28 = vld [vmem:[#allocation3 + $0x1180] sm:$0xff]  ;;  %v1985_v29 = vadd.f32 %v1984_v16, %v587_v10  ;;  %v648_v31 = vld [vmem:[#allocation3 + $0x1358] sm:$0xff]  ;;  %v547_v32 = vld [vmem:[#allocation3 + $0x1030] sm:$0xff] }
  0xd1   :  { %v1941_v30 = vadd.f32 %v1940_v17, %v545_v11  ;;  %1814 = vadd.xlane.f32.xlu0 %v1813_v19  ;;  %v2049_v33 = vadd.f32 %v2048_v24, %v647_v18  ;;  %v605_v34 = vld [vmem:[#allocation3 + $0x1200] sm:$0xff]  ;;  %v606_v35 = vld [vmem:[#allocation3 + $0x1208] sm:$0xff]  ;;  %v607_v42 = vld [vmem:[#allocation3 + $0x1210] sm:$0xff] }
  0xd2   :  { %v530_v36 = vld [vmem:[#allocation3 + $0xfa8] sm:$0xff]  ;;  %v1922_v37 = vadd.f32 %v1921_v25, %v528_v13  ;;  %v1878_v38 = vadd.f32 %v1877_v27, %v486_v21  ;;  %v1986_v39 = vadd.f32 %v1985_v29, %v588_v22  ;;  %v649_v41 = vld [vmem:[#allocation3 + $0x1360] sm:$0xff]  ;;  %v531_v43 = vld [vmem:[#allocation3 + $0xfb0] sm:$0xff]  ;;  %v2006_v48 = vadd.f32 %v606_v35, %v605_v34 }
  0xd3   :  { %v1942_v40 = vadd.f32 %v1941_v30, %v546_v23  ;;  %v488_v44 = vld [vmem:[#allocation3 + $0xe58] sm:$0xff]  ;;  %v590_v45 = vld [vmem:[#allocation3 + $0x1188] sm:$0xff]  ;;  %v2050_v47 = vadd.f32 %v2049_v33, %v648_v31  ;;  %v489_v56 = vld [vmem:[#allocation3 + $0xe60] sm:$0xff] }
  0xd4   :  { %v548_v46 = vld [vmem:[#allocation3 + $0x1038] sm:$0xff]  ;;  %v1923_v50 = vadd.f32 %v1922_v37, %v529_v20  ;;  %v1879_v51 = vadd.f32 %v1878_v38, %v487_v26  ;;  %v1987_v52 = vadd.f32 %v1986_v39, %v589_v28  ;;  %v650_v54 = vld [vmem:[#allocation3 + $0x1368] sm:$0xff]  ;;  %v591_v57 = vld [vmem:[#allocation3 + $0x1190] sm:$0xff]  ;;  %v2007_v60 = vadd.f32 %v2006_v48, %v607_v42 }
  0xd5   :  { %v532_v49 = vld [vmem:[#allocation3 + $0xfb8] sm:$0xff]  ;;  %v1943_v53 = vadd.f32 %v1942_v40, %v547_v32  ;;  %v549_v58 = vld [vmem:[#allocation3 + $0x1040] sm:$0xff]  ;;  %v2051_v59 = vadd.f32 %v2050_v47, %v649_v41  ;;  %v651_v1 = vld [vmem:[#allocation3 + $0x1370] sm:$0xff] }
  0xd6   :  { %v608_v55 = vld [vmem:[#allocation3 + $0x1218] sm:$0xff]  ;;  %v1924_v61 = vadd.f32 %v1923_v50, %v530_v36  ;;  %v1880_v62 = vadd.f32 %v1879_v51, %v488_v44  ;;  %v1988_v63 = vadd.f32 %v1987_v52, %v590_v45  ;;  %v609_v2 = vld [vmem:[#allocation3 + $0x1220] sm:$0xff]  ;;  %v1926_v3 = vsel %vm1431_vm0, %v532_v49, 0.0  ;;  %v490_v4 = vld [vmem:[#allocation3 + $0xe68] sm:$0xff] }
  0xd7   :  { %v1944_v0 = vadd.f32 %v1943_v53, %v548_v46  ;;  %v592_v5 = vld [vmem:[#allocation3 + $0x1198] sm:$0xff]  ;;  %v550_v6 = vld [vmem:[#allocation3 + $0x1048] sm:$0xff]  ;;  %v2052_v7 = vadd.f32 %v2051_v59, %v650_v54  ;;  %v2008_v8 = vadd.f32 %v2007_v60, %v608_v55  ;;  %v491_v15 = vld [vmem:[#allocation3 + $0xe70] sm:$0xff] }
  0xd8   :  { %v1925_v9 = vadd.f32 %v1924_v61, %v531_v43  ;;  %v1881_v10 = vadd.f32 %v1880_v62, %v489_v56  ;;  %v1989_v11 = vadd.f32 %v1988_v63, %v591_v57  ;;  %v652_v13 = vld [vmem:[#allocation3 + $0x1378] sm:$0xff]  ;;  %v610_v14 = vld [vmem:[#allocation3 + $0x1228] sm:$0xff]  ;;  %v593_v16 = vld [vmem:[#allocation3 + $0x11a0] sm:$0xff] }
  0xd9   :  { %v1945_v12 = vadd.f32 %v1944_v0, %v549_v58  ;;  %v551_v17 = vld [vmem:[#allocation3 + $0x1050] sm:$0xff]  ;;  %v2053_v18 = vadd.f32 %v2052_v7, %v651_v1  ;;  %v2009_v19 = vadd.f32 %v2008_v8, %v609_v2  ;;  %v492_v21 = vld [vmem:[#allocation3 + $0xe78] sm:$0xff]  ;;  %v653_v25 = vld [vmem:[#allocation3 + $0x1380] sm:$0xff] }
  0xda   :  { %v1927_v20 = vadd.f32 %v1926_v3, %v1925_v9  ;;  %v1882_v22 = vadd.f32 %v1881_v10, %v490_v4  ;;  %v1990_v23 = vadd.f32 %v1989_v11, %v592_v5  ;;  %v611_v26 = vld [vmem:[#allocation3 + $0x1230] sm:$0xff]  ;;  %v493_v27 = vld [vmem:[#allocation3 + $0xe80] sm:$0xff]  ;;  %v594_v28 = vld [vmem:[#allocation3 + $0x11a8] sm:$0xff] }
  0xdb   :  { %v1946_v24 = vadd.f32 %v1945_v12, %v550_v6  ;;  %v595_v29 = vld [vmem:[#allocation3 + $0x11b0] sm:$0xff]  ;;  %v552_v30 = vld [vmem:[#allocation3 + $0x1058] sm:$0xff]  ;;  %v2054_v31 = vadd.f32 %v2053_v18, %v652_v13  ;;  %v2010_v32 = vadd.f32 %v2009_v19, %v610_v14  ;;  %v553_v35 = vld [vmem:[#allocation3 + $0x1060] sm:$0xff] }
  0xdc   :  { %1928 = vadd.xlane.f32.xlu1 %v1927_v20  ;;  %v1883_v33 = vadd.f32 %v1882_v22, %v491_v15  ;;  %v1991_v34 = vadd.f32 %v1990_v23, %v593_v16  ;;  %v654_v37 = vld [vmem:[#allocation3 + $0x1388] sm:$0xff]  ;;  %v612_v38 = vld [vmem:[#allocation3 + $0x1238] sm:$0xff]  ;;  %v713_v41 = vld [vmem:[#allocation3 + $0x1560] sm:$0xff] }
  0xdd   :  { %v1947_v36 = vadd.f32 %v1946_v24, %v551_v17  ;;  %v2055_v39 = vadd.f32 %v2054_v31, %v653_v25  ;;  %v2011_v40 = vadd.f32 %v2010_v32, %v611_v26  ;;  %v714_v42 = vld [vmem:[#allocation3 + $0x1568] sm:$0xff]  ;;  %v715_v43 = vld [vmem:[#allocation3 + $0x1570] sm:$0xff]  ;;  %v613_v49 = vld [vmem:[#allocation3 + $0x1240] sm:$0xff] }
  0xde   :  { %v494_v44 = vld [vmem:[#allocation3 + $0xe88] sm:$0xff]  ;;  %v1884_v45 = vadd.f32 %v1883_v33, %v492_v21  ;;  %v1992_v46 = vadd.f32 %v1991_v34, %v594_v28  ;;  %v655_v48 = vld [vmem:[#allocation3 + $0x1390] sm:$0xff]  ;;  %v2120_v50 = vadd.f32 %v714_v42, %v713_v41  ;;  %v596_v52 = vld [vmem:[#allocation3 + $0x11b8] sm:$0xff] }
  0xdf   :  { %v1948_v47 = vadd.f32 %v1947_v36, %v552_v30  ;;  %v495_v51 = vld [vmem:[#allocation3 + $0xe90] sm:$0xff]  ;;  %v554_v53 = vld [vmem:[#allocation3 + $0x1068] sm:$0xff]  ;;  %v2056_v54 = vadd.f32 %v2055_v39, %v654_v37  ;;  %v2012_v55 = vadd.f32 %v2011_v40, %v612_v38  ;;  %v716_v56 = vld [vmem:[#allocation3 + $0x1578] sm:$0xff] }
  0xe0   :  { %v496_v57 = vld [vmem:[#allocation3 + $0xe98] sm:$0xff]  ;;  %v1885_v58 = vadd.f32 %v1884_v45, %v493_v27  ;;  %v1993_v59 = vadd.f32 %v1992_v46, %v595_v29  ;;  %v614_v62 = vld [vmem:[#allocation3 + $0x1248] sm:$0xff]  ;;  %v2121_v63 = vadd.f32 %v2120_v50, %v715_v43  ;;  %v597_v0 = vld [vmem:[#allocation3 + $0x11c0] sm:$0xff] }
  0xe1   :  { %v1949_v60 = vadd.f32 %v1948_v47, %v553_v35  ;;  %v656_v61 = vld [vmem:[#allocation3 + $0x1398] sm:$0xff]  ;;  %v555_v1 = vld [vmem:[#allocation3 + $0x1070] sm:$0xff]  ;;  %v2057_v2 = vadd.f32 %v2056_v54, %v655_v48  ;;  %v2013_v3 = vadd.f32 %v2012_v55, %v613_v49  ;;  %v717_v4 = vld [vmem:[#allocation3 + $0x1580] sm:$0xff]  ;;  %v1888_v11 = vsel %vm1431_vm0, %v496_v57, 0.0 }
  0xe2   :  { %v1886_v5 = vadd.f32 %v1885_v58, %v494_v44  ;;  %v1994_v6 = vadd.f32 %v1993_v59, %v596_v52  ;;  %v657_v8 = vld [vmem:[#allocation3 + $0x13a0] sm:$0xff]  ;;  %v615_v9 = vld [vmem:[#allocation3 + $0x1250] sm:$0xff]  ;;  %v2122_v10 = vadd.f32 %v2121_v63, %v716_v56  ;;  %v598_v12 = vld [vmem:[#allocation3 + $0x11c8] sm:$0xff] }
  0xe3   :  { %v1950_v7 = vadd.f32 %v1949_v60, %v554_v53  ;;  %v556_v13 = vld [vmem:[#allocation3 + $0x1078] sm:$0xff]  ;;  %v2058_v14 = vadd.f32 %v2057_v2, %v656_v61  ;;  %v2014_v15 = vadd.f32 %v2013_v3, %v614_v62  ;;  %v718_v16 = vld [vmem:[#allocation3 + $0x1588] sm:$0xff]  ;;  %v599_v23 = vld [vmem:[#allocation3 + $0x11d0] sm:$0xff] }
  0xe4   :  { %v1887_v17 = vadd.f32 %v1886_v5, %v495_v51  ;;  %v1995_v18 = vadd.f32 %v1994_v6, %v597_v0  ;;  %v658_v20 = vld [vmem:[#allocation3 + $0x13a8] sm:$0xff]  ;;  %v616_v21 = vld [vmem:[#allocation3 + $0x1258] sm:$0xff]  ;;  %v2123_v22 = vadd.f32 %v2122_v10, %v717_v4  ;;  %v557_v24 = vld [vmem:[#allocation3 + $0x1080] sm:$0xff] }
  0xe5   :  { %v1951_v19 = vadd.f32 %v1950_v7, %v555_v1  ;;  %v2059_v25 = vadd.f32 %v2058_v14, %v657_v8  ;;  %v2015_v26 = vadd.f32 %v2014_v15, %v615_v9  ;;  %v719_v27 = vld [vmem:[#allocation3 + $0x1590] sm:$0xff]  ;;  %v600_v29 = vld [vmem:[#allocation3 + $0x11d8] sm:$0xff]  ;;  %v617_v33 = vld [vmem:[#allocation3 + $0x1260] sm:$0xff] }
  0xe6   :  { %v1889_v28 = vadd.f32 %v1888_v11, %v1887_v17  ;;  %v1996_v30 = vadd.f32 %v1995_v18, %v598_v12  ;;  %v659_v32 = vld [vmem:[#allocation3 + $0x13b0] sm:$0xff]  ;;  %v2124_v34 = vadd.f32 %v2123_v22, %v718_v16  ;;  %v601_v35 = vld [vmem:[#allocation3 + $0x11e0] sm:$0xff]  ;;  %v558_v36 = vld [vmem:[#allocation3 + $0x1088] sm:$0xff] }
  0xe7   :  { %v1952_v31 = vadd.f32 %v1951_v19, %v556_v13  ;;  %v559_v37 = vld [vmem:[#allocation3 + $0x1090] sm:$0xff]  ;;  %v2060_v38 = vadd.f32 %v2059_v25, %v658_v20  ;;  %v2016_v39 = vadd.f32 %v2015_v26, %v616_v21  ;;  %v720_v40 = vld [vmem:[#allocation3 + $0x1598] sm:$0xff]  ;;  %v618_v44 = vld [vmem:[#allocation3 + $0x1268] sm:$0xff] }
  0xe8   :  { %1890 = vadd.xlane.f32.xlu0 %v1889_v28  ;;  %v1997_v41 = vadd.f32 %v1996_v30, %v599_v23  ;;  %v660_v43 = vld [vmem:[#allocation3 + $0x13b8] sm:$0xff]  ;;  %v721_v45 = vld [vmem:[#allocation3 + $0x15a0] sm:$0xff]  ;;  %v2125_v46 = vadd.f32 %v2124_v34, %v719_v27  ;;  %v678_v50 = vld [vmem:[#allocation3 + $0x1448] sm:$0xff] }
  0xe9   :  { %v1953_v42 = vadd.f32 %v1952_v31, %v557_v24  ;;  %v2061_v47 = vadd.f32 %v2060_v38, %v659_v32  ;;  %v2017_v48 = vadd.f32 %v2016_v39, %v617_v33  ;;  %v677_v49 = vld [vmem:[#allocation3 + $0x1440] sm:$0xff]  ;;  %v679_v51 = vld [vmem:[#allocation3 + $0x1450] sm:$0xff]  ;;  %v602_v52 = vld [vmem:[#allocation3 + $0x11e8] sm:$0xff] }
  0xea   :  { %v1998_v53 = vadd.f32 %v1997_v41, %v600_v29  ;;  %v661_v55 = vld [vmem:[#allocation3 + $0x13c0] sm:$0xff]  ;;  %v619_v56 = vld [vmem:[#allocation3 + $0x1270] sm:$0xff]  ;;  %v2126_v57 = vadd.f32 %v2125_v46, %v720_v40  ;;  %v2082_v58 = vadd.f32 %v678_v50, %v677_v49  ;;  %v560_v60 = vld [vmem:[#allocation3 + $0x1098] sm:$0xff] }
  0xeb   :  { %v1954_v54 = vadd.f32 %v1953_v42, %v558_v36  ;;  %v603_v59 = vld [vmem:[#allocation3 + $0x11f0] sm:$0xff]  ;;  %v2062_v61 = vadd.f32 %v2061_v47, %v660_v43  ;;  %v2018_v62 = vadd.f32 %v2017_v48, %v618_v44  ;;  %v722_v63 = vld [vmem:[#allocation3 + $0x15a8] sm:$0xff]  ;;  %v680_v0 = vld [vmem:[#allocation3 + $0x1458] sm:$0xff] }
  0xec   :  { %v604_v1 = vld [vmem:[#allocation3 + $0x11f8] sm:$0xff]  ;;  %v1999_v2 = vadd.f32 %v1998_v53, %v601_v35  ;;  %v662_v4 = vld [vmem:[#allocation3 + $0x13c8] sm:$0xff]  ;;  %v2127_v6 = vadd.f32 %v2126_v57, %v721_v45  ;;  %v2083_v7 = vadd.f32 %v2082_v58, %v679_v51  ;;  %v561_v8 = vld [vmem:[#allocation3 + $0x10a0] sm:$0xff] }
  0xed   :  { %v1955_v3 = vadd.f32 %v1954_v54, %v559_v37  ;;  %v620_v5 = vld [vmem:[#allocation3 + $0x1278] sm:$0xff]  ;;  %v2063_v9 = vadd.f32 %v2062_v61, %v661_v55  ;;  %v2019_v10 = vadd.f32 %v2018_v62, %v619_v56  ;;  %v723_v11 = vld [vmem:[#allocation3 + $0x15b0] sm:$0xff]  ;;  %v681_v12 = vld [vmem:[#allocation3 + $0x1460] sm:$0xff]  ;;  %v2002_v19 = vsel %vm1431_vm0, %v604_v1, 0.0 }
  0xee   :  { %v2000_v13 = vadd.f32 %v1999_v2, %v602_v52  ;;  %v663_v15 = vld [vmem:[#allocation3 + $0x13d0] sm:$0xff]  ;;  %v621_v16 = vld [vmem:[#allocation3 + $0x1280] sm:$0xff]  ;;  %v2128_v17 = vadd.f32 %v2127_v6, %v722_v63  ;;  %v2084_v18 = vadd.f32 %v2083_v7, %v680_v0  ;;  %v562_v20 = vld [vmem:[#allocation3 + $0x10a8] sm:$0xff] }
  0xef   :  { %v1956_v14 = vadd.f32 %v1955_v3, %v560_v60  ;;  %v2064_v21 = vadd.f32 %v2063_v9, %v662_v4  ;;  %v2020_v22 = vadd.f32 %v2019_v10, %v620_v5  ;;  %v724_v23 = vld [vmem:[#allocation3 + $0x15b8] sm:$0xff]  ;;  %v682_v24 = vld [vmem:[#allocation3 + $0x1468] sm:$0xff]  ;;  %v563_v31 = vld [vmem:[#allocation3 + $0x10b0] sm:$0xff] }
  0xf0   :  { %v2001_v25 = vadd.f32 %v2000_v13, %v603_v59  ;;  %v664_v27 = vld [vmem:[#allocation3 + $0x13d8] sm:$0xff]  ;;  %v622_v28 = vld [vmem:[#allocation3 + $0x1288] sm:$0xff]  ;;  %v2129_v29 = vadd.f32 %v2128_v17, %v723_v11  ;;  %v2085_v30 = vadd.f32 %v2084_v18, %v681_v12  ;;  %v725_v34 = vld [vmem:[#allocation3 + $0x15c0] sm:$0xff] }
  0xf1   :  { %v1957_v26 = vadd.f32 %v1956_v14, %v561_v8  ;;  %v2065_v32 = vadd.f32 %v2064_v21, %v663_v15  ;;  %v2021_v33 = vadd.f32 %v2020_v22, %v621_v16  ;;  %v683_v35 = vld [vmem:[#allocation3 + $0x1470] sm:$0xff]  ;;  %v564_v37 = vld [vmem:[#allocation3 + $0x10b8] sm:$0xff]  ;;  %v665_v39 = vld [vmem:[#allocation3 + $0x13e0] sm:$0xff] }
  0xf2   :  { %v2003_v36 = vadd.f32 %v2002_v19, %v2001_v25  ;;  %v623_v40 = vld [vmem:[#allocation3 + $0x1290] sm:$0xff]  ;;  %v2130_v41 = vadd.f32 %v2129_v29, %v724_v23  ;;  %v2086_v42 = vadd.f32 %v2085_v30, %v682_v24  ;;  %v565_v43 = vld [vmem:[#allocation3 + $0x10c0] sm:$0xff]  ;;  %v666_v44 = vld [vmem:[#allocation3 + $0x13e8] sm:$0xff] }
  0xf3   :  { %v1958_v38 = vadd.f32 %v1957_v26, %v562_v20  ;;  %v2066_v45 = vadd.f32 %v2065_v32, %v664_v27  ;;  %v2022_v46 = vadd.f32 %v2021_v33, %v622_v28  ;;  %v726_v47 = vld [vmem:[#allocation3 + $0x15c8] sm:$0xff]  ;;  %v684_v48 = vld [vmem:[#allocation3 + $0x1478] sm:$0xff]  ;;  %v727_v51 = vld [vmem:[#allocation3 + $0x15d0] sm:$0xff] }
  0xf4   :  { %2004 = vadd.xlane.f32.xlu1 %v2003_v36  ;;  %v624_v50 = vld [vmem:[#allocation3 + $0x1298] sm:$0xff]  ;;  %v2131_v52 = vadd.f32 %v2130_v41, %v725_v34  ;;  %v685_v53 = vld [vmem:[#allocation3 + $0x1480] sm:$0xff]  ;;  %v2087_v54 = vadd.f32 %v2086_v42, %v683_v35  ;;  %v786_v58 = vld [vmem:[#allocation3 + $0x17a8] sm:$0xff] }
  0xf5   :  { %v1959_v49 = vadd.f32 %v1958_v38, %v563_v31  ;;  %v2067_v55 = vadd.f32 %v2066_v45, %v665_v39  ;;  %v2023_v56 = vadd.f32 %v2022_v46, %v623_v40  ;;  %v785_v57 = vld [vmem:[#allocation3 + $0x17a0] sm:$0xff]  ;;  %v787_v59 = vld [vmem:[#allocation3 + $0x17b0] sm:$0xff]  ;;  %v566_v60 = vld [vmem:[#allocation3 + $0x10c8] sm:$0xff] }
  0xf6   :  { %v667_v62 = vld [vmem:[#allocation3 + $0x13f0] sm:$0xff]  ;;  %v625_v63 = vld [vmem:[#allocation3 + $0x12a0] sm:$0xff]  ;;  %v2132_v0 = vadd.f32 %v2131_v52, %v726_v47  ;;  %v2088_v1 = vadd.f32 %v2087_v54, %v684_v48  ;;  %v2196_v2 = vadd.f32 %v786_v58, %v785_v57  ;;  %v728_v6 = vld [vmem:[#allocation3 + $0x15d8] sm:$0xff] }
  0xf7   :  { %v1960_v61 = vadd.f32 %v1959_v49, %v564_v37  ;;  %v567_v3 = vld [vmem:[#allocation3 + $0x10d0] sm:$0xff]  ;;  %v2068_v4 = vadd.f32 %v2067_v55, %v666_v44  ;;  %v2024_v5 = vadd.f32 %v2023_v56, %v624_v50  ;;  %v686_v7 = vld [vmem:[#allocation3 + $0x1488] sm:$0xff]  ;;  %v788_v8 = vld [vmem:[#allocation3 + $0x17b8] sm:$0xff] }
  0xf8   :  { %v568_v9 = vld [vmem:[#allocation3 + $0x10d8] sm:$0xff]  ;;  %v626_v12 = vld [vmem:[#allocation3 + $0x12a8] sm:$0xff]  ;;  %v2133_v13 = vadd.f32 %v2132_v0, %v727_v51  ;;  %v2089_v14 = vadd.f32 %v2088_v1, %v685_v53  ;;  %v2197_v15 = vadd.f32 %v2196_v2, %v787_v59  ;;  %v729_v18 = vld [vmem:[#allocation3 + $0x15e0] sm:$0xff] }
  0xf9   :  { %v1961_v10 = vadd.f32 %v1960_v61, %v565_v43  ;;  %v668_v11 = vld [vmem:[#allocation3 + $0x13f8] sm:$0xff]  ;;  %v2069_v16 = vadd.f32 %v2068_v4, %v667_v62  ;;  %v2025_v17 = vadd.f32 %v2024_v5, %v625_v63  ;;  %v687_v19 = vld [vmem:[#allocation3 + $0x1490] sm:$0xff]  ;;  %v789_v20 = vld [vmem:[#allocation3 + $0x17c0] sm:$0xff]  ;;  %v1964_v27 = vsel %vm1431_vm0, %v568_v9, 0.0 }
  0xfa   :  { %v669_v22 = vld [vmem:[#allocation3 + $0x1400] sm:$0xff]  ;;  %v627_v23 = vld [vmem:[#allocation3 + $0x12b0] sm:$0xff]  ;;  %v2134_v24 = vadd.f32 %v2133_v13, %v728_v6  ;;  %v2090_v25 = vadd.f32 %v2089_v14, %v686_v7  ;;  %v2198_v26 = vadd.f32 %v2197_v15, %v788_v8  ;;  %v730_v30 = vld [vmem:[#allocation3 + $0x15e8] sm:$0xff] }
  0xfb   :  { %v1962_v21 = vadd.f32 %v1961_v10, %v566_v60  ;;  %v2070_v28 = vadd.f32 %v2069_v16, %v668_v11  ;;  %v2026_v29 = vadd.f32 %v2025_v17, %v626_v12  ;;  %v688_v31 = vld [vmem:[#allocation3 + $0x1498] sm:$0xff]  ;;  %v790_v32 = vld [vmem:[#allocation3 + $0x17c8] sm:$0xff]  ;;  %v671_v35 = vld [vmem:[#allocation3 + $0x1410] sm:$0xff] }
  0xfc   :  { %v670_v34 = vld [vmem:[#allocation3 + $0x1408] sm:$0xff]  ;;  %v628_v36 = vld [vmem:[#allocation3 + $0x12b8] sm:$0xff]  ;;  %v2135_v37 = vadd.f32 %v2134_v24, %v729_v18  ;;  %v2091_v38 = vadd.f32 %v2090_v25, %v687_v19  ;;  %v2199_v39 = vadd.f32 %v2198_v26, %v789_v20  ;;  %v731_v42 = vld [vmem:[#allocation3 + $0x15f0] sm:$0xff] }
  0xfd   :  { %v1963_v33 = vadd.f32 %v1962_v21, %v567_v3  ;;  %v2071_v40 = vadd.f32 %v2070_v28, %v669_v22  ;;  %v2027_v41 = vadd.f32 %v2026_v29, %v627_v23  ;;  %v689_v43 = vld [vmem:[#allocation3 + $0x14a0] sm:$0xff]  ;;  %v791_v44 = vld [vmem:[#allocation3 + $0x17d0] sm:$0xff]  ;;  %v672_v46 = vld [vmem:[#allocation3 + $0x1418] sm:$0xff] }
  0xfe   :  { %v629_v47 = vld [vmem:[#allocation3 + $0x12c0] sm:$0xff]  ;;  %v630_v48 = vld [vmem:[#allocation3 + $0x12c8] sm:$0xff]  ;;  %v2136_v49 = vadd.f32 %v2135_v37, %v730_v30  ;;  %v2092_v50 = vadd.f32 %v2091_v38, %v688_v31  ;;  %v2200_v51 = vadd.f32 %v2199_v39, %v790_v32  ;;  %v732_v54 = vld [vmem:[#allocation3 + $0x15f8] sm:$0xff] }
  0xff   :  { %v1965_v45 = vadd.f32 %v1964_v27, %v1963_v33  ;;  %v2072_v52 = vadd.f32 %v2071_v40, %v670_v34  ;;  %v2028_v53 = vadd.f32 %v2027_v41, %v628_v36  ;;  %v690_v55 = vld [vmem:[#allocation3 + $0x14a8] sm:$0xff]  ;;  %v792_v56 = vld [vmem:[#allocation3 + $0x17d8] sm:$0xff]  ;;  %v673_v57 = vld [vmem:[#allocation3 + $0x1420] sm:$0xff] }
 0x100   :  { %v733_v58 = vld [vmem:[#allocation3 + $0x1600] sm:$0xff]  ;;  %v2137_v59 = vadd.f32 %v2136_v49, %v731_v42  ;;  %v691_v60 = vld [vmem:[#allocation3 + $0x14b0] sm:$0xff]  ;;  %v2093_v61 = vadd.f32 %v2092_v50, %v689_v43  ;;  %v2201_v63 = vadd.f32 %v2200_v51, %v791_v44  ;;  %v750_v3 = vld [vmem:[#allocation3 + $0x1688] sm:$0xff] }
 0x101   :  { %1966 = vadd.xlane.f32.xlu0 %v1965_v45  ;;  %v793_v62 = vld [vmem:[#allocation3 + $0x17e0] sm:$0xff]  ;;  %v2073_v0 = vadd.f32 %v2072_v52, %v671_v35  ;;  %v2029_v1 = vadd.f32 %v2028_v53, %v629_v47  ;;  %v751_v4 = vld [vmem:[#allocation3 + $0x1690] sm:$0xff]  ;;  %v674_v5 = vld [vmem:[#allocation3 + $0x1428] sm:$0xff] }
 0x102   :  { %v749_v2 = vld [vmem:[#allocation3 + $0x1680] sm:$0xff]  ;;  %v631_v6 = vld [vmem:[#allocation3 + $0x12d0] sm:$0xff]  ;;  %v734_v7 = vld [vmem:[#allocation3 + $0x1608] sm:$0xff]  ;;  %v2138_v8 = vadd.f32 %v2137_v59, %v732_v54  ;;  %v2094_v9 = vadd.f32 %v2093_v61, %v690_v55  ;;  %v2202_v10 = vadd.f32 %v2201_v63, %v792_v56 }
 0x103   :  { %v2158_v11 = vadd.f32 %v750_v3, %v749_v2  ;;  %v2074_v12 = vadd.f32 %v2073_v0, %v672_v46  ;;  %v2030_v13 = vadd.f32 %v2029_v1, %v630_v48  ;;  %v692_v14 = vld [vmem:[#allocation3 + $0x14b8] sm:$0xff]  ;;  %v794_v15 = vld [vmem:[#allocation3 + $0x17e8] sm:$0xff]  ;;  %v735_v19 = vld [vmem:[#allocation3 + $0x1610] sm:$0xff] }
 0x104   :  { %v752_v16 = vld [vmem:[#allocation3 + $0x1698] sm:$0xff]  ;;  %v2139_v20 = vadd.f32 %v2138_v8, %v733_v58  ;;  %v2095_v21 = vadd.f32 %v2094_v9, %v691_v60  ;;  %v2203_v22 = vadd.f32 %v2202_v10, %v793_v62  ;;  %v693_v26 = vld [vmem:[#allocation3 + $0x14c0] sm:$0xff]  ;;  %v795_v27 = vld [vmem:[#allocation3 + $0x17f0] sm:$0xff] }
 0x105   :  { %v676_v17 = vld [vmem:[#allocation3 + $0x1438] sm:$0xff]  ;;  %v2159_v23 = vadd.f32 %v2158_v11, %v751_v4  ;;  %v2075_v24 = vadd.f32 %v2074_v12, %v673_v57  ;;  %v2031_v25 = vadd.f32 %v2030_v13, %v631_v6  ;;  %v753_v28 = vld [vmem:[#allocation3 + $0x16a0] sm:$0xff]  ;;  %v675_v29 = vld [vmem:[#allocation3 + $0x1430] sm:$0xff] }
 0x106   :  { %v632_v18 = vld [vmem:[#allocation3 + $0x12d8] sm:$0xff]  ;;  %v633_v30 = vld [vmem:[#allocation3 + $0x12e0] sm:$0xff]  ;;  %v2140_v32 = vadd.f32 %v2139_v20, %v734_v7  ;;  %v2096_v33 = vadd.f32 %v2095_v21, %v692_v14  ;;  %v2204_v34 = vadd.f32 %v2203_v22, %v794_v15  ;;  %v2078_v37 = vsel %vm1431_vm0, %v676_v17, 0.0  ;;  %v694_v39 = vld [vmem:[#allocation3 + $0x14c8] sm:$0xff] }
 0x107   :  { %v736_v31 = vld [vmem:[#allocation3 + $0x1618] sm:$0xff]  ;;  %v2160_v35 = vadd.f32 %v2159_v23, %v752_v16  ;;  %v2076_v36 = vadd.f32 %v2075_v24, %v674_v5  ;;  %v2032_v38 = vadd.f32 %v2031_v25, %v632_v18  ;;  %v754_v41 = vld [vmem:[#allocation3 + $0x16a8] sm:$0xff]  ;;  %v737_v43 = vld [vmem:[#allocation3 + $0x1620] sm:$0xff] }
 0x108   :  { %v796_v40 = vld [vmem:[#allocation3 + $0x17f8] sm:$0xff]  ;;  %v634_v42 = vld [vmem:[#allocation3 + $0x12e8] sm:$0xff]  ;;  %v2141_v44 = vadd.f32 %v2140_v32, %v735_v19  ;;  %v2097_v45 = vadd.f32 %v2096_v33, %v693_v26  ;;  %v2205_v46 = vadd.f32 %v2204_v34, %v795_v27  ;;  %v695_v50 = vld [vmem:[#allocation3 + $0x14d0] sm:$0xff] }
 0x109   :  { %v2161_v47 = vadd.f32 %v2160_v35, %v753_v28  ;;  %v2077_v48 = vadd.f32 %v2076_v36, %v675_v29  ;;  %v2033_v49 = vadd.f32 %v2032_v38, %v633_v30  ;;  %v797_v51 = vld [vmem:[#allocation3 + $0x1800] sm:$0xff]  ;;  %v755_v52 = vld [vmem:[#allocation3 + $0x16b0] sm:$0xff]  ;;  %v636_v54 = vld [vmem:[#allocation3 + $0x12f8] sm:$0xff] }
 0x10a   :  { %v635_v53 = vld [vmem:[#allocation3 + $0x12f0] sm:$0xff]  ;;  %v738_v55 = vld [vmem:[#allocation3 + $0x1628] sm:$0xff]  ;;  %v2142_v56 = vadd.f32 %v2141_v44, %v736_v31  ;;  %v2098_v57 = vadd.f32 %v2097_v45, %v694_v39  ;;  %v2206_v58 = vadd.f32 %v2205_v46, %v796_v40  ;;  %v696_v62 = vld [vmem:[#allocation3 + $0x14d8] sm:$0xff] }
 0x10b   :  { %v2162_v59 = vadd.f32 %v2161_v47, %v754_v41  ;;  %v2079_v60 = vadd.f32 %v2078_v37, %v2077_v48  ;;  %v2034_v61 = vadd.f32 %v2033_v49, %v634_v42  ;;  %v798_v63 = vld [vmem:[#allocation3 + $0x1808] sm:$0xff]  ;;  %v756_v0 = vld [vmem:[#allocation3 + $0x16b8] sm:$0xff]  ;;  %v637_v1 = vld [vmem:[#allocation3 + $0x1300] sm:$0xff] }
 0x10c   :  { %v739_v2 = vld [vmem:[#allocation3 + $0x1630] sm:$0xff]  ;;  %v2143_v3 = vadd.f32 %v2142_v56, %v737_v43  ;;  %v697_v4 = vld [vmem:[#allocation3 + $0x14e0] sm:$0xff]  ;;  %v2099_v5 = vadd.f32 %v2098_v57, %v695_v50  ;;  %v2207_v7 = vadd.f32 %v2206_v58, %v797_v51  ;;  %v858_v12 = vld [vmem:[#allocation3 + $0x19e8] sm:$0xff] }
 0x10d   :  { %v799_v6 = vld [vmem:[#allocation3 + $0x1810] sm:$0xff]  ;;  %v2163_v8 = vadd.f32 %v2162_v59, %v755_v52  ;;  %2080 = vadd.xlane.f32.xlu1 %v2079_v60  ;;  %v2035_v9 = vadd.f32 %v2034_v61, %v635_v53  ;;  %v757_v10 = vld [vmem:[#allocation3 + $0x16c0] sm:$0xff]  ;;  %v638_v13 = vld [vmem:[#allocation3 + $0x1308] sm:$0xff] }
 0x10e   :  { %v857_v11 = vld [vmem:[#allocation3 + $0x19e0] sm:$0xff]  ;;  %v740_v14 = vld [vmem:[#allocation3 + $0x1638] sm:$0xff]  ;;  %v2144_v15 = vadd.f32 %v2143_v3, %v738_v55  ;;  %v2100_v16 = vadd.f32 %v2099_v5, %v696_v62  ;;  %v2208_v17 = vadd.f32 %v2207_v7, %v798_v63  ;;  %v859_v19 = vld [vmem:[#allocation3 + $0x19f0] sm:$0xff] }
 0x10f   :  { %v2164_v18 = vadd.f32 %v2163_v8, %v756_v0  ;;  %v2036_v20 = vadd.f32 %v2035_v9, %v636_v54  ;;  %v698_v21 = vld [vmem:[#allocation3 + $0x14e8] sm:$0xff]  ;;  %v800_v22 = vld [vmem:[#allocation3 + $0x1818] sm:$0xff]  ;;  %v2272_v24 = vadd.f32 %v858_v12, %v857_v11  ;;  %v741_v26 = vld [vmem:[#allocation3 + $0x1640] sm:$0xff] }
 0x110   :  { %v758_v23 = vld [vmem:[#allocation3 + $0x16c8] sm:$0xff]  ;;  %v640_v25 = vld [vmem:[#allocation3 + $0x1318] sm:$0xff]  ;;  %v2145_v27 = vadd.f32 %v2144_v15, %v739_v2  ;;  %v2101_v28 = vadd.f32 %v2100_v16, %v697_v4  ;;  %v2209_v29 = vadd.f32 %v2208_v17, %v799_v6  ;;  %v699_v33 = vld [vmem:[#allocation3 + $0x14f0] sm:$0xff] }
 0x111   :  { %v2165_v30 = vadd.f32 %v2164_v18, %v757_v10  ;;  %v860_v31 = vld [vmem:[#allocation3 + $0x19f8] sm:$0xff]  ;;  %v2037_v32 = vadd.f32 %v2036_v20, %v637_v1  ;;  %v801_v34 = vld [vmem:[#allocation3 + $0x1820] sm:$0xff]  ;;  %v759_v35 = vld [vmem:[#allocation3 + $0x16d0] sm:$0xff]  ;;  %v2273_v36 = vadd.f32 %v2272_v24, %v859_v19  ;;  %v2040_v45 = vsel %vm1431_vm0, %v640_v25, 0.0 }
 0x112   :  { %v639_v37 = vld [vmem:[#allocation3 + $0x1310] sm:$0xff]  ;;  %v742_v38 = vld [vmem:[#allocation3 + $0x1648] sm:$0xff]  ;;  %v2146_v39 = vadd.f32 %v2145_v27, %v740_v14  ;;  %v2102_v40 = vadd.f32 %v2101_v28, %v698_v21  ;;  %v2210_v41 = vadd.f32 %v2209_v29, %v800_v22  ;;  %v861_v43 = vld [vmem:[#allocation3 + $0x1a00] sm:$0xff] }
 0x113   :  { %v2166_v42 = vadd.f32 %v2165_v30, %v758_v23  ;;  %v2038_v44 = vadd.f32 %v2037_v32, %v638_v13  ;;  %v700_v46 = vld [vmem:[#allocation3 + $0x14f8] sm:$0xff]  ;;  %v802_v47 = vld [vmem:[#allocation3 + $0x1828] sm:$0xff]  ;;  %v2274_v49 = vadd.f32 %v2273_v36, %v860_v31  ;;  %v743_v50 = vld [vmem:[#allocation3 + $0x1650] sm:$0xff] }
 0x114   :  { %v760_v48 = vld [vmem:[#allocation3 + $0x16d8] sm:$0xff]  ;;  %v2147_v51 = vadd.f32 %v2146_v39, %v741_v26  ;;  %v2103_v52 = vadd.f32 %v2102_v40, %v699_v33  ;;  %v2211_v53 = vadd.f32 %v2210_v41, %v801_v34  ;;  %v862_v55 = vld [vmem:[#allocation3 + $0x1a08] sm:$0xff]  ;;  %v701_v57 = vld [vmem:[#allocation3 + $0x1500] sm:$0xff] }
 0x115   :  { %v2167_v54 = vadd.f32 %v2166_v42, %v759_v35  ;;  %v2039_v56 = vadd.f32 %v2038_v44, %v639_v37  ;;  %v803_v58 = vld [vmem:[#allocation3 + $0x1830] sm:$0xff]  ;;  %v761_v59 = vld [vmem:[#allocation3 + $0x16e0] sm:$0xff]  ;;  %v2275_v60 = vadd.f32 %v2274_v49, %v861_v43  ;;  %v744_v61 = vld [vmem:[#allocation3 + $0x1658] sm:$0xff] }
 0x116   :  { %v2148_v62 = vadd.f32 %v2147_v51, %v742_v38  ;;  %v2104_v63 = vadd.f32 %v2103_v52, %v700_v46  ;;  %v2212_v0 = vadd.f32 %v2211_v53, %v802_v47  ;;  %v863_v2 = vld [vmem:[#allocation3 + $0x1a10] sm:$0xff]  ;;  %v745_v4 = vld [vmem:[#allocation3 + $0x1660] sm:$0xff]  ;;  %v702_v5 = vld [vmem:[#allocation3 + $0x1508] sm:$0xff] }
 0x117   :  { %v2168_v1 = vadd.f32 %v2167_v54, %v760_v48  ;;  %v2041_v3 = vadd.f32 %v2040_v45, %v2039_v56  ;;  %v804_v6 = vld [vmem:[#allocation3 + $0x1838] sm:$0xff]  ;;  %v762_v7 = vld [vmem:[#allocation3 + $0x16e8] sm:$0xff]  ;;  %v2276_v8 = vadd.f32 %v2275_v60, %v862_v55  ;;  %v703_v10 = vld [vmem:[#allocation3 + $0x1510] sm:$0xff] }
 0x118   :  { %v2149_v9 = vadd.f32 %v2148_v62, %v743_v50  ;;  %v2105_v11 = vadd.f32 %v2104_v63, %v701_v57  ;;  %v805_v12 = vld [vmem:[#allocation3 + $0x1840] sm:$0xff]  ;;  %v2213_v13 = vadd.f32 %v2212_v0, %v803_v58  ;;  %v864_v15 = vld [vmem:[#allocation3 + $0x1a18] sm:$0xff]  ;;  %v763_v16 = vld [vmem:[#allocation3 + $0x16f0] sm:$0xff] }
 0x119   :  { %v2169_v14 = vadd.f32 %v2168_v1, %v761_v59  ;;  %2042 = vadd.xlane.f32.xlu0 %v2041_v3  ;;  %v2277_v17 = vadd.f32 %v2276_v8, %v863_v2  ;;  %v821_v18 = vld [vmem:[#allocation3 + $0x18c0] sm:$0xff]  ;;  %v822_v19 = vld [vmem:[#allocation3 + $0x18c8] sm:$0xff]  ;;  %v823_v26 = vld [vmem:[#allocation3 + $0x18d0] sm:$0xff] }
 0x11a   :  { %v746_v20 = vld [vmem:[#allocation3 + $0x1668] sm:$0xff]  ;;  %v2150_v21 = vadd.f32 %v2149_v9, %v744_v61  ;;  %v2106_v22 = vadd.f32 %v2105_v11, %v702_v5  ;;  %v2214_v23 = vadd.f32 %v2213_v13, %v804_v6  ;;  %v865_v25 = vld [vmem:[#allocation3 + $0x1a20] sm:$0xff]  ;;  %v747_v27 = vld [vmem:[#allocation3 + $0x1670] sm:$0xff]  ;;  %v2234_v32 = vadd.f32 %v822_v19, %v821_v18 }
 0x11b   :  { %v2170_v24 = vadd.f32 %v2169_v14, %v762_v7  ;;  %v704_v28 = vld [vmem:[#allocation3 + $0x1518] sm:$0xff]  ;;  %v806_v29 = vld [vmem:[#allocation3 + $0x1848] sm:$0xff]  ;;  %v2278_v31 = vadd.f32 %v2277_v17, %v864_v15  ;;  %v705_v40 = vld [vmem:[#allocation3 + $0x1520] sm:$0xff] }
 0x11c   :  { %v764_v30 = vld [vmem:[#allocation3 + $0x16f8] sm:$0xff]  ;;  %v2151_v34 = vadd.f32 %v2150_v21, %v745_v4  ;;  %v2107_v35 = vadd.f32 %v2106_v22, %v703_v10  ;;  %v2215_v36 = vadd.f32 %v2214_v23, %v805_v12  ;;  %v866_v38 = vld [vmem:[#allocation3 + $0x1a28] sm:$0xff]  ;;  %v807_v41 = vld [vmem:[#allocation3 + $0x1850] sm:$0xff]  ;;  %v2235_v44 = vadd.f32 %v2234_v32, %v823_v26 }
 0x11d   :  { %v748_v33 = vld [vmem:[#allocation3 + $0x1678] sm:$0xff]  ;;  %v2171_v37 = vadd.f32 %v2170_v24, %v763_v16  ;;  %v765_v42 = vld [vmem:[#allocation3 + $0x1700] sm:$0xff]  ;;  %v2279_v43 = vadd.f32 %v2278_v31, %v865_v25  ;;  %v867_v49 = vld [vmem:[#allocation3 + $0x1a30] sm:$0xff] }
 0x11e   :  { %v824_v39 = vld [vmem:[#allocation3 + $0x18d8] sm:$0xff]  ;;  %v2152_v45 = vadd.f32 %v2151_v34, %v746_v20  ;;  %v2108_v46 = vadd.f32 %v2107_v35, %v704_v28  ;;  %v2216_v47 = vadd.f32 %v2215_v36, %v806_v29  ;;  %v825_v50 = vld [vmem:[#allocation3 + $0x18e0] sm:$0xff]  ;;  %v2154_v51 = vsel %vm1431_vm0, %v748_v33, 0.0  ;;  %v706_v52 = vld [vmem:[#allocation3 + $0x1528] sm:$0xff] }
 0x11f   :  { %v2172_v48 = vadd.f32 %v2171_v37, %v764_v30  ;;  %v808_v53 = vld [vmem:[#allocation3 + $0x1858] sm:$0xff]  ;;  %v766_v54 = vld [vmem:[#allocation3 + $0x1708] sm:$0xff]  ;;  %v2280_v55 = vadd.f32 %v2279_v43, %v866_v38  ;;  %v2236_v56 = vadd.f32 %v2235_v44, %v824_v39  ;;  %v707_v63 = vld [vmem:[#allocation3 + $0x1530] sm:$0xff] }
 0x120   :  { %v2153_v57 = vadd.f32 %v2152_v45, %v747_v27  ;;  %v2109_v58 = vadd.f32 %v2108_v46, %v705_v40  ;;  %v2217_v59 = vadd.f32 %v2216_v47, %v807_v41  ;;  %v868_v61 = vld [vmem:[#allocation3 + $0x1a38] sm:$0xff]  ;;  %v826_v62 = vld [vmem:[#allocation3 + $0x18e8] sm:$0xff]  ;;  %v809_v0 = vld [vmem:[#allocation3 + $0x1860] sm:$0xff] }
 0x121   :  { %v2173_v60 = vadd.f32 %v2172_v48, %v765_v42  ;;  %v767_v1 = vld [vmem:[#allocation3 + $0x1710] sm:$0xff]  ;;  %v2281_v2 = vadd.f32 %v2280_v55, %v867_v49  ;;  %v2237_v3 = vadd.f32 %v2236_v56, %v825_v50  ;;  %v708_v5 = vld [vmem:[#allocation3 + $0x1538] sm:$0xff]  ;;  %v869_v9 = vld [vmem:[#allocation3 + $0x1a40] sm:$0xff] }
 0x122   :  { %v2155_v4 = vadd.f32 %v2154_v51, %v2153_v57  ;;  %v2110_v6 = vadd.f32 %v2109_v58, %v706_v52  ;;  %v2218_v7 = vadd.f32 %v2217_v59, %v808_v53  ;;  %v827_v10 = vld [vmem:[#allocation3 + $0x18f0] sm:$0xff]  ;;  %v709_v11 = vld [vmem:[#allocation3 + $0x1540] sm:$0xff]  ;;  %v810_v12 = vld [vmem:[#allocation3 + $0x1868] sm:$0xff] }
 0x123   :  { %v2174_v8 = vadd.f32 %v2173_v60, %v766_v54  ;;  %v811_v13 = vld [vmem:[#allocation3 + $0x1870] sm:$0xff]  ;;  %v768_v14 = vld [vmem:[#allocation3 + $0x1718] sm:$0xff]  ;;  %v2282_v15 = vadd.f32 %v2281_v2, %v868_v61  ;;  %v2238_v16 = vadd.f32 %v2237_v3, %v826_v62  ;;  %v769_v19 = vld [vmem:[#allocation3 + $0x1720] sm:$0xff] }
 0x124   :  { %2156 = vadd.xlane.f32.xlu1 %v2155_v4  ;;  %v2111_v17 = vadd.f32 %v2110_v6, %v707_v63  ;;  %v2219_v18 = vadd.f32 %v2218_v7, %v809_v0  ;;  %v870_v21 = vld [vmem:[#allocation3 + $0x1a48] sm:$0xff]  ;;  %v828_v22 = vld [vmem:[#allocation3 + $0x18f8] sm:$0xff]  ;;  %v929_v25 = vld [vmem:[#allocation3 + $0x1c20] sm:$0xff] }
 0x125   :  { %v2175_v20 = vadd.f32 %v2174_v8, %v767_v1  ;;  %v2283_v23 = vadd.f32 %v2282_v15, %v869_v9  ;;  %v2239_v24 = vadd.f32 %v2238_v16, %v827_v10  ;;  %v930_v26 = vld [vmem:[#allocation3 + $0x1c28] sm:$0xff]  ;;  %v931_v27 = vld [vmem:[#allocation3 + $0x1c30] sm:$0xff]  ;;  %v829_v33 = vld [vmem:[#allocation3 + $0x1900] sm:$0xff] }
 0x126   :  { %v710_v28 = vld [vmem:[#allocation3 + $0x1548] sm:$0xff]  ;;  %v2112_v29 = vadd.f32 %v2111_v17, %v708_v5  ;;  %v2220_v30 = vadd.f32 %v2219_v18, %v810_v12  ;;  %v871_v32 = vld [vmem:[#allocation3 + $0x1a50] sm:$0xff]  ;;  %v2348_v34 = vadd.f32 %v930_v26, %v929_v25  ;;  %v812_v36 = vld [vmem:[#allocation3 + $0x1878] sm:$0xff] }
 0x127   :  { %v2176_v31 = vadd.f32 %v2175_v20, %v768_v14  ;;  %v711_v35 = vld [vmem:[#allocation3 + $0x1550] sm:$0xff]  ;;  %v770_v37 = vld [vmem:[#allocation3 + $0x1728] sm:$0xff]  ;;  %v2284_v38 = vadd.f32 %v2283_v23, %v870_v21  ;;  %v2240_v39 = vadd.f32 %v2239_v24, %v828_v22  ;;  %v932_v40 = vld [vmem:[#allocation3 + $0x1c38] sm:$0xff] }
 0x128   :  { %v712_v41 = vld [vmem:[#allocation3 + $0x1558] sm:$0xff]  ;;  %v2113_v42 = vadd.f32 %v2112_v29, %v709_v11  ;;  %v2221_v43 = vadd.f32 %v2220_v30, %v811_v13  ;;  %v830_v46 = vld [vmem:[#allocation3 + $0x1908] sm:$0xff]  ;;  %v2349_v47 = vadd.f32 %v2348_v34, %v931_v27  ;;  %v813_v48 = vld [vmem:[#allocation3 + $0x1880] sm:$0xff] }
 0x129   :  { %v2177_v44 = vadd.f32 %v2176_v31, %v769_v19  ;;  %v872_v45 = vld [vmem:[#allocation3 + $0x1a58] sm:$0xff]  ;;  %v771_v49 = vld [vmem:[#allocation3 + $0x1730] sm:$0xff]  ;;  %v2285_v50 = vadd.f32 %v2284_v38, %v871_v32  ;;  %v2241_v51 = vadd.f32 %v2240_v39, %v829_v33  ;;  %v933_v52 = vld [vmem:[#allocation3 + $0x1c40] sm:$0xff]  ;;  %v2116_v59 = vsel %vm1431_vm0, %v712_v41, 0.0 }
 0x12a   :  { %v2114_v53 = vadd.f32 %v2113_v42, %v710_v28  ;;  %v2222_v54 = vadd.f32 %v2221_v43, %v812_v36  ;;  %v873_v56 = vld [vmem:[#allocation3 + $0x1a60] sm:$0xff]  ;;  %v831_v57 = vld [vmem:[#allocation3 + $0x1910] sm:$0xff]  ;;  %v2350_v58 = vadd.f32 %v2349_v47, %v932_v40  ;;  %v814_v60 = vld [vmem:[#allocation3 + $0x1888] sm:$0xff] }
 0x12b   :  { %v2178_v55 = vadd.f32 %v2177_v44, %v770_v37  ;;  %v772_v61 = vld [vmem:[#allocation3 + $0x1738] sm:$0xff]  ;;  %v2286_v62 = vadd.f32 %v2285_v50, %v872_v45  ;;  %v2242_v63 = vadd.f32 %v2241_v51, %v830_v46  ;;  %v934_v0 = vld [vmem:[#allocation3 + $0x1c48] sm:$0xff]  ;;  %v815_v7 = vld [vmem:[#allocation3 + $0x1890] sm:$0xff] }
 0x12c   :  { %v2115_v1 = vadd.f32 %v2114_v53, %v711_v35  ;;  %v2223_v2 = vadd.f32 %v2222_v54, %v813_v48  ;;  %v874_v4 = vld [vmem:[#allocation3 + $0x1a68] sm:$0xff]  ;;  %v832_v5 = vld [vmem:[#allocation3 + $0x1918] sm:$0xff]  ;;  %v2351_v6 = vadd.f32 %v2350_v58, %v933_v52  ;;  %v773_v8 = vld [vmem:[#allocation3 + $0x1740] sm:$0xff] }
 0x12d   :  { %v2179_v3 = vadd.f32 %v2178_v55, %v771_v49  ;;  %v2287_v9 = vadd.f32 %v2286_v62, %v873_v56  ;;  %v2243_v10 = vadd.f32 %v2242_v63, %v831_v57  ;;  %v935_v11 = vld [vmem:[#allocation3 + $0x1c50] sm:$0xff]  ;;  %v816_v13 = vld [vmem:[#allocation3 + $0x1898] sm:$0xff]  ;;  %v833_v17 = vld [vmem:[#allocation3 + $0x1920] sm:$0xff] }
 0x12e   :  { %v2117_v12 = vadd.f32 %v2116_v59, %v2115_v1  ;;  %v2224_v14 = vadd.f32 %v2223_v2, %v814_v60  ;;  %v875_v16 = vld [vmem:[#allocation3 + $0x1a70] sm:$0xff]  ;;  %v2352_v18 = vadd.f32 %v2351_v6, %v934_v0  ;;  %v817_v19 = vld [vmem:[#allocation3 + $0x18a0] sm:$0xff]  ;;  %v774_v20 = vld [vmem:[#allocation3 + $0x1748] sm:$0xff] }
 0x12f   :  { %v2180_v15 = vadd.f32 %v2179_v3, %v772_v61  ;;  %v775_v21 = vld [vmem:[#allocation3 + $0x1750] sm:$0xff]  ;;  %v2288_v22 = vadd.f32 %v2287_v9, %v874_v4  ;;  %v2244_v23 = vadd.f32 %v2243_v10, %v832_v5  ;;  %v936_v24 = vld [vmem:[#allocation3 + $0x1c58] sm:$0xff]  ;;  %v834_v28 = vld [vmem:[#allocation3 + $0x1928] sm:$0xff] }
 0x130   :  { %2118 = vadd.xlane.f32.xlu0 %v2117_v12  ;;  %v2225_v25 = vadd.f32 %v2224_v14, %v815_v7  ;;  %v876_v27 = vld [vmem:[#allocation3 + $0x1a78] sm:$0xff]  ;;  %v937_v29 = vld [vmem:[#allocation3 + $0x1c60] sm:$0xff]  ;;  %v2353_v30 = vadd.f32 %v2352_v18, %v935_v11  ;;  %v894_v34 = vld [vmem:[#allocation3 + $0x1b08] sm:$0xff] }
 0x131   :  { %v2181_v26 = vadd.f32 %v2180_v15, %v773_v8  ;;  %v2289_v31 = vadd.f32 %v2288_v22, %v875_v16  ;;  %v2245_v32 = vadd.f32 %v2244_v23, %v833_v17  ;;  %v893_v33 = vld [vmem:[#allocation3 + $0x1b00] sm:$0xff]  ;;  %v895_v35 = vld [vmem:[#allocation3 + $0x1b10] sm:$0xff]  ;;  %v818_v36 = vld [vmem:[#allocation3 + $0x18a8] sm:$0xff] }
 0x132   :  { %v2226_v37 = vadd.f32 %v2225_v25, %v816_v13  ;;  %v877_v39 = vld [vmem:[#allocation3 + $0x1a80] sm:$0xff]  ;;  %v835_v40 = vld [vmem:[#allocation3 + $0x1930] sm:$0xff]  ;;  %v2354_v41 = vadd.f32 %v2353_v30, %v936_v24  ;;  %v2310_v42 = vadd.f32 %v894_v34, %v893_v33  ;;  %v776_v44 = vld [vmem:[#allocation3 + $0x1758] sm:$0xff] }
 0x133   :  { %v2182_v38 = vadd.f32 %v2181_v26, %v774_v20  ;;  %v819_v43 = vld [vmem:[#allocation3 + $0x18b0] sm:$0xff]  ;;  %v2290_v45 = vadd.f32 %v2289_v31, %v876_v27  ;;  %v2246_v46 = vadd.f32 %v2245_v32, %v834_v28  ;;  %v938_v47 = vld [vmem:[#allocation3 + $0x1c68] sm:$0xff]  ;;  %v896_v48 = vld [vmem:[#allocation3 + $0x1b18] sm:$0xff] }
 0x134   :  { %v820_v49 = vld [vmem:[#allocation3 + $0x18b8] sm:$0xff]  ;;  %v2227_v50 = vadd.f32 %v2226_v37, %v817_v19  ;;  %v878_v52 = vld [vmem:[#allocation3 + $0x1a88] sm:$0xff]  ;;  %v2355_v54 = vadd.f32 %v2354_v41, %v937_v29  ;;  %v2311_v55 = vadd.f32 %v2310_v42, %v895_v35  ;;  %v777_v56 = vld [vmem:[#allocation3 + $0x1760] sm:$0xff] }
 0x135   :  { %v2183_v51 = vadd.f32 %v2182_v38, %v775_v21  ;;  %v836_v53 = vld [vmem:[#allocation3 + $0x1938] sm:$0xff]  ;;  %v2291_v57 = vadd.f32 %v2290_v45, %v877_v39  ;;  %v2247_v58 = vadd.f32 %v2246_v46, %v835_v40  ;;  %v939_v59 = vld [vmem:[#allocation3 + $0x1c70] sm:$0xff]  ;;  %v897_v60 = vld [vmem:[#allocation3 + $0x1b20] sm:$0xff]  ;;  %v2230_v3 = vsel %vm1431_vm0, %v820_v49, 0.0 }
 0x136   :  { %v2228_v61 = vadd.f32 %v2227_v50, %v818_v36  ;;  %v879_v63 = vld [vmem:[#allocation3 + $0x1a90] sm:$0xff]  ;;  %v837_v0 = vld [vmem:[#allocation3 + $0x1940] sm:$0xff]  ;;  %v2356_v1 = vadd.f32 %v2355_v54, %v938_v47  ;;  %v2312_v2 = vadd.f32 %v2311_v55, %v896_v48  ;;  %v778_v4 = vld [vmem:[#allocation3 + $0x1768] sm:$0xff] }
 0x137   :  { %v2184_v62 = vadd.f32 %v2183_v51, %v776_v44  ;;  %v2292_v5 = vadd.f32 %v2291_v57, %v878_v52  ;;  %v2248_v6 = vadd.f32 %v2247_v58, %v836_v53  ;;  %v940_v7 = vld [vmem:[#allocation3 + $0x1c78] sm:$0xff]  ;;  %v898_v8 = vld [vmem:[#allocation3 + $0x1b28] sm:$0xff]  ;;  %v779_v15 = vld [vmem:[#allocation3 + $0x1770] sm:$0xff] }
 0x138   :  { %v2229_v9 = vadd.f32 %v2228_v61, %v819_v43  ;;  %v880_v11 = vld [vmem:[#allocation3 + $0x1a98] sm:$0xff]  ;;  %v838_v12 = vld [vmem:[#allocation3 + $0x1948] sm:$0xff]  ;;  %v2357_v13 = vadd.f32 %v2356_v1, %v939_v59  ;;  %v2313_v14 = vadd.f32 %v2312_v2, %v897_v60  ;;  %v941_v18 = vld [vmem:[#allocation3 + $0x1c80] sm:$0xff] }
 0x139   :  { %v2185_v10 = vadd.f32 %v2184_v62, %v777_v56  ;;  %v2293_v16 = vadd.f32 %v2292_v5, %v879_v63  ;;  %v2249_v17 = vadd.f32 %v2248_v6, %v837_v0  ;;  %v899_v19 = vld [vmem:[#allocation3 + $0x1b30] sm:$0xff]  ;;  %v780_v21 = vld [vmem:[#allocation3 + $0x1778] sm:$0xff]  ;;  %v881_v23 = vld [vmem:[#allocation3 + $0x1aa0] sm:$0xff] }
 0x13a   :  { %v2231_v20 = vadd.f32 %v2230_v3, %v2229_v9  ;;  %v839_v24 = vld [vmem:[#allocation3 + $0x1950] sm:$0xff]  ;;  %v2358_v25 = vadd.f32 %v2357_v13, %v940_v7  ;;  %v2314_v26 = vadd.f32 %v2313_v14, %v898_v8  ;;  %v781_v27 = vld [vmem:[#allocation3 + $0x1780] sm:$0xff]  ;;  %v882_v28 = vld [vmem:[#allocation3 + $0x1aa8] sm:$0xff] }
 0x13b   :  { %v2186_v22 = vadd.f32 %v2185_v10, %v778_v4  ;;  %v2294_v29 = vadd.f32 %v2293_v16, %v880_v11  ;;  %v2250_v30 = vadd.f32 %v2249_v17, %v838_v12  ;;  %v942_v31 = vld [vmem:[#allocation3 + $0x1c88] sm:$0xff]  ;;  %v900_v32 = vld [vmem:[#allocation3 + $0x1b38] sm:$0xff]  ;;  %v943_v35 = vld [vmem:[#allocation3 + $0x1c90] sm:$0xff] }
 0x13c   :  { %2232 = vadd.xlane.f32.xlu1 %v2231_v20  ;;  %v840_v34 = vld [vmem:[#allocation3 + $0x1958] sm:$0xff]  ;;  %v2359_v36 = vadd.f32 %v2358_v25, %v941_v18  ;;  %v901_v37 = vld [vmem:[#allocation3 + $0x1b40] sm:$0xff]  ;;  %v2315_v38 = vadd.f32 %v2314_v26, %v899_v19  ;;  %v1002_v42 = vld [vmem:[#allocation3 + $0x1e68] sm:$0xff] }
 0x13d   :  { %v2187_v33 = vadd.f32 %v2186_v22, %v779_v15  ;;  %v2295_v39 = vadd.f32 %v2294_v29, %v881_v23  ;;  %v2251_v40 = vadd.f32 %v2250_v30, %v839_v24  ;;  %v1001_v41 = vld [vmem:[#allocation3 + $0x1e60] sm:$0xff]  ;;  %v1003_v43 = vld [vmem:[#allocation3 + $0x1e70] sm:$0xff]  ;;  %v782_v44 = vld [vmem:[#allocation3 + $0x1788] sm:$0xff] }
 0x13e   :  { %v883_v46 = vld [vmem:[#allocation3 + $0x1ab0] sm:$0xff]  ;;  %v841_v47 = vld [vmem:[#allocation3 + $0x1960] sm:$0xff]  ;;  %v2360_v48 = vadd.f32 %v2359_v36, %v942_v31  ;;  %v2316_v49 = vadd.f32 %v2315_v38, %v900_v32  ;;  %v2424_v50 = vadd.f32 %v1002_v42, %v1001_v41  ;;  %v944_v54 = vld [vmem:[#allocation3 + $0x1c98] sm:$0xff] }
 0x13f   :  { %v2188_v45 = vadd.f32 %v2187_v33, %v780_v21  ;;  %v783_v51 = vld [vmem:[#allocation3 + $0x1790] sm:$0xff]  ;;  %v2296_v52 = vadd.f32 %v2295_v39, %v882_v28  ;;  %v2252_v53 = vadd.f32 %v2251_v40, %v840_v34  ;;  %v902_v55 = vld [vmem:[#allocation3 + $0x1b48] sm:$0xff]  ;;  %v1004_v56 = vld [vmem:[#allocation3 + $0x1e78] sm:$0xff] }
 0x140   :  { %v784_v57 = vld [vmem:[#allocation3 + $0x1798] sm:$0xff]  ;;  %v842_v60 = vld [vmem:[#allocation3 + $0x1968] sm:$0xff]  ;;  %v2361_v61 = vadd.f32 %v2360_v48, %v943_v35  ;;  %v2317_v62 = vadd.f32 %v2316_v49, %v901_v37  ;;  %v2425_v63 = vadd.f32 %v2424_v50, %v1003_v43  ;;  %v945_v2 = vld [vmem:[#allocation3 + $0x1ca0] sm:$0xff] }
 0x141   :  { %v2189_v58 = vadd.f32 %v2188_v45, %v781_v27  ;;  %v884_v59 = vld [vmem:[#allocation3 + $0x1ab8] sm:$0xff]  ;;  %v2297_v0 = vadd.f32 %v2296_v52, %v883_v46  ;;  %v2253_v1 = vadd.f32 %v2252_v53, %v841_v47  ;;  %v903_v3 = vld [vmem:[#allocation3 + $0x1b50] sm:$0xff]  ;;  %v1005_v4 = vld [vmem:[#allocation3 + $0x1e80] sm:$0xff]  ;;  %v2192_v11 = vsel %vm1431_vm0, %v784_v57, 0.0 }
 0x142   :  { %v885_v6 = vld [vmem:[#allocation3 + $0x1ac0] sm:$0xff]  ;;  %v843_v7 = vld [vmem:[#allocation3 + $0x1970] sm:$0xff]  ;;  %v2362_v8 = vadd.f32 %v2361_v61, %v944_v54  ;;  %v2318_v9 = vadd.f32 %v2317_v62, %v902_v55  ;;  %v2426_v10 = vadd.f32 %v2425_v63, %v1004_v56  ;;  %v946_v14 = vld [vmem:[#allocation3 + $0x1ca8] sm:$0xff] }
 0x143   :  { %v2190_v5 = vadd.f32 %v2189_v58, %v782_v44  ;;  %v2298_v12 = vadd.f32 %v2297_v0, %v884_v59  ;;  %v2254_v13 = vadd.f32 %v2253_v1, %v842_v60  ;;  %v904_v15 = vld [vmem:[#allocation3 + $0x1b58] sm:$0xff]  ;;  %v1006_v16 = vld [vmem:[#allocation3 + $0x1e88] sm:$0xff]  ;;  %v887_v19 = vld [vmem:[#allocation3 + $0x1ad0] sm:$0xff] }
 0x144   :  { %v886_v18 = vld [vmem:[#allocation3 + $0x1ac8] sm:$0xff]  ;;  %v844_v20 = vld [vmem:[#allocation3 + $0x1978] sm:$0xff]  ;;  %v2363_v21 = vadd.f32 %v2362_v8, %v945_v2  ;;  %v2319_v22 = vadd.f32 %v2318_v9, %v903_v3  ;;  %v2427_v23 = vadd.f32 %v2426_v10, %v1005_v4  ;;  %v947_v26 = vld [vmem:[#allocation3 + $0x1cb0] sm:$0xff] }
 0x145   :  { %v2191_v17 = vadd.f32 %v2190_v5, %v783_v51  ;;  %v2299_v24 = vadd.f32 %v2298_v12, %v885_v6  ;;  %v2255_v25 = vadd.f32 %v2254_v13, %v843_v7  ;;  %v905_v27 = vld [vmem:[#allocation3 + $0x1b60] sm:$0xff]  ;;  %v1007_v28 = vld [vmem:[#allocation3 + $0x1e90] sm:$0xff]  ;;  %v888_v30 = vld [vmem:[#allocation3 + $0x1ad8] sm:$0xff] }
 0x146   :  { %v845_v31 = vld [vmem:[#allocation3 + $0x1980] sm:$0xff]  ;;  %v846_v32 = vld [vmem:[#allocation3 + $0x1988] sm:$0xff]  ;;  %v2364_v33 = vadd.f32 %v2363_v21, %v946_v14  ;;  %v2320_v34 = vadd.f32 %v2319_v22, %v904_v15  ;;  %v2428_v35 = vadd.f32 %v2427_v23, %v1006_v16  ;;  %v948_v38 = vld [vmem:[#allocation3 + $0x1cb8] sm:$0xff] }
 0x147   :  { %v2193_v29 = vadd.f32 %v2192_v11, %v2191_v17  ;;  %v2300_v36 = vadd.f32 %v2299_v24, %v886_v18  ;;  %v2256_v37 = vadd.f32 %v2255_v25, %v844_v20  ;;  %v906_v39 = vld [vmem:[#allocation3 + $0x1b68] sm:$0xff]  ;;  %v1008_v40 = vld [vmem:[#allocation3 + $0x1e98] sm:$0xff]  ;;  %v889_v41 = vld [vmem:[#allocation3 + $0x1ae0] sm:$0xff] }
 0x148   :  { %v949_v42 = vld [vmem:[#allocation3 + $0x1cc0] sm:$0xff]  ;;  %v2365_v43 = vadd.f32 %v2364_v33, %v947_v26  ;;  %v907_v44 = vld [vmem:[#allocation3 + $0x1b70] sm:$0xff]  ;;  %v2321_v45 = vadd.f32 %v2320_v34, %v905_v27  ;;  %v2429_v47 = vadd.f32 %v2428_v35, %v1007_v28  ;;  %v966_v51 = vld [vmem:[#allocation3 + $0x1d48] sm:$0xff] }
 0x149   :  { %2194 = vadd.xlane.f32.xlu0 %v2193_v29  ;;  %v1009_v46 = vld [vmem:[#allocation3 + $0x1ea0] sm:$0xff]  ;;  %v2301_v48 = vadd.f32 %v2300_v36, %v887_v19  ;;  %v2257_v49 = vadd.f32 %v2256_v37, %v845_v31  ;;  %v967_v52 = vld [vmem:[#allocation3 + $0x1d50] sm:$0xff]  ;;  %v890_v53 = vld [vmem:[#allocation3 + $0x1ae8] sm:$0xff] }
 0x14a   :  { %v965_v50 = vld [vmem:[#allocation3 + $0x1d40] sm:$0xff]  ;;  %v847_v54 = vld [vmem:[#allocation3 + $0x1990] sm:$0xff]  ;;  %v950_v55 = vld [vmem:[#allocation3 + $0x1cc8] sm:$0xff]  ;;  %v2366_v56 = vadd.f32 %v2365_v43, %v948_v38  ;;  %v2322_v57 = vadd.f32 %v2321_v45, %v906_v39  ;;  %v2430_v58 = vadd.f32 %v2429_v47, %v1008_v40 }
 0x14b   :  { %v2386_v59 = vadd.f32 %v966_v51, %v965_v50  ;;  %v2302_v60 = vadd.f32 %v2301_v48, %v888_v30  ;;  %v2258_v61 = vadd.f32 %v2257_v49, %v846_v32  ;;  %v908_v62 = vld [vmem:[#allocation3 + $0x1b78] sm:$0xff]  ;;  %v1010_v63 = vld [vmem:[#allocation3 + $0x1ea8] sm:$0xff]  ;;  %v951_v3 = vld [vmem:[#allocation3 + $0x1cd0] sm:$0xff] }
 0x14c   :  { %v968_v0 = vld [vmem:[#allocation3 + $0x1d58] sm:$0xff]  ;;  %v2367_v4 = vadd.f32 %v2366_v56, %v949_v42  ;;  %v2323_v5 = vadd.f32 %v2322_v57, %v907_v44  ;;  %v2431_v6 = vadd.f32 %v2430_v58, %v1009_v46  ;;  %v909_v10 = vld [vmem:[#allocation3 + $0x1b80] sm:$0xff]  ;;  %v1011_v11 = vld [vmem:[#allocation3 + $0x1eb0] sm:$0xff] }
 0x14d   :  { %v892_v1 = vld [vmem:[#allocation3 + $0x1af8] sm:$0xff]  ;;  %v2387_v7 = vadd.f32 %v2386_v59, %v967_v52  ;;  %v2303_v8 = vadd.f32 %v2302_v60, %v889_v41  ;;  %v2259_v9 = vadd.f32 %v2258_v61, %v847_v54  ;;  %v969_v12 = vld [vmem:[#allocation3 + $0x1d60] sm:$0xff]  ;;  %v891_v13 = vld [vmem:[#allocation3 + $0x1af0] sm:$0xff] }
 0x14e   :  { %v848_v2 = vld [vmem:[#allocation3 + $0x1998] sm:$0xff]  ;;  %v849_v14 = vld [vmem:[#allocation3 + $0x19a0] sm:$0xff]  ;;  %v2368_v16 = vadd.f32 %v2367_v4, %v950_v55  ;;  %v2324_v17 = vadd.f32 %v2323_v5, %v908_v62  ;;  %v2432_v18 = vadd.f32 %v2431_v6, %v1010_v63  ;;  %v2306_v21 = vsel %vm1431_vm0, %v892_v1, 0.0  ;;  %v910_v23 = vld [vmem:[#allocation3 + $0x1b88] sm:$0xff] }
 0x14f   :  { %v952_v15 = vld [vmem:[#allocation3 + $0x1cd8] sm:$0xff]  ;;  %v2388_v19 = vadd.f32 %v2387_v7, %v968_v0  ;;  %v2304_v20 = vadd.f32 %v2303_v8, %v890_v53  ;;  %v2260_v22 = vadd.f32 %v2259_v9, %v848_v2  ;;  %v970_v25 = vld [vmem:[#allocation3 + $0x1d68] sm:$0xff]  ;;  %v953_v27 = vld [vmem:[#allocation3 + $0x1ce0] sm:$0xff] }
 0x150   :  { %v1012_v24 = vld [vmem:[#allocation3 + $0x1eb8] sm:$0xff]  ;;  %v850_v26 = vld [vmem:[#allocation3 + $0x19a8] sm:$0xff]  ;;  %v2369_v28 = vadd.f32 %v2368_v16, %v951_v3  ;;  %v2325_v29 = vadd.f32 %v2324_v17, %v909_v10  ;;  %v2433_v30 = vadd.f32 %v2432_v18, %v1011_v11  ;;  %v911_v34 = vld [vmem:[#allocation3 + $0x1b90] sm:$0xff] }
 0x151   :  { %v2389_v31 = vadd.f32 %v2388_v19, %v969_v12  ;;  %v2305_v32 = vadd.f32 %v2304_v20, %v891_v13  ;;  %v2261_v33 = vadd.f32 %v2260_v22, %v849_v14  ;;  %v1013_v35 = vld [vmem:[#allocation3 + $0x1ec0] sm:$0xff]  ;;  %v971_v36 = vld [vmem:[#allocation3 + $0x1d70] sm:$0xff]  ;;  %v852_v38 = vld [vmem:[#allocation3 + $0x19b8] sm:$0xff] }
 0x152   :  { %v851_v37 = vld [vmem:[#allocation3 + $0x19b0] sm:$0xff]  ;;  %v954_v39 = vld [vmem:[#allocation3 + $0x1ce8] sm:$0xff]  ;;  %v2370_v40 = vadd.f32 %v2369_v28, %v952_v15  ;;  %v2326_v41 = vadd.f32 %v2325_v29, %v910_v23  ;;  %v2434_v42 = vadd.f32 %v2433_v30, %v1012_v24  ;;  %v912_v46 = vld [vmem:[#allocation3 + $0x1b98] sm:$0xff] }
 0x153   :  { %v2390_v43 = vadd.f32 %v2389_v31, %v970_v25  ;;  %v2307_v44 = vadd.f32 %v2306_v21, %v2305_v32  ;;  %v2262_v45 = vadd.f32 %v2261_v33, %v850_v26  ;;  %v1014_v47 = vld [vmem:[#allocation3 + $0x1ec8] sm:$0xff]  ;;  %v972_v48 = vld [vmem:[#allocation3 + $0x1d78] sm:$0xff]  ;;  %v853_v49 = vld [vmem:[#allocation3 + $0x19c0] sm:$0xff] }
 0x154   :  { %v955_v50 = vld [vmem:[#allocation3 + $0x1cf0] sm:$0xff]  ;;  %v2371_v51 = vadd.f32 %v2370_v40, %v953_v27  ;;  %v913_v52 = vld [vmem:[#allocation3 + $0x1ba0] sm:$0xff]  ;;  %v2327_v53 = vadd.f32 %v2326_v41, %v911_v34  ;;  %v2435_v55 = vadd.f32 %v2434_v42, %v1013_v35  ;;  %v1074_v60 = vld [vmem:[#allocation3 + $0x20a8] sm:$0xff] }
 0x155   :  { %v1015_v54 = vld [vmem:[#allocation3 + $0x1ed0] sm:$0xff]  ;;  %v2391_v56 = vadd.f32 %v2390_v43, %v971_v36  ;;  %2308 = vadd.xlane.f32.xlu1 %v2307_v44  ;;  %v2263_v57 = vadd.f32 %v2262_v45, %v851_v37  ;;  %v973_v58 = vld [vmem:[#allocation3 + $0x1d80] sm:$0xff]  ;;  %v854_v61 = vld [vmem:[#allocation3 + $0x19c8] sm:$0xff] }
 0x156   :  { %v1073_v59 = vld [vmem:[#allocation3 + $0x20a0] sm:$0xff]  ;;  %v956_v62 = vld [vmem:[#allocation3 + $0x1cf8] sm:$0xff]  ;;  %v2372_v63 = vadd.f32 %v2371_v51, %v954_v39  ;;  %v2328_v0 = vadd.f32 %v2327_v53, %v912_v46  ;;  %v2436_v1 = vadd.f32 %v2435_v55, %v1014_v47  ;;  %v1075_v3 = vld [vmem:[#allocation3 + $0x20b0] sm:$0xff] }
 0x157   :  { %v2392_v2 = vadd.f32 %v2391_v56, %v972_v48  ;;  %v2264_v4 = vadd.f32 %v2263_v57, %v852_v38  ;;  %v914_v5 = vld [vmem:[#allocation3 + $0x1ba8] sm:$0xff]  ;;  %v1016_v6 = vld [vmem:[#allocation3 + $0x1ed8] sm:$0xff]  ;;  %v2500_v8 = vadd.f32 %v1074_v60, %v1073_v59  ;;  %v957_v10 = vld [vmem:[#allocation3 + $0x1d00] sm:$0xff] }
 0x158   :  { %v974_v7 = vld [vmem:[#allocation3 + $0x1d88] sm:$0xff]  ;;  %v856_v9 = vld [vmem:[#allocation3 + $0x19d8] sm:$0xff]  ;;  %v2373_v11 = vadd.f32 %v2372_v63, %v955_v50  ;;  %v2329_v12 = vadd.f32 %v2328_v0, %v913_v52  ;;  %v2437_v13 = vadd.f32 %v2436_v1, %v1015_v54  ;;  %v915_v17 = vld [vmem:[#allocation3 + $0x1bb0] sm:$0xff] }
 0x159   :  { %v2393_v14 = vadd.f32 %v2392_v2, %v973_v58  ;;  %v1076_v15 = vld [vmem:[#allocation3 + $0x20b8] sm:$0xff]  ;;  %v2265_v16 = vadd.f32 %v2264_v4, %v853_v49  ;;  %v1017_v18 = vld [vmem:[#allocation3 + $0x1ee0] sm:$0xff]  ;;  %v975_v19 = vld [vmem:[#allocation3 + $0x1d90] sm:$0xff]  ;;  %v2501_v20 = vadd.f32 %v2500_v8, %v1075_v3  ;;  %v2268_v29 = vsel %vm1431_vm0, %v856_v9, 0.0 }
 0x15a   :  { %v855_v21 = vld [vmem:[#allocation3 + $0x19d0] sm:$0xff]  ;;  %v958_v22 = vld [vmem:[#allocation3 + $0x1d08] sm:$0xff]  ;;  %v2374_v23 = vadd.f32 %v2373_v11, %v956_v62  ;;  %v2330_v24 = vadd.f32 %v2329_v12, %v914_v5  ;;  %v2438_v25 = vadd.f32 %v2437_v13, %v1016_v6  ;;  %v1077_v27 = vld [vmem:[#allocation3 + $0x20c0] sm:$0xff] }
 0x15b   :  { %v2394_v26 = vadd.f32 %v2393_v14, %v974_v7  ;;  %v2266_v28 = vadd.f32 %v2265_v16, %v854_v61  ;;  %v916_v30 = vld [vmem:[#allocation3 + $0x1bb8] sm:$0xff]  ;;  %v1018_v31 = vld [vmem:[#allocation3 + $0x1ee8] sm:$0xff]  ;;  %v2502_v33 = vadd.f32 %v2501_v20, %v1076_v15  ;;  %v959_v34 = vld [vmem:[#allocation3 + $0x1d10] sm:$0xff] }
 0x15c   :  { %v976_v32 = vld [vmem:[#allocation3 + $0x1d98] sm:$0xff]  ;;  %v2375_v35 = vadd.f32 %v2374_v23, %v957_v10  ;;  %v2331_v36 = vadd.f32 %v2330_v24, %v915_v17  ;;  %v2439_v37 = vadd.f32 %v2438_v25, %v1017_v18  ;;  %v1078_v39 = vld [vmem:[#allocation3 + $0x20c8] sm:$0xff]  ;;  %v917_v41 = vld [vmem:[#allocation3 + $0x1bc0] sm:$0xff] }
 0x15d   :  { %v2395_v38 = vadd.f32 %v2394_v26, %v975_v19  ;;  %v2267_v40 = vadd.f32 %v2266_v28, %v855_v21  ;;  %v1019_v42 = vld [vmem:[#allocation3 + $0x1ef0] sm:$0xff]  ;;  %v977_v43 = vld [vmem:[#allocation3 + $0x1da0] sm:$0xff]  ;;  %v2503_v44 = vadd.f32 %v2502_v33, %v1077_v27  ;;  %v960_v45 = vld [vmem:[#allocation3 + $0x1d18] sm:$0xff] }
 0x15e   :  { %v2376_v46 = vadd.f32 %v2375_v35, %v958_v22  ;;  %v2332_v47 = vadd.f32 %v2331_v36, %v916_v30  ;;  %v2440_v48 = vadd.f32 %v2439_v37, %v1018_v31  ;;  %v1079_v50 = vld [vmem:[#allocation3 + $0x20d0] sm:$0xff]  ;;  %v961_v52 = vld [vmem:[#allocation3 + $0x1d20] sm:$0xff]  ;;  %v918_v53 = vld [vmem:[#allocation3 + $0x1bc8] sm:$0xff] }
 0x15f   :  { %v2396_v49 = vadd.f32 %v2395_v38, %v976_v32  ;;  %v2269_v51 = vadd.f32 %v2268_v29, %v2267_v40  ;;  %v1020_v54 = vld [vmem:[#allocation3 + $0x1ef8] sm:$0xff]  ;;  %v978_v55 = vld [vmem:[#allocation3 + $0x1da8] sm:$0xff]  ;;  %v2504_v56 = vadd.f32 %v2503_v44, %v1078_v39  ;;  %v919_v58 = vld [vmem:[#allocation3 + $0x1bd0] sm:$0xff] }
 0x160   :  { %v2377_v57 = vadd.f32 %v2376_v46, %v959_v34  ;;  %v2333_v59 = vadd.f32 %v2332_v47, %v917_v41  ;;  %v1021_v60 = vld [vmem:[#allocation3 + $0x1f00] sm:$0xff]  ;;  %v2441_v61 = vadd.f32 %v2440_v48, %v1019_v42  ;;  %v1080_v63 = vld [vmem:[#allocation3 + $0x20d8] sm:$0xff]  ;;  %v979_v0 = vld [vmem:[#allocation3 + $0x1db0] sm:$0xff] }
 0x161   :  { %v2397_v62 = vadd.f32 %v2396_v49, %v977_v43  ;;  %2270 = vadd.xlane.f32.xlu0 %v2269_v51  ;;  %v2505_v1 = vadd.f32 %v2504_v56, %v1079_v50  ;;  %v1037_v2 = vld [vmem:[#allocation3 + $0x1f80] sm:$0xff]  ;;  %v1038_v3 = vld [vmem:[#allocation3 + $0x1f88] sm:$0xff]  ;;  %v1039_v10 = vld [vmem:[#allocation3 + $0x1f90] sm:$0xff] }
 0x162   :  { %v962_v4 = vld [vmem:[#allocation3 + $0x1d28] sm:$0xff]  ;;  %v2378_v5 = vadd.f32 %v2377_v57, %v960_v45  ;;  %v2334_v6 = vadd.f32 %v2333_v59, %v918_v53  ;;  %v2442_v7 = vadd.f32 %v2441_v61, %v1020_v54  ;;  %v1081_v9 = vld [vmem:[#allocation3 + $0x20e0] sm:$0xff]  ;;  %v963_v11 = vld [vmem:[#allocation3 + $0x1d30] sm:$0xff]  ;;  %v2462_v16 = vadd.f32 %v1038_v3, %v1037_v2 }
 0x163   :  { %v2398_v8 = vadd.f32 %v2397_v62, %v978_v55  ;;  %v920_v12 = vld [vmem:[#allocation3 + $0x1bd8] sm:$0xff]  ;;  %v1022_v13 = vld [vmem:[#allocation3 + $0x1f08] sm:$0xff]  ;;  %v2506_v15 = vadd.f32 %v2505_v1, %v1080_v63  ;;  %v921_v24 = vld [vmem:[#allocation3 + $0x1be0] sm:$0xff] }
 0x164   :  { %v980_v14 = vld [vmem:[#allocation3 + $0x1db8] sm:$0xff]  ;;  %v2379_v18 = vadd.f32 %v2378_v5, %v961_v52  ;;  %v2335_v19 = vadd.f32 %v2334_v6, %v919_v58  ;;  %v2443_v20 = vadd.f32 %v2442_v7, %v1021_v60  ;;  %v1082_v22 = vld [vmem:[#allocation3 + $0x20e8] sm:$0xff]  ;;  %v1023_v25 = vld [vmem:[#allocation3 + $0x1f10] sm:$0xff]  ;;  %v2463_v28 = vadd.f32 %v2462_v16, %v1039_v10 }
 0x165   :  { %v964_v17 = vld [vmem:[#allocation3 + $0x1d38] sm:$0xff]  ;;  %v2399_v21 = vadd.f32 %v2398_v8, %v979_v0  ;;  %v981_v26 = vld [vmem:[#allocation3 + $0x1dc0] sm:$0xff]  ;;  %v2507_v27 = vadd.f32 %v2506_v15, %v1081_v9  ;;  %v1083_v33 = vld [vmem:[#allocation3 + $0x20f0] sm:$0xff] }
 0x166   :  { %v1040_v23 = vld [vmem:[#allocation3 + $0x1f98] sm:$0xff]  ;;  %v2380_v29 = vadd.f32 %v2379_v18, %v962_v4  ;;  %v2336_v30 = vadd.f32 %v2335_v19, %v920_v12  ;;  %v2444_v31 = vadd.f32 %v2443_v20, %v1022_v13  ;;  %v1041_v34 = vld [vmem:[#allocation3 + $0x1fa0] sm:$0xff]  ;;  %v2382_v35 = vsel %vm1431_vm0, %v964_v17, 0.0  ;;  %v922_v36 = vld [vmem:[#allocation3 + $0x1be8] sm:$0xff] }
 0x167   :  { %v2400_v32 = vadd.f32 %v2399_v21, %v980_v14  ;;  %v1024_v37 = vld [vmem:[#allocation3 + $0x1f18] sm:$0xff]  ;;  %v982_v38 = vld [vmem:[#allocation3 + $0x1dc8] sm:$0xff]  ;;  %v2508_v39 = vadd.f32 %v2507_v27, %v1082_v22  ;;  %v2464_v40 = vadd.f32 %v2463_v28, %v1040_v23  ;;  %v923_v47 = vld [vmem:[#allocation3 + $0x1bf0] sm:$0xff] }
 0x168   :  { %v2381_v41 = vadd.f32 %v2380_v29, %v963_v11  ;;  %v2337_v42 = vadd.f32 %v2336_v30, %v921_v24  ;;  %v2445_v43 = vadd.f32 %v2444_v31, %v1023_v25  ;;  %v1084_v45 = vld [vmem:[#allocation3 + $0x20f8] sm:$0xff]  ;;  %v1042_v46 = vld [vmem:[#allocation3 + $0x1fa8] sm:$0xff]  ;;  %v1025_v48 = vld [vmem:[#allocation3 + $0x1f20] sm:$0xff] }
 0x169   :  { %v2401_v44 = vadd.f32 %v2400_v32, %v981_v26  ;;  %v983_v49 = vld [vmem:[#allocation3 + $0x1dd0] sm:$0xff]  ;;  %v2509_v50 = vadd.f32 %v2508_v39, %v1083_v33  ;;  %v2465_v51 = vadd.f32 %v2464_v40, %v1041_v34  ;;  %v924_v53 = vld [vmem:[#allocation3 + $0x1bf8] sm:$0xff]  ;;  %v1085_v57 = vld [vmem:[#allocation3 + $0x2100] sm:$0xff] }
 0x16a   :  { %v2383_v52 = vadd.f32 %v2382_v35, %v2381_v41  ;;  %v2338_v54 = vadd.f32 %v2337_v42, %v922_v36  ;;  %v2446_v55 = vadd.f32 %v2445_v43, %v1024_v37  ;;  %v1043_v58 = vld [vmem:[#allocation3 + $0x1fb0] sm:$0xff]  ;;  %v925_v59 = vld [vmem:[#allocation3 + $0x1c00] sm:$0xff]  ;;  %v1026_v60 = vld [vmem:[#allocation3 + $0x1f28] sm:$0xff] }
 0x16b   :  { %v2402_v56 = vadd.f32 %v2401_v44, %v982_v38  ;;  %v1027_v61 = vld [vmem:[#allocation3 + $0x1f30] sm:$0xff]  ;;  %v984_v62 = vld [vmem:[#allocation3 + $0x1dd8] sm:$0xff]  ;;  %v2510_v63 = vadd.f32 %v2509_v50, %v1084_v45  ;;  %v2466_v0 = vadd.f32 %v2465_v51, %v1042_v46  ;;  %v985_v3 = vld [vmem:[#allocation3 + $0x1de0] sm:$0xff] }
 0x16c   :  { %2384 = vadd.xlane.f32.xlu1 %v2383_v52  ;;  %v2339_v1 = vadd.f32 %v2338_v54, %v923_v47  ;;  %v2447_v2 = vadd.f32 %v2446_v55, %v1025_v48  ;;  %v1086_v5 = vld [vmem:[#allocation3 + $0x2108] sm:$0xff]  ;;  %v1044_v6 = vld [vmem:[#allocation3 + $0x1fb8] sm:$0xff]  ;;  %v1145_v9 = vld [vmem:[#allocation3 + $0x22e0] sm:$0xff] }
 0x16d   :  { %v2403_v4 = vadd.f32 %v2402_v56, %v983_v49  ;;  %v2511_v7 = vadd.f32 %v2510_v63, %v1085_v57  ;;  %v2467_v8 = vadd.f32 %v2466_v0, %v1043_v58  ;;  %v1146_v10 = vld [vmem:[#allocation3 + $0x22e8] sm:$0xff]  ;;  %v1147_v11 = vld [vmem:[#allocation3 + $0x22f0] sm:$0xff]  ;;  %v1045_v17 = vld [vmem:[#allocation3 + $0x1fc0] sm:$0xff] }
 0x16e   :  { %v926_v12 = vld [vmem:[#allocation3 + $0x1c08] sm:$0xff]  ;;  %v2340_v13 = vadd.f32 %v2339_v1, %v924_v53  ;;  %v2448_v14 = vadd.f32 %v2447_v2, %v1026_v60  ;;  %v1087_v16 = vld [vmem:[#allocation3 + $0x2110] sm:$0xff]  ;;  %v2576_v18 = vadd.f32 %v1146_v10, %v1145_v9  ;;  %v1028_v20 = vld [vmem:[#allocation3 + $0x1f38] sm:$0xff] }
 0x16f   :  { %v2404_v15 = vadd.f32 %v2403_v4, %v984_v62  ;;  %v927_v19 = vld [vmem:[#allocation3 + $0x1c10] sm:$0xff]  ;;  %v986_v21 = vld [vmem:[#allocation3 + $0x1de8] sm:$0xff]  ;;  %v2512_v22 = vadd.f32 %v2511_v7, %v1086_v5  ;;  %v2468_v23 = vadd.f32 %v2467_v8, %v1044_v6  ;;  %v1148_v24 = vld [vmem:[#allocation3 + $0x22f8] sm:$0xff] }
 0x170   :  { %v928_v25 = vld [vmem:[#allocation3 + $0x1c18] sm:$0xff]  ;;  %v2341_v26 = vadd.f32 %v2340_v13, %v925_v59  ;;  %v2449_v27 = vadd.f32 %v2448_v14, %v1027_v61  ;;  %v1046_v30 = vld [vmem:[#allocation3 + $0x1fc8] sm:$0xff]  ;;  %v2577_v31 = vadd.f32 %v2576_v18, %v1147_v11  ;;  %v1029_v32 = vld [vmem:[#allocation3 + $0x1f40] sm:$0xff] }
 0x171   :  { %v2405_v28 = vadd.f32 %v2404_v15, %v985_v3  ;;  %v1088_v29 = vld [vmem:[#allocation3 + $0x2118] sm:$0xff]  ;;  %v987_v33 = vld [vmem:[#allocation3 + $0x1df0] sm:$0xff]  ;;  %v2513_v34 = vadd.f32 %v2512_v22, %v1087_v16  ;;  %v2469_v35 = vadd.f32 %v2468_v23, %v1045_v17  ;;  %v1149_v36 = vld [vmem:[#allocation3 + $0x2300] sm:$0xff]  ;;  %v2344_v43 = vsel %vm1431_vm0, %v928_v25, 0.0 }
 0x172   :  { %v2342_v37 = vadd.f32 %v2341_v26, %v926_v12  ;;  %v2450_v38 = vadd.f32 %v2449_v27, %v1028_v20  ;;  %v1089_v40 = vld [vmem:[#allocation3 + $0x2120] sm:$0xff]  ;;  %v1047_v41 = vld [vmem:[#allocation3 + $0x1fd0] sm:$0xff]  ;;  %v2578_v42 = vadd.f32 %v2577_v31, %v1148_v24  ;;  %v1030_v44 = vld [vmem:[#allocation3 + $0x1f48] sm:$0xff] }
 0x173   :  { %v2406_v39 = vadd.f32 %v2405_v28, %v986_v21  ;;  %v988_v45 = vld [vmem:[#allocation3 + $0x1df8] sm:$0xff]  ;;  %v2514_v46 = vadd.f32 %v2513_v34, %v1088_v29  ;;  %v2470_v47 = vadd.f32 %v2469_v35, %v1046_v30  ;;  %v1150_v48 = vld [vmem:[#allocation3 + $0x2308] sm:$0xff]  ;;  %v1031_v55 = vld [vmem:[#allocation3 + $0x1f50] sm:$0xff] }
 0x174   :  { %v2343_v49 = vadd.f32 %v2342_v37, %v927_v19  ;;  %v2451_v50 = vadd.f32 %v2450_v38, %v1029_v32  ;;  %v1090_v52 = vld [vmem:[#allocation3 + $0x2128] sm:$0xff]  ;;  %v1048_v53 = vld [vmem:[#allocation3 + $0x1fd8] sm:$0xff]  ;;  %v2579_v54 = vadd.f32 %v2578_v42, %v1149_v36  ;;  %v989_v56 = vld [vmem:[#allocation3 + $0x1e00] sm:$0xff] }
 0x175   :  { %v2407_v51 = vadd.f32 %v2406_v39, %v987_v33  ;;  %v2515_v57 = vadd.f32 %v2514_v46, %v1089_v40  ;;  %v2471_v58 = vadd.f32 %v2470_v47, %v1047_v41  ;;  %v1151_v59 = vld [vmem:[#allocation3 + $0x2310] sm:$0xff]  ;;  %v1032_v61 = vld [vmem:[#allocation3 + $0x1f58] sm:$0xff]  ;;  %v1049_v1 = vld [vmem:[#allocation3 + $0x1fe0] sm:$0xff] }
 0x176   :  { %v2345_v60 = vadd.f32 %v2344_v43, %v2343_v49  ;;  %v2452_v62 = vadd.f32 %v2451_v50, %v1030_v44  ;;  %v1091_v0 = vld [vmem:[#allocation3 + $0x2130] sm:$0xff]  ;;  %v2580_v2 = vadd.f32 %v2579_v54, %v1150_v48  ;;  %v1033_v3 = vld [vmem:[#allocation3 + $0x1f60] sm:$0xff]  ;;  %v990_v4 = vld [vmem:[#allocation3 + $0x1e08] sm:$0xff] }
 0x177   :  { %v2408_v63 = vadd.f32 %v2407_v51, %v988_v45  ;;  %v991_v5 = vld [vmem:[#allocation3 + $0x1e10] sm:$0xff]  ;;  %v2516_v6 = vadd.f32 %v2515_v57, %v1090_v52  ;;  %v2472_v7 = vadd.f32 %v2471_v58, %v1048_v53  ;;  %v1152_v8 = vld [vmem:[#allocation3 + $0x2318] sm:$0xff]  ;;  %v1050_v12 = vld [vmem:[#allocation3 + $0x1fe8] sm:$0xff] }
 0x178   :  { %2346 = vadd.xlane.f32.xlu0 %v2345_v60  ;;  %v2453_v9 = vadd.f32 %v2452_v62, %v1031_v55  ;;  %v1092_v11 = vld [vmem:[#allocation3 + $0x2138] sm:$0xff]  ;;  %v1153_v13 = vld [vmem:[#allocation3 + $0x2320] sm:$0xff]  ;;  %v2581_v14 = vadd.f32 %v2580_v2, %v1151_v59  ;;  %v1110_v18 = vld [vmem:[#allocation3 + $0x21c8] sm:$0xff] }
 0x179   :  { %v2409_v10 = vadd.f32 %v2408_v63, %v989_v56  ;;  %v2517_v15 = vadd.f32 %v2516_v6, %v1091_v0  ;;  %v2473_v16 = vadd.f32 %v2472_v7, %v1049_v1  ;;  %v1109_v17 = vld [vmem:[#allocation3 + $0x21c0] sm:$0xff]  ;;  %v1111_v19 = vld [vmem:[#allocation3 + $0x21d0] sm:$0xff]  ;;  %v1034_v20 = vld [vmem:[#allocation3 + $0x1f68] sm:$0xff] }
 0x17a   :  { %v2454_v21 = vadd.f32 %v2453_v9, %v1032_v61  ;;  %v1093_v23 = vld [vmem:[#allocation3 + $0x2140] sm:$0xff]  ;;  %v1051_v24 = vld [vmem:[#allocation3 + $0x1ff0] sm:$0xff]  ;;  %v2582_v25 = vadd.f32 %v2581_v14, %v1152_v8  ;;  %v2538_v26 = vadd.f32 %v1110_v18, %v1109_v17  ;;  %v992_v28 = vld [vmem:[#allocation3 + $0x1e18] sm:$0xff] }
 0x17b   :  { %v2410_v22 = vadd.f32 %v2409_v10, %v990_v4  ;;  %v1035_v27 = vld [vmem:[#allocation3 + $0x1f70] sm:$0xff]  ;;  %v2518_v29 = vadd.f32 %v2517_v15, %v1092_v11  ;;  %v2474_v30 = vadd.f32 %v2473_v16, %v1050_v12  ;;  %v1154_v31 = vld [vmem:[#allocation3 + $0x2328] sm:$0xff]  ;;  %v1112_v32 = vld [vmem:[#allocation3 + $0x21d8] sm:$0xff] }
 0x17c   :  { %v1036_v33 = vld [vmem:[#allocation3 + $0x1f78] sm:$0xff]  ;;  %v2455_v34 = vadd.f32 %v2454_v21, %v1033_v3  ;;  %v1094_v36 = vld [vmem:[#allocation3 + $0x2148] sm:$0xff]  ;;  %v2583_v38 = vadd.f32 %v2582_v25, %v1153_v13  ;;  %v2539_v39 = vadd.f32 %v2538_v26, %v1111_v19  ;;  %v993_v40 = vld [vmem:[#allocation3 + $0x1e20] sm:$0xff] }
 0x17d   :  { %v2411_v35 = vadd.f32 %v2410_v22, %v991_v5  ;;  %v1052_v37 = vld [vmem:[#allocation3 + $0x1ff8] sm:$0xff]  ;;  %v2519_v41 = vadd.f32 %v2518_v29, %v1093_v23  ;;  %v2475_v42 = vadd.f32 %v2474_v30, %v1051_v24  ;;  %v1155_v43 = vld [vmem:[#allocation3 + $0x2330] sm:$0xff]  ;;  %v1113_v44 = vld [vmem:[#allocation3 + $0x21e0] sm:$0xff]  ;;  %v2458_v51 = vsel %vm1431_vm0, %v1036_v33, 0.0 }
 0x17e   :  { %v2456_v45 = vadd.f32 %v2455_v34, %v1034_v20  ;;  %v1095_v47 = vld [vmem:[#allocation3 + $0x2150] sm:$0xff]  ;;  %v1053_v48 = vld [vmem:[#allocation3 + $0x2000] sm:$0xff]  ;;  %v2584_v49 = vadd.f32 %v2583_v38, %v1154_v31  ;;  %v2540_v50 = vadd.f32 %v2539_v39, %v1112_v32  ;;  %v994_v52 = vld [vmem:[#allocation3 + $0x1e28] sm:$0xff] }
 0x17f   :  { %v2412_v46 = vadd.f32 %v2411_v35, %v992_v28  ;;  %v2520_v53 = vadd.f32 %v2519_v41, %v1094_v36  ;;  %v2476_v54 = vadd.f32 %v2475_v42, %v1052_v37  ;;  %v1156_v55 = vld [vmem:[#allocation3 + $0x2338] sm:$0xff]  ;;  %v1114_v56 = vld [vmem:[#allocation3 + $0x21e8] sm:$0xff]  ;;  %v995_v63 = vld [vmem:[#allocation3 + $0x1e30] sm:$0xff] }
 0x180   :  { %v2457_v57 = vadd.f32 %v2456_v45, %v1035_v27  ;;  %v1096_v59 = vld [vmem:[#allocation3 + $0x2158] sm:$0xff]  ;;  %v1054_v60 = vld [vmem:[#allocation3 + $0x2008] sm:$0xff]  ;;  %v2585_v61 = vadd.f32 %v2584_v49, %v1155_v43  ;;  %v2541_v62 = vadd.f32 %v2540_v50, %v1113_v44  ;;  %v1157_v2 = vld [vmem:[#allocation3 + $0x2340] sm:$0xff] }
 0x181   :  { %v2413_v58 = vadd.f32 %v2412_v46, %v993_v40  ;;  %v2521_v0 = vadd.f32 %v2520_v53, %v1095_v47  ;;  %v2477_v1 = vadd.f32 %v2476_v54, %v1053_v48  ;;  %v1115_v3 = vld [vmem:[#allocation3 + $0x21f0] sm:$0xff]  ;;  %v996_v5 = vld [vmem:[#allocation3 + $0x1e38] sm:$0xff]  ;;  %v1097_v7 = vld [vmem:[#allocation3 + $0x2160] sm:$0xff] }
 0x182   :  { %v2459_v4 = vadd.f32 %v2458_v51, %v2457_v57  ;;  %v1055_v8 = vld [vmem:[#allocation3 + $0x2010] sm:$0xff]  ;;  %v2586_v9 = vadd.f32 %v2585_v61, %v1156_v55  ;;  %v2542_v10 = vadd.f32 %v2541_v62, %v1114_v56  ;;  %v997_v11 = vld [vmem:[#allocation3 + $0x1e40] sm:$0xff]  ;;  %v1098_v12 = vld [vmem:[#allocation3 + $0x2168] sm:$0xff] }
 0x183   :  { %v2414_v6 = vadd.f32 %v2413_v58, %v994_v52  ;;  %v2522_v13 = vadd.f32 %v2521_v0, %v1096_v59  ;;  %v2478_v14 = vadd.f32 %v2477_v1, %v1054_v60  ;;  %v1158_v15 = vld [vmem:[#allocation3 + $0x2348] sm:$0xff]  ;;  %v1116_v16 = vld [vmem:[#allocation3 + $0x21f8] sm:$0xff]  ;;  %v1159_v19 = vld [vmem:[#allocation3 + $0x2350] sm:$0xff] }
 0x184   :  { %2460 = vadd.xlane.f32.xlu1 %v2459_v4  ;;  %v1056_v18 = vld [vmem:[#allocation3 + $0x2018] sm:$0xff]  ;;  %v2587_v20 = vadd.f32 %v2586_v9, %v1157_v2  ;;  %v1117_v21 = vld [vmem:[#allocation3 + $0x2200] sm:$0xff]  ;;  %v2543_v22 = vadd.f32 %v2542_v10, %v1115_v3  ;;  %v1218_v26 = vld [vmem:[#allocation3 + $0x2528] sm:$0xff] }
 0x185   :  { %v2415_v17 = vadd.f32 %v2414_v6, %v995_v63  ;;  %v2523_v23 = vadd.f32 %v2522_v13, %v1097_v7  ;;  %v2479_v24 = vadd.f32 %v2478_v14, %v1055_v8  ;;  %v1217_v25 = vld [vmem:[#allocation3 + $0x2520] sm:$0xff]  ;;  %v1219_v27 = vld [vmem:[#allocation3 + $0x2530] sm:$0xff]  ;;  %v998_v28 = vld [vmem:[#allocation3 + $0x1e48] sm:$0xff] }
 0x186   :  { %v1099_v30 = vld [vmem:[#allocation3 + $0x2170] sm:$0xff]  ;;  %v1057_v31 = vld [vmem:[#allocation3 + $0x2020] sm:$0xff]  ;;  %v2588_v32 = vadd.f32 %v2587_v20, %v1158_v15  ;;  %v2544_v33 = vadd.f32 %v2543_v22, %v1116_v16  ;;  %v2652_v34 = vadd.f32 %v1218_v26, %v1217_v25  ;;  %v1160_v38 = vld [vmem:[#allocation3 + $0x2358] sm:$0xff] }
 0x187   :  { %v2416_v29 = vadd.f32 %v2415_v17, %v996_v5  ;;  %v999_v35 = vld [vmem:[#allocation3 + $0x1e50] sm:$0xff]  ;;  %v2524_v36 = vadd.f32 %v2523_v23, %v1098_v12  ;;  %v2480_v37 = vadd.f32 %v2479_v24, %v1056_v18  ;;  %v1118_v39 = vld [vmem:[#allocation3 + $0x2208] sm:$0xff]  ;;  %v1220_v40 = vld [vmem:[#allocation3 + $0x2538] sm:$0xff] }
 0x188   :  { %v1000_v41 = vld [vmem:[#allocation3 + $0x1e58] sm:$0xff]  ;;  %v1058_v44 = vld [vmem:[#allocation3 + $0x2028] sm:$0xff]  ;;  %v2589_v45 = vadd.f32 %v2588_v32, %v1159_v19  ;;  %v2545_v46 = vadd.f32 %v2544_v33, %v1117_v21  ;;  %v2653_v47 = vadd.f32 %v2652_v34, %v1219_v27  ;;  %v1161_v50 = vld [vmem:[#allocation3 + $0x2360] sm:$0xff] }
 0x189   :  { %v2417_v42 = vadd.f32 %v2416_v29, %v997_v11  ;;  %v1100_v43 = vld [vmem:[#allocation3 + $0x2178] sm:$0xff]  ;;  %v2525_v48 = vadd.f32 %v2524_v36, %v1099_v30  ;;  %v2481_v49 = vadd.f32 %v2480_v37, %v1057_v31  ;;  %v1119_v51 = vld [vmem:[#allocation3 + $0x2210] sm:$0xff]  ;;  %v1221_v52 = vld [vmem:[#allocation3 + $0x2540] sm:$0xff]  ;;  %v2420_v59 = vsel %vm1431_vm0, %v1000_v41, 0.0 }
 0x18a   :  { %v1101_v54 = vld [vmem:[#allocation3 + $0x2180] sm:$0xff]  ;;  %v1059_v55 = vld [vmem:[#allocation3 + $0x2030] sm:$0xff]  ;;  %v2590_v56 = vadd.f32 %v2589_v45, %v1160_v38  ;;  %v2546_v57 = vadd.f32 %v2545_v46, %v1118_v39  ;;  %v2654_v58 = vadd.f32 %v2653_v47, %v1220_v40  ;;  %v1162_v62 = vld [vmem:[#allocation3 + $0x2368] sm:$0xff] }
 0x18b   :  { %v2418_v53 = vadd.f32 %v2417_v42, %v998_v28  ;;  %v2526_v60 = vadd.f32 %v2525_v48, %v1100_v43  ;;  %v2482_v61 = vadd.f32 %v2481_v49, %v1058_v44  ;;  %v1120_v63 = vld [vmem:[#allocation3 + $0x2218] sm:$0xff]  ;;  %v1222_v0 = vld [vmem:[#allocation3 + $0x2548] sm:$0xff]  ;;  %v1103_v3 = vld [vmem:[#allocation3 + $0x2190] sm:$0xff] }
 0x18c   :  { %v1102_v2 = vld [vmem:[#allocation3 + $0x2188] sm:$0xff]  ;;  %v1060_v4 = vld [vmem:[#allocation3 + $0x2038] sm:$0xff]  ;;  %v2591_v5 = vadd.f32 %v2590_v56, %v1161_v50  ;;  %v2547_v6 = vadd.f32 %v2546_v57, %v1119_v51  ;;  %v2655_v7 = vadd.f32 %v2654_v58, %v1221_v52  ;;  %v1163_v10 = vld [vmem:[#allocation3 + $0x2370] sm:$0xff] }
 0x18d   :  { %v2419_v1 = vadd.f32 %v2418_v53, %v999_v35  ;;  %v2527_v8 = vadd.f32 %v2526_v60, %v1101_v54  ;;  %v2483_v9 = vadd.f32 %v2482_v61, %v1059_v55  ;;  %v1121_v11 = vld [vmem:[#allocation3 + $0x2220] sm:$0xff]  ;;  %v1223_v12 = vld [vmem:[#allocation3 + $0x2550] sm:$0xff]  ;;  %v1104_v14 = vld [vmem:[#allocation3 + $0x2198] sm:$0xff] }
 0x18e   :  { %v1061_v15 = vld [vmem:[#allocation3 + $0x2040] sm:$0xff]  ;;  %v1062_v16 = vld [vmem:[#allocation3 + $0x2048] sm:$0xff]  ;;  %v2592_v17 = vadd.f32 %v2591_v5, %v1162_v62  ;;  %v2548_v18 = vadd.f32 %v2547_v6, %v1120_v63  ;;  %v2656_v19 = vadd.f32 %v2655_v7, %v1222_v0  ;;  %v1164_v22 = vld [vmem:[#allocation3 + $0x2378] sm:$0xff] }
 0x18f   :  { %v2421_v13 = vadd.f32 %v2420_v59, %v2419_v1  ;;  %v2528_v20 = vadd.f32 %v2527_v8, %v1102_v2  ;;  %v2484_v21 = vadd.f32 %v2483_v9, %v1060_v4  ;;  %v1122_v23 = vld [vmem:[#allocation3 + $0x2228] sm:$0xff]  ;;  %v1224_v24 = vld [vmem:[#allocation3 + $0x2558] sm:$0xff]  ;;  %v1105_v25 = vld [vmem:[#allocation3 + $0x21a0] sm:$0xff] }
 0x190   :  { %v1165_v26 = vld [vmem:[#allocation3 + $0x2380] sm:$0xff]  ;;  %v2593_v27 = vadd.f32 %v2592_v17, %v1163_v10  ;;  %v1123_v28 = vld [vmem:[#allocation3 + $0x2230] sm:$0xff]  ;;  %v2549_v29 = vadd.f32 %v2548_v18, %v1121_v11  ;;  %v2657_v31 = vadd.f32 %v2656_v19, %v1223_v12  ;;  %v1182_v35 = vld [vmem:[#allocation3 + $0x2408] sm:$0xff] }
 0x191   :  { %2422 = vadd.xlane.f32.xlu0 %v2421_v13  ;;  %v1225_v30 = vld [vmem:[#allocation3 + $0x2560] sm:$0xff]  ;;  %v2529_v32 = vadd.f32 %v2528_v20, %v1103_v3  ;;  %v2485_v33 = vadd.f32 %v2484_v21, %v1061_v15  ;;  %v1183_v36 = vld [vmem:[#allocation3 + $0x2410] sm:$0xff]  ;;  %v1106_v37 = vld [vmem:[#allocation3 + $0x21a8] sm:$0xff] }
 0x192   :  { %v1181_v34 = vld [vmem:[#allocation3 + $0x2400] sm:$0xff]  ;;  %v1063_v38 = vld [vmem:[#allocation3 + $0x2050] sm:$0xff]  ;;  %v1166_v39 = vld [vmem:[#allocation3 + $0x2388] sm:$0xff]  ;;  %v2594_v40 = vadd.f32 %v2593_v27, %v1164_v22  ;;  %v2550_v41 = vadd.f32 %v2549_v29, %v1122_v23  ;;  %v2658_v42 = vadd.f32 %v2657_v31, %v1224_v24 }
 0x193   :  { %v2614_v43 = vadd.f32 %v1182_v35, %v1181_v34  ;;  %v2530_v44 = vadd.f32 %v2529_v32, %v1104_v14  ;;  %v2486_v45 = vadd.f32 %v2485_v33, %v1062_v16  ;;  %v1124_v46 = vld [vmem:[#allocation3 + $0x2238] sm:$0xff]  ;;  %v1226_v47 = vld [vmem:[#allocation3 + $0x2568] sm:$0xff]  ;;  %v1167_v51 = vld [vmem:[#allocation3 + $0x2390] sm:$0xff] }
 0x194   :  { %v1184_v48 = vld [vmem:[#allocation3 + $0x2418] sm:$0xff]  ;;  %v2595_v52 = vadd.f32 %v2594_v40, %v1165_v26  ;;  %v2551_v53 = vadd.f32 %v2550_v41, %v1123_v28  ;;  %v2659_v54 = vadd.f32 %v2658_v42, %v1225_v30  ;;  %v1125_v58 = vld [vmem:[#allocation3 + $0x2240] sm:$0xff]  ;;  %v1227_v59 = vld [vmem:[#allocation3 + $0x2570] sm:$0xff] }
 0x195   :  { %v1108_v49 = vld [vmem:[#allocation3 + $0x21b8] sm:$0xff]  ;;  %v2615_v55 = vadd.f32 %v2614_v43, %v1183_v36  ;;  %v2531_v56 = vadd.f32 %v2530_v44, %v1105_v25  ;;  %v2487_v57 = vadd.f32 %v2486_v45, %v1063_v38  ;;  %v1185_v60 = vld [vmem:[#allocation3 + $0x2420] sm:$0xff]  ;;  %v1107_v61 = vld [vmem:[#allocation3 + $0x21b0] sm:$0xff] }
 0x196   :  { %v1064_v50 = vld [vmem:[#allocation3 + $0x2058] sm:$0xff]  ;;  %v1065_v62 = vld [vmem:[#allocation3 + $0x2060] sm:$0xff]  ;;  %v2596_v0 = vadd.f32 %v2595_v52, %v1166_v39  ;;  %v2552_v1 = vadd.f32 %v2551_v53, %v1124_v46  ;;  %v2660_v2 = vadd.f32 %v2659_v54, %v1226_v47  ;;  %v2534_v5 = vsel %vm1431_vm0, %v1108_v49, 0.0  ;;  %v1126_v7 = vld [vmem:[#allocation3 + $0x2248] sm:$0xff] }
 0x197   :  { %v1168_v63 = vld [vmem:[#allocation3 + $0x2398] sm:$0xff]  ;;  %v2616_v3 = vadd.f32 %v2615_v55, %v1184_v48  ;;  %v2532_v4 = vadd.f32 %v2531_v56, %v1106_v37  ;;  %v2488_v6 = vadd.f32 %v2487_v57, %v1064_v50  ;;  %v1186_v9 = vld [vmem:[#allocation3 + $0x2428] sm:$0xff]  ;;  %v1169_v11 = vld [vmem:[#allocation3 + $0x23a0] sm:$0xff] }
 0x198   :  { %v1228_v8 = vld [vmem:[#allocation3 + $0x2578] sm:$0xff]  ;;  %v1066_v10 = vld [vmem:[#allocation3 + $0x2068] sm:$0xff]  ;;  %v2597_v12 = vadd.f32 %v2596_v0, %v1167_v51  ;;  %v2553_v13 = vadd.f32 %v2552_v1, %v1125_v58  ;;  %v2661_v14 = vadd.f32 %v2660_v2, %v1227_v59  ;;  %v1127_v18 = vld [vmem:[#allocation3 + $0x2250] sm:$0xff] }
 0x199   :  { %v2617_v15 = vadd.f32 %v2616_v3, %v1185_v60  ;;  %v2533_v16 = vadd.f32 %v2532_v4, %v1107_v61  ;;  %v2489_v17 = vadd.f32 %v2488_v6, %v1065_v62  ;;  %v1229_v19 = vld [vmem:[#allocation3 + $0x2580] sm:$0xff]  ;;  %v1187_v20 = vld [vmem:[#allocation3 + $0x2430] sm:$0xff]  ;;  %v1068_v22 = vld [vmem:[#allocation3 + $0x2078] sm:$0xff] }
 0x19a   :  { %v1067_v21 = vld [vmem:[#allocation3 + $0x2070] sm:$0xff]  ;;  %v1170_v23 = vld [vmem:[#allocation3 + $0x23a8] sm:$0xff]  ;;  %v2598_v24 = vadd.f32 %v2597_v12, %v1168_v63  ;;  %v2554_v25 = vadd.f32 %v2553_v13, %v1126_v7  ;;  %v2662_v26 = vadd.f32 %v2661_v14, %v1228_v8  ;;  %v1128_v30 = vld [vmem:[#allocation3 + $0x2258] sm:$0xff] }
 0x19b   :  { %v2618_v27 = vadd.f32 %v2617_v15, %v1186_v9  ;;  %v2535_v28 = vadd.f32 %v2534_v5, %v2533_v16  ;;  %v2490_v29 = vadd.f32 %v2489_v17, %v1066_v10  ;;  %v1230_v31 = vld [vmem:[#allocation3 + $0x2588] sm:$0xff]  ;;  %v1188_v32 = vld [vmem:[#allocation3 + $0x2438] sm:$0xff]  ;;  %v1069_v33 = vld [vmem:[#allocation3 + $0x2080] sm:$0xff] }
 0x19c   :  { %v1171_v34 = vld [vmem:[#allocation3 + $0x23b0] sm:$0xff]  ;;  %v2599_v35 = vadd.f32 %v2598_v24, %v1169_v11  ;;  %v1129_v36 = vld [vmem:[#allocation3 + $0x2260] sm:$0xff]  ;;  %v2555_v37 = vadd.f32 %v2554_v25, %v1127_v18  ;;  %v2663_v39 = vadd.f32 %v2662_v26, %v1229_v19  ;;  %v1290_v44 = vld [vmem:[#allocation3 + $0x2768] sm:$0xff] }
 0x19d   :  { %v1231_v38 = vld [vmem:[#allocation3 + $0x2590] sm:$0xff]  ;;  %v2619_v40 = vadd.f32 %v2618_v27, %v1187_v20  ;;  %2536 = vadd.xlane.f32.xlu1 %v2535_v28  ;;  %v2491_v41 = vadd.f32 %v2490_v29, %v1067_v21  ;;  %v1189_v42 = vld [vmem:[#allocation3 + $0x2440] sm:$0xff]  ;;  %v1070_v45 = vld [vmem:[#allocation3 + $0x2088] sm:$0xff] }
 0x19e   :  { %v1289_v43 = vld [vmem:[#allocation3 + $0x2760] sm:$0xff]  ;;  %v1172_v46 = vld [vmem:[#allocation3 + $0x23b8] sm:$0xff]  ;;  %v2600_v47 = vadd.f32 %v2599_v35, %v1170_v23  ;;  %v2556_v48 = vadd.f32 %v2555_v37, %v1128_v30  ;;  %v2664_v49 = vadd.f32 %v2663_v39, %v1230_v31  ;;  %v1291_v51 = vld [vmem:[#allocation3 + $0x2770] sm:$0xff] }
 0x19f   :  { %v2620_v50 = vadd.f32 %v2619_v40, %v1188_v32  ;;  %v2492_v52 = vadd.f32 %v2491_v41, %v1068_v22  ;;  %v1130_v53 = vld [vmem:[#allocation3 + $0x2268] sm:$0xff]  ;;  %v1232_v54 = vld [vmem:[#allocation3 + $0x2598] sm:$0xff]  ;;  %v2728_v56 = vadd.f32 %v1290_v44, %v1289_v43  ;;  %v1173_v58 = vld [vmem:[#allocation3 + $0x23c0] sm:$0xff] }
 0x1a0   :  { %v1190_v55 = vld [vmem:[#allocation3 + $0x2448] sm:$0xff]  ;;  %v1072_v57 = vld [vmem:[#allocation3 + $0x2098] sm:$0xff]  ;;  %v2601_v59 = vadd.f32 %v2600_v47, %v1171_v34  ;;  %v2557_v60 = vadd.f32 %v2556_v48, %v1129_v36  ;;  %v2665_v61 = vadd.f32 %v2664_v49, %v1231_v38  ;;  %v1131_v1 = vld [vmem:[#allocation3 + $0x2270] sm:$0xff] }
 0x1a1   :  { %v2621_v62 = vadd.f32 %v2620_v50, %v1189_v42  ;;  %v1292_v63 = vld [vmem:[#allocation3 + $0x2778] sm:$0xff]  ;;  %v2493_v0 = vadd.f32 %v2492_v52, %v1069_v33  ;;  %v1233_v2 = vld [vmem:[#allocation3 + $0x25a0] sm:$0xff]  ;;  %v1191_v3 = vld [vmem:[#allocation3 + $0x2450] sm:$0xff]  ;;  %v2729_v4 = vadd.f32 %v2728_v56, %v1291_v51  ;;  %v2496_v13 = vsel %vm1431_vm0, %v1072_v57, 0.0 }
 0x1a2   :  { %v1071_v5 = vld [vmem:[#allocation3 + $0x2090] sm:$0xff]  ;;  %v1174_v6 = vld [vmem:[#allocation3 + $0x23c8] sm:$0xff]  ;;  %v2602_v7 = vadd.f32 %v2601_v59, %v1172_v46  ;;  %v2558_v8 = vadd.f32 %v2557_v60, %v1130_v53  ;;  %v2666_v9 = vadd.f32 %v2665_v61, %v1232_v54  ;;  %v1293_v11 = vld [vmem:[#allocation3 + $0x2780] sm:$0xff] }
 0x1a3   :  { %v2622_v10 = vadd.f32 %v2621_v62, %v1190_v55  ;;  %v2494_v12 = vadd.f32 %v2493_v0, %v1070_v45  ;;  %v1132_v14 = vld [vmem:[#allocation3 + $0x2278] sm:$0xff]  ;;  %v1234_v15 = vld [vmem:[#allocation3 + $0x25a8] sm:$0xff]  ;;  %v2730_v17 = vadd.f32 %v2729_v4, %v1292_v63  ;;  %v1175_v18 = vld [vmem:[#allocation3 + $0x23d0] sm:$0xff] }
 0x1a4   :  { %v1192_v16 = vld [vmem:[#allocation3 + $0x2458] sm:$0xff]  ;;  %v2603_v19 = vadd.f32 %v2602_v7, %v1173_v58  ;;  %v2559_v20 = vadd.f32 %v2558_v8, %v1131_v1  ;;  %v2667_v21 = vadd.f32 %v2666_v9, %v1233_v2  ;;  %v1294_v23 = vld [vmem:[#allocation3 + $0x2788] sm:$0xff]  ;;  %v1133_v25 = vld [vmem:[#allocation3 + $0x2280] sm:$0xff] }
 0x1a5   :  { %v2623_v22 = vadd.f32 %v2622_v10, %v1191_v3  ;;  %v2495_v24 = vadd.f32 %v2494_v12, %v1071_v5  ;;  %v1235_v26 = vld [vmem:[#allocation3 + $0x25b0] sm:$0xff]  ;;  %v1193_v27 = vld [vmem:[#allocation3 + $0x2460] sm:$0xff]  ;;  %v2731_v28 = vadd.f32 %v2730_v17, %v1293_v11  ;;  %v1176_v29 = vld [vmem:[#allocation3 + $0x23d8] sm:$0xff] }
 0x1a6   :  { %v2604_v30 = vadd.f32 %v2603_v19, %v1174_v6  ;;  %v2560_v31 = vadd.f32 %v2559_v20, %v1132_v14  ;;  %v2668_v32 = vadd.f32 %v2667_v21, %v1234_v15  ;;  %v1295_v34 = vld [vmem:[#allocation3 + $0x2790] sm:$0xff]  ;;  %v1177_v36 = vld [vmem:[#allocation3 + $0x23e0] sm:$0xff]  ;;  %v1134_v37 = vld [vmem:[#allocation3 + $0x2288] sm:$0xff] }
 0x1a7   :  { %v2624_v33 = vadd.f32 %v2623_v22, %v1192_v16  ;;  %v2497_v35 = vadd.f32 %v2496_v13, %v2495_v24  ;;  %v1236_v38 = vld [vmem:[#allocation3 + $0x25b8] sm:$0xff]  ;;  %v1194_v39 = vld [vmem:[#allocation3 + $0x2468] sm:$0xff]  ;;  %v2732_v40 = vadd.f32 %v2731_v28, %v1294_v23  ;;  %v1135_v42 = vld [vmem:[#allocation3 + $0x2290] sm:$0xff] }
 0x1a8   :  { %v2605_v41 = vadd.f32 %v2604_v30, %v1175_v18  ;;  %v2561_v43 = vadd.f32 %v2560_v31, %v1133_v25  ;;  %v1237_v44 = vld [vmem:[#allocation3 + $0x25c0] sm:$0xff]  ;;  %v2669_v45 = vadd.f32 %v2668_v32, %v1235_v26  ;;  %v1296_v47 = vld [vmem:[#allocation3 + $0x2798] sm:$0xff]  ;;  %v1195_v48 = vld [vmem:[#allocation3 + $0x2470] sm:$0xff] }
 0x1a9   :  { %v2625_v46 = vadd.f32 %v2624_v33, %v1193_v27  ;;  %2498 = vadd.xlane.f32.xlu0 %v2497_v35  ;;  %v2733_v49 = vadd.f32 %v2732_v40, %v1295_v34  ;;  %v1253_v50 = vld [vmem:[#allocation3 + $0x2640] sm:$0xff]  ;;  %v1254_v51 = vld [vmem:[#allocation3 + $0x2648] sm:$0xff]  ;;  %v1255_v58 = vld [vmem:[#allocation3 + $0x2650] sm:$0xff] }
 0x1aa   :  { %v1178_v52 = vld [vmem:[#allocation3 + $0x23e8] sm:$0xff]  ;;  %v2606_v53 = vadd.f32 %v2605_v41, %v1176_v29  ;;  %v2562_v54 = vadd.f32 %v2561_v43, %v1134_v37  ;;  %v2670_v55 = vadd.f32 %v2669_v45, %v1236_v38  ;;  %v1297_v57 = vld [vmem:[#allocation3 + $0x27a0] sm:$0xff]  ;;  %v1179_v59 = vld [vmem:[#allocation3 + $0x23f0] sm:$0xff]  ;;  %v2690_v0 = vadd.f32 %v1254_v51, %v1253_v50 }
 0x1ab   :  { %v2626_v56 = vadd.f32 %v2625_v46, %v1194_v39  ;;  %v1136_v60 = vld [vmem:[#allocation3 + $0x2298] sm:$0xff]  ;;  %v1238_v61 = vld [vmem:[#allocation3 + $0x25c8] sm:$0xff]  ;;  %v2734_v63 = vadd.f32 %v2733_v49, %v1296_v47  ;;  %v1137_v8 = vld [vmem:[#allocation3 + $0x22a0] sm:$0xff] }
 0x1ac   :  { %v1196_v62 = vld [vmem:[#allocation3 + $0x2478] sm:$0xff]  ;;  %v2607_v2 = vadd.f32 %v2606_v53, %v1177_v36  ;;  %v2563_v3 = vadd.f32 %v2562_v54, %v1135_v42  ;;  %v2671_v4 = vadd.f32 %v2670_v55, %v1237_v44  ;;  %v1298_v6 = vld [vmem:[#allocation3 + $0x27a8] sm:$0xff]  ;;  %v1239_v9 = vld [vmem:[#allocation3 + $0x25d0] sm:$0xff]  ;;  %v2691_v12 = vadd.f32 %v2690_v0, %v1255_v58 }
 0x1ad   :  { %v1180_v1 = vld [vmem:[#allocation3 + $0x23f8] sm:$0xff]  ;;  %v2627_v5 = vadd.f32 %v2626_v56, %v1195_v48  ;;  %v1197_v10 = vld [vmem:[#allocation3 + $0x2480] sm:$0xff]  ;;  %v2735_v11 = vadd.f32 %v2734_v63, %v1297_v57  ;;  %v1299_v17 = vld [vmem:[#allocation3 + $0x27b0] sm:$0xff] }
 0x1ae   :  { %v1256_v7 = vld [vmem:[#allocation3 + $0x2658] sm:$0xff]  ;;  %v2608_v13 = vadd.f32 %v2607_v2, %v1178_v52  ;;  %v2564_v14 = vadd.f32 %v2563_v3, %v1136_v60  ;;  %v2672_v15 = vadd.f32 %v2671_v4, %v1238_v61  ;;  %v1257_v18 = vld [vmem:[#allocation3 + $0x2660] sm:$0xff]  ;;  %v2610_v19 = vsel %vm1431_vm0, %v1180_v1, 0.0  ;;  %v1138_v20 = vld [vmem:[#allocation3 + $0x22a8] sm:$0xff]  ;;  %v3209_v52 = vpop.xlane.xlu1 %1510 }
 0x1af   :  { %v2628_v16 = vadd.f32 %v2627_v5, %v1196_v62  ;;  %v1240_v21 = vld [vmem:[#allocation3 + $0x25d8] sm:$0xff]  ;;  %v1198_v22 = vld [vmem:[#allocation3 + $0x2488] sm:$0xff]  ;;  %v2736_v23 = vadd.f32 %v2735_v11, %v1298_v6  ;;  %v2692_v24 = vadd.f32 %v2691_v12, %v1256_v7  ;;  %v1139_v31 = vld [vmem:[#allocation3 + $0x22b0] sm:$0xff] }
 0x1b0   :  { %v2609_v25 = vadd.f32 %v2608_v13, %v1179_v59  ;;  %v2565_v26 = vadd.f32 %v2564_v14, %v1137_v8  ;;  %v2673_v27 = vadd.f32 %v2672_v15, %v1239_v9  ;;  %v1300_v29 = vld [vmem:[#allocation3 + $0x27b8] sm:$0xff]  ;;  %v1258_v30 = vld [vmem:[#allocation3 + $0x2668] sm:$0xff]  ;;  %v1241_v32 = vld [vmem:[#allocation3 + $0x25e0] sm:$0xff]  ;;  %v3211_v15 = vpop.xlane.xlu0 %1434 }
 0x1b1   :  { %v2629_v28 = vadd.f32 %v2628_v16, %v1197_v10  ;;  %v1199_v33 = vld [vmem:[#allocation3 + $0x2490] sm:$0xff]  ;;  %v2737_v34 = vadd.f32 %v2736_v23, %v1299_v17  ;;  %v2693_v35 = vadd.f32 %v2692_v24, %v1257_v18  ;;  %v1301_v40 = vld [vmem:[#allocation3 + $0x27c0] sm:$0xff]  ;;  %v1140_v42 = vld [vmem:[#allocation3 + $0x22b8] sm:$0xff] }
 0x1b2   :  { %v2611_v36 = vadd.f32 %v2610_v19, %v2609_v25  ;;  %v2566_v37 = vadd.f32 %v2565_v26, %v1138_v20  ;;  %v2674_v38 = vadd.f32 %v2673_v27, %v1240_v21  ;;  %v1259_v41 = vld [vmem:[#allocation3 + $0x2670] sm:$0xff]  ;;  %v1242_v43 = vld [vmem:[#allocation3 + $0x25e8] sm:$0xff]  ;;  %v1200_v44 = vld [vmem:[#allocation3 + $0x2498] sm:$0xff]  ;;  %v3213_v21 = vpop.xlane.xlu1 %1548 }
 0x1b3   :  { %v2630_v39 = vadd.f32 %v2629_v28, %v1198_v22  ;;  %v2738_v45 = vadd.f32 %v2737_v34, %v1300_v29  ;;  %v2694_v46 = vadd.f32 %v2693_v35, %v1258_v30  ;;  %v1302_v50 = vld [vmem:[#allocation3 + $0x27c8] sm:$0xff]  ;;  %v1260_v51 = vld [vmem:[#allocation3 + $0x2678] sm:$0xff]  ;;  %v1141_v53 = vld [vmem:[#allocation3 + $0x22c0] sm:$0xff] }
 0x1b4   :  { %2612 = vadd.xlane.f32.xlu1 %v2611_v36  ;;  %v2567_v47 = vadd.f32 %v2566_v37, %v1139_v31  ;;  %v2675_v48 = vadd.f32 %v2674_v38, %v1241_v32  ;;  %v1243_v54 = vld [vmem:[#allocation3 + $0x25f0] sm:$0xff]  ;;  %v1201_v55 = vld [vmem:[#allocation3 + $0x24a0] sm:$0xff]  ;;  %v1142_v63 = vld [vmem:[#allocation3 + $0x22c8] sm:$0xff] }
 0x1b5   :  { %v2631_v49 = vadd.f32 %v2630_v39, %v1199_v33  ;;  %v2739_v56 = vadd.f32 %v2738_v45, %v1301_v40  ;;  %v2695_v57 = vadd.f32 %v2694_v46, %v1259_v41  ;;  %v1303_v61 = vld [vmem:[#allocation3 + $0x27d0] sm:$0xff]  ;;  %v1261_v62 = vld [vmem:[#allocation3 + $0x2680] sm:$0xff]  ;;  %v1244_v0 = vld [vmem:[#allocation3 + $0x25f8] sm:$0xff] }
 0x1b6   :  { %v2568_v58 = vadd.f32 %v2567_v47, %v1140_v42  ;;  %v2676_v59 = vadd.f32 %v2675_v48, %v1242_v43  ;;  %v1202_v1 = vld [vmem:[#allocation3 + $0x24a8] sm:$0xff]  ;;  %v1144_v4 = vld [vmem:[#allocation3 + $0x22d8] sm:$0xff]  ;;  %v1143_v10 = vld [vmem:[#allocation3 + $0x22d0] sm:$0xff] }
 0x1b7   :  { %v2632_v60 = vadd.f32 %v2631_v49, %v1200_v44  ;;  %v2740_v2 = vadd.f32 %v2739_v56, %v1302_v50  ;;  %v2696_v3 = vadd.f32 %v2695_v57, %v1260_v51  ;;  %v1304_v8 = vld [vmem:[#allocation3 + $0x27d8] sm:$0xff]  ;;  %v1262_v9 = vld [vmem:[#allocation3 + $0x2688] sm:$0xff]  ;;  %v1245_v11 = vld [vmem:[#allocation3 + $0x2600] sm:$0xff]  ;;  %v2572_v22 = vsel %vm1431_vm0, %v1144_v4, 0.0  ;;  %v3216_v51 = vpop.xlane.xlu0 %1472 }
 0x1b8   :  { %v2569_v5 = vadd.f32 %v2568_v58, %v1141_v53  ;;  %v2677_v6 = vadd.f32 %v2676_v59, %v1243_v54  ;;  %v1203_v12 = vld [vmem:[#allocation3 + $0x24b0] sm:$0xff]  ;;  %v1305_v19 = vld [vmem:[#allocation3 + $0x27e0] sm:$0xff]  ;;  %v1246_v23 = vld [vmem:[#allocation3 + $0x2608] sm:$0xff]  ;;  %v3221_v59 = vpop.xlane.xlu1 %1624 }
 0x1b9   :  { %v2633_v7 = vadd.f32 %v2632_v60, %v1201_v55  ;;  %v2741_v13 = vadd.f32 %v2740_v2, %v1303_v61  ;;  %v2697_v14 = vadd.f32 %v2696_v3, %v1261_v62  ;;  %v1263_v20 = vld [vmem:[#allocation3 + $0x2690] sm:$0xff]  ;;  %v1204_v24 = vld [vmem:[#allocation3 + $0x24b8] sm:$0xff]  ;;  %v1306_v31 = vld [vmem:[#allocation3 + $0x27e8] sm:$0xff] }
 0x1ba   :  { %v2570_v16 = vadd.f32 %v2569_v5, %v1142_v63  ;;  %v2678_v17 = vadd.f32 %v2677_v6, %v1244_v0  ;;  %v1247_v28 = vld [vmem:[#allocation3 + $0x2610] sm:$0xff]  ;;  %v1264_v32 = vld [vmem:[#allocation3 + $0x2698] sm:$0xff]  ;;  %v1205_v35 = vld [vmem:[#allocation3 + $0x24c0] sm:$0xff] }
 0x1bb   :  { %v2634_v18 = vadd.f32 %v2633_v7, %v1202_v1  ;;  %v2742_v25 = vadd.f32 %v2741_v13, %v1304_v8  ;;  %v2698_v26 = vadd.f32 %v2697_v14, %v1262_v9  ;;  %v1248_v33 = vld [vmem:[#allocation3 + $0x2618] sm:$0xff]  ;;  %v1307_v36 = vld [vmem:[#allocation3 + $0x27f0] sm:$0xff]  ;;  %v1265_v42 = vld [vmem:[#allocation3 + $0x26a0] sm:$0xff] }
 0x1bc   :  { %v2571_v27 = vadd.f32 %v2570_v16, %v1143_v10  ;;  %v2679_v29 = vadd.f32 %v2678_v17, %v1245_v11  ;;  %v1252_v34 = vld [vmem:[#allocation3 + $0x2638] sm:$0xff]  ;;  %v1361_v43 = vld [vmem:[#allocation3 + $0x29a0] sm:$0xf]  ;;  %v1362_v44 = vld [vmem:[#allocation3 + $0x29a8] sm:$0xf] }
 0x1bd   :  { %v2635_v30 = vadd.f32 %v2634_v18, %v1203_v12  ;;  %v2743_v37 = vadd.f32 %v2742_v25, %v1305_v19  ;;  %v2699_v38 = vadd.f32 %v2698_v26, %v1263_v20  ;;  %v1249_v45 = vld [vmem:[#allocation3 + $0x2620] sm:$0xff]  ;;  %v1206_v46 = vld [vmem:[#allocation3 + $0x24c8] sm:$0xff]  ;;  %v1207_v47 = vld [vmem:[#allocation3 + $0x24d0] sm:$0xff]  ;;  %v3219_v54 = vsel %vm1431_vm0, %v1252_v34, 0.0 }
 0x1be   :  { %v2573_v39 = vadd.f32 %v2572_v22, %v2571_v27  ;;  %v2680_v40 = vadd.f32 %v2679_v29, %v1246_v23  ;;  %v1363_v50 = vld [vmem:[#allocation3 + $0x29b0] sm:$0xf]  ;;  %v1308_v56 = vld [vmem:[#allocation3 + $0x27f8] sm:$0xff]  ;;  %v1266_v57 = vld [vmem:[#allocation3 + $0x26a8] sm:$0xff]  ;;  %v2805_v2 = vsel %vm2804_vm1, %v1361_v43, 0.0  ;;  %v2806_v3 = vsel %vm2804_vm1, %v1362_v44, 0.0  ;;  %v3244_v43 = vpop.xlane.xlu1 %1700 }
 0x1bf   :  { %v2636_v41 = vadd.f32 %v2635_v30, %v1204_v24  ;;  %v2744_v48 = vadd.f32 %v2743_v37, %v1306_v31  ;;  %v2700_v49 = vadd.f32 %v2699_v38, %v1264_v32  ;;  %v1364_v58 = vld [vmem:[#allocation3 + $0x29b8] sm:$0xf]  ;;  %v1250_v60 = vld [vmem:[#allocation3 + $0x2628] sm:$0xff]  ;;  %v1309_v63 = vld [vmem:[#allocation3 + $0x2800] sm:$0xff]  ;;  %v2807_v9 = vadd.f32 %v2806_v3, %v2805_v2 }
 0x1c0   :  { %2574 = vadd.xlane.f32.xlu0 %v2573_v39  ;;  %v2681_v53 = vadd.f32 %v2680_v40, %v1247_v28  ;;  %v1208_v61 = vld [vmem:[#allocation3 + $0x24d8] sm:$0xff]  ;;  %v1267_v7 = vld [vmem:[#allocation3 + $0x26b0] sm:$0xff]  ;;  %v1365_v8 = vld [vmem:[#allocation3 + $0x29c0] sm:$0xf]  ;;  %v2808_v10 = vsel %vm2804_vm1, %v1363_v50, 0.0  ;;  %v2810_v18 = vsel %vm2804_vm1, %v1364_v58, 0.0  ;;  %v3230_v19 = vstv %s3705_s0 }
 0x1c1   :  { %v2637_v55 = vadd.f32 %v2636_v41, %v1205_v35  ;;  %v1216_v62 = vld [vmem:[#allocation3 + $0x2518] sm:$0xff]  ;;  %v2745_v0 = vadd.f32 %v2744_v48, %v1307_v36  ;;  %v2701_v1 = vadd.f32 %v2700_v49, %v1265_v42  ;;  %v1251_v11 = vld [vmem:[#allocation3 + $0x2630] sm:$0xff]  ;;  %v1209_v12 = vld [vmem:[#allocation3 + $0x24e0] sm:$0xff]  ;;  %v2809_v27 = vadd.f32 %v2808_v10, %v2807_v9  ;;  %v3239_v35 = vpop.xlane.xlu0 %1586 }
 0x1c2   :  { %v2682_v4 = vadd.f32 %v2681_v53, %v1248_v33  ;;  %v1324_v6 = vld [vmem:[#allocation3 + $0x2878] sm:$0xff]  ;;  %v1310_v13 = vld [vmem:[#allocation3 + $0x2808] sm:$0xff]  ;;  %v3233_v23 = vsel %vm1431_vm0, %v1216_v62, 0.0  ;;  %v1367_v26 = vld [vmem:[#allocation3 + $0x29d0] sm:$0xf]  ;;  %v2812_v34 = vsel %vm2804_vm1, %v1365_v8, 0.0 }
 0x1c3   :  { %v2638_v5 = vadd.f32 %v2637_v55, %v1206_v46  ;;  %v2746_v14 = vadd.f32 %v2745_v0, %v1308_v56  ;;  %v1288_v16 = vld [vmem:[#allocation3 + $0x2758] sm:$0xff]  ;;  %v2702_v17 = vadd.f32 %v2701_v1, %v1266_v57  ;;  %v1366_v25 = vld [vmem:[#allocation3 + $0x29c8] sm:$0xf]  ;;  %v1311_v29 = vld [vmem:[#allocation3 + $0x2810] sm:$0xff]  ;;  %v3236_v31 = vsel %vm1431_vm0, %v1324_v6, 0.0 }
 0x1c4   :  { %v2683_v20 = vadd.f32 %v2682_v4, %v1249_v45  ;;  %v1268_v24 = vld [vmem:[#allocation3 + $0x26b8] sm:$0xff]  ;;  %v1210_v28 = vld [vmem:[#allocation3 + $0x24e8] sm:$0xff]  ;;  %v1269_v38 = vld [vmem:[#allocation3 + $0x26c0] sm:$0xff]  ;;  %v3242_v39 = vsel %vm1431_vm0, %v1288_v16, 0.0  ;;  %v2811_v42 = vadd.f32 %v2810_v18, %v2809_v27  ;;  %v2814_v50 = vsel %vm2804_vm1, %v1366_v25, 0.0 }
 0x1c5   :  { %v2639_v22 = vadd.f32 %v2638_v5, %v1207_v47  ;;  %v2747_v30 = vadd.f32 %v2746_v14, %v1309_v63  ;;  %v2703_v32 = vadd.f32 %v2702_v17, %v1267_v7  ;;  %v1368_v33 = vld [vmem:[#allocation3 + $0x29d8] sm:$0xf]  ;;  %v1369_v40 = vld [vmem:[#allocation3 + $0x29e0] sm:$0xf]  ;;  %v1370_v41 = vld [vmem:[#allocation3 + $0x29e8] sm:$0xf] }
 0x1c6   :  { %v2684_v36 = vadd.f32 %v2683_v20, %v1250_v60  ;;  %v1211_v44 = vld [vmem:[#allocation3 + $0x24f0] sm:$0xff]  ;;  %v1312_v45 = vld [vmem:[#allocation3 + $0x2818] sm:$0xff]  ;;  %v1270_v47 = vld [vmem:[#allocation3 + $0x26c8] sm:$0xff]  ;;  %v2816_v53 = vsel %vm2804_vm1, %v1367_v26, 0.0  ;;  %v2813_v62 = vadd.f32 %v2812_v34, %v2811_v42  ;;  %v2818_v63 = vsel %vm2804_vm1, %v1368_v33, 0.0 }
 0x1c7   :  { %v2640_v37 = vadd.f32 %v2639_v22, %v1208_v61  ;;  %v2748_v46 = vadd.f32 %v2747_v30, %v1310_v13  ;;  %v2704_v48 = vadd.f32 %v2703_v32, %v1268_v24  ;;  %v1371_v49 = vld [vmem:[#allocation3 + $0x29f0] sm:$0xf]  ;;  %v1313_v57 = vld [vmem:[#allocation3 + $0x2820] sm:$0xff]  ;;  %v1372_v60 = vld [vmem:[#allocation3 + $0x29f8] sm:$0xf]  ;;  %v2820_v5 = vsel %vm2804_vm1, %v1369_v40, 0.0 }
 0x1c8   :  { %v2685_v55 = vadd.f32 %v2684_v36, %v1251_v11  ;;  %v1271_v58 = vld [vmem:[#allocation3 + $0x26d0] sm:$0xff]  ;;  %v1373_v61 = vld [vmem:[#allocation3 + $0x2a00] sm:$0xf]  ;;  %v1212_v0 = vld [vmem:[#allocation3 + $0x24f8] sm:$0xff]  ;;  %v3251_v6 = vsel %vm2804_vm1, %v1370_v41, 0.0  ;;  %v2815_v13 = vadd.f32 %v2814_v50, %v2813_v62  ;;  %v3255_v14 = vsel %vm2804_vm1, %v1371_v49, 0.0  ;;  %v3271_v36 = vpop.xlane.xlu1 %1776 }
 0x1c9   :  { %v2641_v56 = vadd.f32 %v2640_v37, %v1209_v12  ;;  %v2749_v1 = vadd.f32 %v2748_v46, %v1311_v29  ;;  %v2705_v2 = vadd.f32 %v2704_v48, %v1269_v38  ;;  %v1374_v3 = vld [vmem:[#allocation3 + $0x2a08] sm:$0xf]  ;;  %v1375_v4 = vld [vmem:[#allocation3 + $0x2a10] sm:$0xf]  ;;  %v1272_v10 = vld [vmem:[#allocation3 + $0x26d8] sm:$0xff]  ;;  %v3258_v24 = vsel %vm2804_vm1, %v1372_v60, 0.0 }
 0x1ca   :  { %v2687_v7 = vadd.f32 %v3219_v54, %v2685_v55  ;;  %v1314_v9 = vld [vmem:[#allocation3 + $0x2828] sm:$0xff]  ;;  %v1376_v11 = vld [vmem:[#allocation3 + $0x2a18] sm:$0xf]  ;;  %v1377_v12 = vld [vmem:[#allocation3 + $0x2a20] sm:$0xf]  ;;  %v3261_v25 = vsel %vm2804_vm1, %v1373_v61, 0.0  ;;  %v3263_v54 = vpop.xlane.xlu0 %1662  ;;  %v2817_v32 = vadd.f32 %v2816_v53, %v2815_v13 }
 0x1cb   :  { %v2642_v8 = vadd.f32 %v2641_v56, %v1210_v28  ;;  %v1213_v16 = vld [vmem:[#allocation3 + $0x2500] sm:$0xff]  ;;  %v2750_v17 = vadd.f32 %v2749_v1, %v1312_v45  ;;  %v2706_v18 = vadd.f32 %v2705_v2, %v1270_v47  ;;  %v1378_v20 = vld [vmem:[#allocation3 + $0x2a28] sm:$0xf]  ;;  %v1379_v22 = vld [vmem:[#allocation3 + $0x2a30] sm:$0xf]  ;;  %v3266_v33 = vsel %vm2804_vm1, %v1374_v3, 0.0 }
 0x1cc   :  { %2688 = vadd.xlane.f32.xlu1 %v2687_v7  ;;  %v1315_v27 = vld [vmem:[#allocation3 + $0x2830] sm:$0xff]  ;;  %v1273_v28 = vld [vmem:[#allocation3 + $0x26e0] sm:$0xff]  ;;  %v1380_v29 = vld [vmem:[#allocation3 + $0x2a38] sm:$0xf]  ;;  %v3269_v34 = vsel %vm2804_vm1, %v1375_v4, 0.0  ;;  %v3277_v45 = vsel %vm2804_vm1, %v1377_v12, 0.0  ;;  %v2819_v53 = vadd.f32 %v2818_v63, %v2817_v32  ;;  %v3312_v32 = vpop.xlane.xlu1 %1852 }
 0x1cd   :  { %v2643_v26 = vadd.f32 %v2642_v8, %v1211_v44  ;;  %v1381_v30 = vld [vmem:[#allocation3 + $0x2a40] sm:$0xf]  ;;  %v1214_v37 = vld [vmem:[#allocation3 + $0x2508] sm:$0xff]  ;;  %v2751_v38 = vadd.f32 %v2750_v17, %v1313_v57  ;;  %v2707_v40 = vadd.f32 %v2706_v18, %v1271_v58  ;;  %v1383_v42 = vld [vmem:[#allocation3 + $0x2a50] sm:$0xf]  ;;  %v3274_v44 = vsel %vm2804_vm1, %v1376_v11, 0.0 }
 0x1ce   :  { %v1382_v41 = vld [vmem:[#allocation3 + $0x2a48] sm:$0xf]  ;;  %v1316_v47 = vld [vmem:[#allocation3 + $0x2838] sm:$0xff]  ;;  %v1385_v50 = vld [vmem:[#allocation3 + $0x2a60] sm:$0xf]  ;;  %v3280_v55 = vsel %vm2804_vm1, %v1378_v20, 0.0  ;;  %v2821_v8 = vadd.f32 %v2820_v5, %v2819_v53  ;;  %v3303_v20 = vpop.xlane.xlu0 %1738 }
 0x1cf   :  { %v2644_v46 = vadd.f32 %v2643_v26, %v1212_v0  ;;  %v1274_v48 = vld [vmem:[#allocation3 + $0x26e8] sm:$0xff]  ;;  %v1384_v49 = vld [vmem:[#allocation3 + $0x2a58] sm:$0xf]  ;;  %v3283_v56 = vsel %vm2804_vm1, %v1379_v22, 0.0  ;;  %v1215_v57 = vld [vmem:[#allocation3 + $0x2510] sm:$0xff]  ;;  %v2752_v58 = vadd.f32 %v2751_v38, %v1314_v9  ;;  %v2708_v60 = vadd.f32 %v2707_v40, %v1272_v10 }
 0x1d0   :  { %v1386_v61 = vld [vmem:[#allocation3 + $0x2a68] sm:$0xf]  ;;  %v1387_v62 = vld [vmem:[#allocation3 + $0x2a70] sm:$0xf]  ;;  %v3286_v1 = vsel %vm2804_vm1, %v1380_v29, 0.0  ;;  %v3289_v0 = vsel %vm2804_vm1, %v1381_v30, 0.0  ;;  %v2823_v26 = vadd.f32 %v3251_v6, %v2821_v8 }
 0x1d1   :  { %v2645_v2 = vadd.f32 %v2644_v46, %v1213_v16  ;;  %v1317_v3 = vld [vmem:[#allocation3 + $0x2840] sm:$0xff]  ;;  %v1275_v63 = vld [vmem:[#allocation3 + $0x26f0] sm:$0xff]  ;;  %v1388_v4 = vld [vmem:[#allocation3 + $0x2a78] sm:$0xf]  ;;  %v3292_v11 = vsel %vm2804_vm1, %v1382_v41, 0.0  ;;  %v3295_v9 = vsel %vm2804_vm1, %v1383_v42, 0.0  ;;  %v2753_v10 = vadd.f32 %v2752_v58, %v1315_v27 }
 0x1d2   :  { %v1389_v7 = vld [vmem:[#allocation3 + $0x2a80] sm:$0xf]  ;;  %v2709_v12 = vadd.f32 %v2708_v60, %v1273_v28  ;;  %v1390_v13 = vld [vmem:[#allocation3 + $0x2a88] sm:$0xf]  ;;  %v1391_v17 = vld [vmem:[#allocation3 + $0x2a90] sm:$0xf]  ;;  %v2825_v53 = vadd.f32 %v3255_v14, %v2823_v26 }
 0x1d3   :  { %v3298_v18 = vsel %vm2804_vm1, %v1384_v49, 0.0  ;;  %v3301_v16 = vsel %vm2804_vm1, %v1385_v50, 0.0  ;;  %v2646_v22 = vadd.f32 %v2645_v2, %v1214_v37  ;;  %v1392_v5 = vld [vmem:[#allocation3 + $0x2a98] sm:$0xf]  ;;  %v3307_v29 = vsel %vm2804_vm1, %v1386_v61, 0.0  ;;  %v1325_v28 = vld [vmem:[#allocation3 + $0x2880] sm:$0xff] }
 0x1d4   :  { %v3310_v27 = vsel %vm2804_vm1, %v1387_v62, 0.0  ;;  %v1326_v30 = vld [vmem:[#allocation3 + $0x2888] sm:$0xff]  ;;  %v2754_v40 = vadd.f32 %v2753_v10, %v1316_v47  ;;  %v2710_v41 = vadd.f32 %v2709_v12, %v1274_v48  ;;  %v1393_v42 = vld [vmem:[#allocation3 + $0x2aa0] sm:$0xf]  ;;  %v3315_v46 = vsel %vm2804_vm1, %v1388_v4, 0.0  ;;  %v2881_v6 = vld [vmem:[%s3707_s2 + $0x10] sm:$0xff] }
 0x1d5   :  { %v1318_v38 = vld [vmem:[#allocation3 + $0x2848] sm:$0xff]  ;;  %v3318_v37 = vsel %vm2804_vm1, %v1389_v7, 0.0  ;;  %v2647_v49 = vadd.f32 %v2646_v22, %v1215_v57  ;;  %v1276_v50 = vld [vmem:[#allocation3 + $0x26f8] sm:$0xff]  ;;  %v3325_v58 = vsel %vm2804_vm1, %v1390_v13, 0.0  ;;  %v3328_v47 = vsel %vm2804_vm1, %v1391_v17, 0.0  ;;  %v1327_v48 = vld [vmem:[#allocation3 + $0x2890] sm:$0xff] }
 0x1d6   :  { %v2879_v60 = vld [vmem:[%s3707_s2] sm:$0xff]  ;;  %v2755_v61 = vadd.f32 %v2754_v40, %v1317_v3  ;;  %v2711_v62 = vadd.f32 %v2710_v41, %v1275_v63  ;;  %v3334_v2 = vsel %vm2804_vm1, %v1392_v5, 0.0  ;;  %v2766_v57 = vadd.f32 %v1326_v30, %v1325_v28  ;;  %v2882_v14 = vld [vmem:[%s3707_s2 + $0x18] sm:$0xff]  ;;  %v2880_v4 = vld [vmem:[%s3707_s2 + $0x8] sm:$0xff]  ;;  %v3347_v30 = vpop.xlane.xlu0 %1814 }
 0x1d7   :  { %3709 = vst [vmem:[#allocation6_spill] sm:$0xff] %v3334_v2  ;;  %v2649_v7 = vadd.f32 %v3233_v23, %v2647_v49  ;;  %v1319_v8 = vld [vmem:[#allocation3 + $0x2850] sm:$0xff]  ;;  %v1277_v10 = vld [vmem:[#allocation3 + $0x2700] sm:$0xff]  ;;  %v2827_v12 = vadd.f32 %v3258_v24, %v2825_v53  ;;  %v3345_v3 = vsel %vm2804_vm1, %v1393_v42, 0.0  ;;  %v1328_v63 = vld [vmem:[#allocation3 + $0x2898] sm:$0xff]  ;;  %v3351_v42 = vpop.xlane.xlu1 %1928 }
 0x1d8   :  { %3710 = vst [vmem:[#allocation7_spill] sm:$0xff] %v3345_v3  ;;  %v2919_v13 = vmul.f32 0.001, %v2881_v6  ;;  %v1320_v17 = vld [vmem:[#allocation3 + $0x2858] sm:$0xff]  ;;  %v2756_v22 = vadd.f32 %v2755_v61, %v1318_v38  ;;  %v2712_v5 = vadd.f32 %v2711_v62, %v1276_v50  ;;  %v2767_v26 = vadd.f32 %v2766_v57, %v1327_v48  ;;  %v1278_v40 = vld [vmem:[#allocation3 + $0x2708] sm:$0xff]  ;;  %v1329_v41 = vld [vmem:[#allocation3 + $0x28a0] sm:$0xff] }
 0x1d9   :  { %v2917_v28 = vmul.f32 0.001, %v2879_v60  ;;  %2650 = vadd.xlane.f32.xlu0 %v2649_v7  ;;  %v2829_v23 = vadd.f32 %v3261_v25, %v2827_v12  ;;  %v2920_v24 = vmul.f32 0.001, %v2882_v14  ;;  %v2918_v53 = vmul.f32 0.001, %v2880_v4 }
 0x1da   :  { %v2959_v49 = vsub.f32 %v2919_v13, %v3230_v19  ;;  %v2757_v3 = vadd.f32 %v2756_v22, %v1319_v8  ;;  %v2713_v6 = vadd.f32 %v2712_v5, %v1277_v10  ;;  %v2768_v2 = vadd.f32 %v2767_v26, %v1328_v63  ;;  %v1321_v50 = vld [vmem:[#allocation3 + $0x2860] sm:$0xff]  ;;  %v1279_v48 = vld [vmem:[#allocation3 + $0x2710] sm:$0xff]  ;;  %v1330_v61 = vld [vmem:[#allocation3 + $0x28a8] sm:$0xff] }
 0x1db   :  { %v2957_v38 = vsub.f32 %v2917_v28, %v3230_v19  ;;  %v2831_v60 = vadd.f32 %v3266_v33, %v2829_v23  ;;  %v2960_v25 = vsub.f32 %v2920_v24, %v3230_v19  ;;  %v2958_v57 = vsub.f32 %v2918_v53, %v3230_v19  ;;  %v1322_v7 = vld [vmem:[#allocation3 + $0x2868] sm:$0xff]  ;;  %v1280_v10 = vld [vmem:[#allocation3 + $0x2718] sm:$0xff]  ;;  %v1331_v22 = vld [vmem:[#allocation3 + $0x28b0] sm:$0xff] }
 0x1dc   :  { %v2997_v62 = vsub.f32 0.0, %v2959_v49  ;;  %v2758_v14 = vadd.f32 %v2757_v3, %v1320_v17  ;;  %v2714_v4 = vadd.f32 %v2713_v6, %v1278_v40  ;;  %v2769_v12 = vadd.f32 %v2768_v2, %v1329_v41  ;;  %v2884_v8 = vld [vmem:[%s3707_s2 + $0x28] sm:$0xff]  ;;  %v2883_v28 = vld [vmem:[%s3707_s2 + $0x20] sm:$0xff]  ;;  %v2886_v23 = vld [vmem:[%s3707_s2 + $0x38] sm:$0xff] }
 0x1dd   :  { %v2995_v13 = vsub.f32 0.0, %v2957_v38  ;;  %v2833_v63 = vadd.f32 %v3269_v34, %v2831_v60  ;;  %v2998_v5 = vsub.f32 0.0, %v2960_v25  ;;  %v2996_v26 = vsub.f32 0.0, %v2958_v57  ;;  %v2885_v34 = vld [vmem:[%s3707_s2 + $0x30] sm:$0xff]  ;;  %v1281_v49 = vld [vmem:[#allocation3 + $0x2720] sm:$0xff]  ;;  %v1332_v53 = vld [vmem:[#allocation3 + $0x28b8] sm:$0xff] }
 0x1de   :  { %v3035_v33 = vmul.f32 %v2997_v62, %v3209_v52  ;;  %v2759_v3 = vadd.f32 %v2758_v14, %v1321_v50  ;;  %v2715_v17 = vadd.f32 %v2714_v4, %v1279_v48  ;;  %v2770_v2 = vadd.f32 %v2769_v12, %v1330_v61  ;;  %v3372_v52 = vpop.xlane.xlu0 %1890  ;;  %v1323_v41 = vld [vmem:[#allocation3 + $0x2870] sm:$0xff]  ;;  %v3381_v50 = vpop.xlane.xlu1 %2004  ;;  %v1282_v62 = vld [vmem:[#allocation3 + $0x2728] sm:$0xff]  ;;  %v1333_v57 = vld [vmem:[#allocation3 + $0x28c0] sm:$0xff] }
 0x1df   :  { %v3033_v40 = vmul.f32 %v2995_v13, %v3211_v15  ;;  %v2835_v24 = vadd.f32 %v3274_v44, %v2833_v63  ;;  %v3036_v15 = vmul.f32 %v2998_v5, %v3213_v21  ;;  %v3034_v6 = vmul.f32 %v2996_v26, %v3216_v51  ;;  %v1283_v13 = vld [vmem:[#allocation3 + $0x2730] sm:$0xff]  ;;  %v2888_v5 = vld [vmem:[%s3707_s2 + $0x48] sm:$0xff] }
 0x1e0   :  { %3074 = vst.msk [vmem:[%s3708_s3 + $0x10] sm:$0xff] %vm3071_vm2, %v3035_v33  ;;  %v2922_v38 = vmul.f32 0.001, %v2884_v8  ;;  %v2760_v48 = vadd.f32 %v2759_v3, %v1322_v7  ;;  %v2716_v60 = vadd.f32 %v2715_v17, %v1280_v10  ;;  %v2771_v61 = vadd.f32 %v2770_v2, %v1331_v22  ;;  %v1334_v10 = vld [vmem:[#allocation3 + $0x28c8] sm:$0xff]  ;;  %v2887_v2 = vld [vmem:[%s3707_s2 + $0x40] sm:$0xff] }
 0x1e1   :  { %3072 = vst.msk [vmem:[%s3708_s3] sm:$0xff] %vm3071_vm2, %v3033_v40  ;;  %v2921_v44 = vmul.f32 0.001, %v2883_v28  ;;  %v2837_v25 = vadd.f32 %v3277_v45, %v2835_v24  ;;  %3075 = vst.msk [vmem:[%s3708_s3 + $0x18] sm:$0xff] %vm3071_vm2, %v3036_v15  ;;  %v2924_v51 = vmul.f32 0.001, %v2886_v23 }
 0x1e2   :  { %3073 = vst.msk [vmem:[%s3708_s3 + $0x8] sm:$0xff] %vm3071_vm2, %v3034_v6  ;;  %v2962_v21 = vsub.f32 %v2922_v38, %v3230_v19  ;;  %v2923_v7 = vmul.f32 0.001, %v2885_v34  ;;  %v2761_v14 = vadd.f32 %v2760_v48, %v1323_v41  ;;  %v2717_v4 = vadd.f32 %v2716_v60, %v1281_v49  ;;  %v1284_v40 = vld [vmem:[#allocation3 + $0x2738] sm:$0xff]  ;;  %v1335_v34 = vld [vmem:[#allocation3 + $0x28d0] sm:$0xff]  ;;  %v1285_v60 = vld [vmem:[#allocation3 + $0x2740] sm:$0xff] }
 0x1e3   :  { %v2772_v12 = vadd.f32 %v2771_v61, %v1332_v53  ;;  %v2961_v45 = vsub.f32 %v2921_v44, %v3230_v19  ;;  %v2839_v8 = vadd.f32 %v3280_v55, %v2837_v25  ;;  %v2964_v22 = vsub.f32 %v2924_v51, %v3230_v19  ;;  %v3408_v55 = vpop.xlane.xlu0 %1966  ;;  %v3415_v53 = vpop.xlane.xlu1 %2080  ;;  %v1336_v44 = vld [vmem:[#allocation3 + $0x28d8] sm:$0xff] }
 0x1e4   :  { %v3000_v63 = vsub.f32 0.0, %v2962_v21  ;;  %v2963_v33 = vsub.f32 %v2923_v7, %v3230_v19  ;;  %v2763_v26 = vadd.f32 %v3236_v31, %v2761_v14  ;;  %v2718_v28 = vadd.f32 %v2717_v4, %v1282_v62  ;;  %v2890_v31 = vld [vmem:[%s3707_s2 + $0x58] sm:$0xff]  ;;  %v1286_v7 = vld [vmem:[#allocation3 + $0x2748] sm:$0xff]  ;;  %v1337_v4 = vld [vmem:[#allocation3 + $0x28e0] sm:$0xff] }
 0x1e5   :  { %v2773_v3 = vadd.f32 %v2772_v12, %v1333_v57  ;;  %v2999_v17 = vsub.f32 0.0, %v2961_v45  ;;  %v2841_v23 = vadd.f32 %v3283_v56, %v2839_v8  ;;  %v3002_v49 = vsub.f32 0.0, %v2964_v22  ;;  %v2889_v56 = vld [vmem:[%s3707_s2 + $0x50] sm:$0xff] }
 0x1e6   :  { %v3038_v41 = vmul.f32 %v3000_v63, %v3221_v59  ;;  %v3001_v24 = vsub.f32 0.0, %v2963_v33  ;;  %2764 = vadd.xlane.f32.xlu1 %v2763_v26  ;;  %v2719_v15 = vadd.f32 %v2718_v28, %v1283_v13  ;;  %v2926_v48 = vmul.f32 0.001, %v2888_v5  ;;  %v2892_v59 = vld [vmem:[%s3707_s2 + $0x68] sm:$0xff]  ;;  %v1287_v63 = vld [vmem:[#allocation3 + $0x2750] sm:$0xff] }
 0x1e7   :  { %v2774_v6 = vadd.f32 %v2773_v3, %v1334_v10  ;;  %v3037_v38 = vmul.f32 %v2999_v17, %v3239_v35  ;;  %v2843_v61 = vadd.f32 %v3286_v1, %v2841_v23  ;;  %v3040_v35 = vmul.f32 %v3002_v49, %v3244_v43  ;;  %v3447_v10 = vpop.xlane.xlu0 %2042  ;;  %v1338_v33 = vld [vmem:[#allocation3 + $0x28e8] sm:$0xff]  ;;  %v2891_v3 = vld [vmem:[%s3707_s2 + $0x60] sm:$0xff]  ;;  %v3455_v17 = vpop.xlane.xlu1 %2156  ;;  %v1339_v49 = vld [vmem:[#allocation3 + $0x28f0] sm:$0xff] }
 0x1e8   :  { %3077 = vst.msk [vmem:[%s3708_s3 + $0x28] sm:$0xff] %vm3071_vm2, %v3038_v41  ;;  %v3039_v62 = vmul.f32 %v3001_v24, %v3263_v54  ;;  %v2925_v25 = vmul.f32 0.001, %v2887_v2  ;;  %v2720_v57 = vadd.f32 %v2719_v15, %v1284_v40  ;;  %v2966_v1 = vsub.f32 %v2926_v48, %v3230_v19 }
 0x1e9   :  { %v2775_v21 = vadd.f32 %v2774_v6, %v1335_v34  ;;  %3076 = vst.msk [vmem:[%s3708_s3 + $0x20] sm:$0xff] %vm3071_vm2, %v3037_v38  ;;  %v2928_v51 = vmul.f32 0.001, %v2890_v31  ;;  %v2845_v14 = vadd.f32 %v3289_v0, %v2843_v61  ;;  %3079 = vst.msk [vmem:[%s3708_s3 + $0x38] sm:$0xff] %vm3071_vm2, %v3040_v35  ;;  %v2927_v54 = vmul.f32 0.001, %v2889_v56 }
 0x1ea   :  { %3078 = vst.msk [vmem:[%s3708_s3 + $0x30] sm:$0xff] %vm3071_vm2, %v3039_v62  ;;  %v2965_v43 = vsub.f32 %v2925_v25, %v3230_v19  ;;  %v2930_v12 = vmul.f32 0.001, %v2892_v59  ;;  %v2721_v45 = vadd.f32 %v2720_v57, %v1285_v60  ;;  %v3004_v8 = vsub.f32 0.0, %v2966_v1  ;;  %v2893_v6 = vld [vmem:[%s3707_s2 + $0x70] sm:$0xff]  ;;  %v1340_v60 = vld [vmem:[#allocation3 + $0x28f8] sm:$0xff] }
 0x1eb   :  { %v2776_v13 = vadd.f32 %v2775_v21, %v1336_v44  ;;  %v2968_v0 = vsub.f32 %v2928_v51, %v3230_v19  ;;  %v2847_v22 = vadd.f32 %v3292_v11, %v2845_v14  ;;  %v2967_v26 = vsub.f32 %v2927_v54, %v3230_v19  ;;  %v2894_v11 = vld [vmem:[%s3707_s2 + $0x78] sm:$0xff]  ;;  %v3493_v21 = vpop.xlane.xlu0 %2118 }
 0x1ec   :  { %v3003_v5 = vsub.f32 0.0, %v2965_v43  ;;  %v2970_v28 = vsub.f32 %v2930_v12, %v3230_v19  ;;  %v2722_v2 = vadd.f32 %v2721_v45, %v1286_v7  ;;  %v3042_v23 = vmul.f32 %v3004_v8, %v3271_v36  ;;  %v2898_v35 = vld [vmem:[%s3707_s2 + $0x98] sm:$0xff]  ;;  %v3505_v7 = vpop.xlane.xlu1 %2232  ;;  %v1342_v12 = vld [vmem:[#allocation3 + $0x2908] sm:$0xff] }
 0x1ed   :  { %v2777_v40 = vadd.f32 %v2776_v13, %v1337_v4  ;;  %v3006_v34 = vsub.f32 0.0, %v2968_v0  ;;  %v2849_v41 = vadd.f32 %v3295_v9, %v2847_v22  ;;  %v3005_v31 = vsub.f32 0.0, %v2967_v26  ;;  %v2896_v9 = vld [vmem:[%s3707_s2 + $0x88] sm:$0xff]  ;;  %v2897_v0 = vld [vmem:[%s3707_s2 + $0x90] sm:$0xff] }
 0x1ee   :  { %v3041_v24 = vmul.f32 %v3003_v5, %v3303_v20  ;;  %v3008_v15 = vsub.f32 0.0, %v2970_v28  ;;  %v2723_v38 = vadd.f32 %v2722_v2, %v1287_v63  ;;  %3081 = vst.msk [vmem:[%s3708_s3 + $0x48] sm:$0xff] %vm3071_vm2, %v3042_v23  ;;  %v2929_v56 = vmul.f32 0.001, %v2891_v3  ;;  %v2895_v20 = vld [vmem:[%s3707_s2 + $0x80] sm:$0xff]  ;;  %v1343_v28 = vld [vmem:[#allocation3 + $0x2910] sm:$0xff] }
 0x1ef   :  { %v2778_v48 = vadd.f32 %v2777_v40, %v1338_v33  ;;  %v3044_v36 = vmul.f32 %v3006_v34, %v3312_v32  ;;  %v2851_v59 = vadd.f32 %v3298_v18, %v2849_v41  ;;  %v3043_v61 = vmul.f32 %v3005_v31, %v3347_v30  ;;  %v2899_v23 = vld [vmem:[%s3707_s2 + $0xa0] sm:$0xff]  ;;  %v1344_v31 = vld [vmem:[#allocation3 + $0x2918] sm:$0xff] }
 0x1f0   :  { %3080 = vst.msk [vmem:[%s3708_s3 + $0x40] sm:$0xff] %vm3071_vm2, %v3041_v24  ;;  %v3046_v32 = vmul.f32 %v3008_v15, %v3351_v42  ;;  %v2932_v44 = vmul.f32 0.001, %v2894_v11  ;;  %v2725_v62 = vadd.f32 %v3242_v39, %v2723_v38  ;;  %v2969_v18 = vsub.f32 %v2929_v56, %v3230_v19  ;;  %v1341_v42 = vld [vmem:[#allocation3 + $0x2900] sm:$0xff]  ;;  %v2309_v38 = vpop.xlane.xlu1 %2308 }
 0x1f1   :  { %v2779_v25 = vadd.f32 %v2778_v48, %v1339_v49  ;;  %3083 = vst.msk [vmem:[%s3708_s3 + $0x58] sm:$0xff] %vm3071_vm2, %v3044_v36  ;;  %v2931_v57 = vmul.f32 0.001, %v2893_v6  ;;  %v2853_v30 = vadd.f32 %v3301_v16, %v2851_v59  ;;  %3082 = vst.msk [vmem:[%s3708_s3 + $0x50] sm:$0xff] %vm3071_vm2, %v3043_v61  ;;  %v2934_v1 = vmul.f32 0.001, %v2896_v9 }
 0x1f2   :  { %3085 = vst.msk [vmem:[%s3708_s3 + $0x68] sm:$0xff] %vm3071_vm2, %v3046_v32  ;;  %v2972_v39 = vsub.f32 %v2932_v44, %v3230_v19  ;;  %v2933_v51 = vmul.f32 0.001, %v2895_v20  ;;  %2726 = vadd.xlane.f32.xlu0 %v2725_v62  ;;  %v3007_v16 = vsub.f32 0.0, %v2969_v18  ;;  %v2936_v43 = vmul.f32 0.001, %v2898_v35 }
 0x1f3   :  { %v2780_v14 = vadd.f32 %v2779_v25, %v1340_v60  ;;  %v2971_v4 = vsub.f32 %v2931_v57, %v3230_v19  ;;  %v2855_v54 = vadd.f32 %v3307_v29, %v2853_v30  ;;  %v2974_v13 = vsub.f32 %v2934_v1, %v3230_v19  ;;  %v2900_v29 = vld [vmem:[%s3707_s2 + $0xa8] sm:$0xff]  ;;  %v2901_v49 = vld [vmem:[%s3707_s2 + $0xb0] sm:$0xff]  ;;  %v2903_v57 = vld [vmem:[%s3707_s2 + $0xc0] sm:$0xff] }
 0x1f4   :  { %v3010_v45 = vsub.f32 0.0, %v2972_v39  ;;  %v2973_v8 = vsub.f32 %v2933_v51, %v3230_v19  ;;  %v3045_v22 = vmul.f32 %v3007_v16, %v3372_v52  ;;  %v2976_v5 = vsub.f32 %v2936_v43, %v3230_v19  ;;  %v2904_v48 = vld [vmem:[%s3707_s2 + $0xc8] sm:$0xff]  ;;  %v1347_v16 = vld [vmem:[#allocation3 + $0x2930] sm:$0xff] }
 0x1f5   :  { %v2781_v63 = vadd.f32 %v2780_v14, %v1341_v42  ;;  %v3009_v33 = vsub.f32 0.0, %v2971_v4  ;;  %v2857_v26 = vadd.f32 %v3310_v27, %v2855_v54  ;;  %v3012_v2 = vsub.f32 0.0, %v2974_v13  ;;  %v2195_v27 = vpop.xlane.xlu0 %2194  ;;  %v1346_v35 = vld [vmem:[#allocation3 + $0x2928] sm:$0xff] }
 0x1f6   :  { %v3048_v3 = vmul.f32 %v3010_v45, %v3381_v50  ;;  %v3011_v40 = vsub.f32 0.0, %v2973_v8  ;;  %3084 = vst.msk [vmem:[%s3708_s3 + $0x60] sm:$0xff] %vm3071_vm2, %v3045_v22  ;;  %v3014_v11 = vsub.f32 0.0, %v2976_v5  ;;  %v2935_v41 = vmul.f32 0.001, %v2897_v0  ;;  %v2902_v50 = vld [vmem:[%s3707_s2 + $0xb8] sm:$0xff] }
 0x1f7   :  { %v2782_v34 = vadd.f32 %v2781_v63, %v1342_v12  ;;  %v3047_v52 = vmul.f32 %v3009_v33, %v3408_v55  ;;  %v2859_v24 = vadd.f32 %v3315_v46, %v2857_v26  ;;  %v3050_v55 = vmul.f32 %v3012_v2, %v3415_v53  ;;  %v1394_v14 = vld [vmem:[#allocation3 + $0x2aa8] sm:$0xf]  ;;  %v1395_v0 = vld [vmem:[#allocation3 + $0x2ab0] sm:$0xf]  ;;  %v3711_v63 = vld [vmem:[#allocation6_spill] sm:$0xff] }
 0x1f8   :  { %3087 = vst.msk [vmem:[%s3708_s3 + $0x78] sm:$0xff] %vm3071_vm2, %v3048_v3  ;;  %v3049_v15 = vmul.f32 %v3011_v40, %v3447_v10  ;;  %v2938_v6 = vmul.f32 0.001, %v2900_v29  ;;  %v3052_v46 = vmul.f32 %v3014_v11, %v3455_v17  ;;  %v2975_v56 = vsub.f32 %v2935_v41, %v3230_v19  ;;  %v1345_v10 = vld [vmem:[#allocation3 + $0x2920] sm:$0xff]  ;;  %v1348_v33 = vld [vmem:[#allocation3 + $0x2938] sm:$0xff]  ;;  %v3712_v2 = vld [vmem:[#allocation7_spill] sm:$0xff] }
 0x1f9   :  { %v2783_v36 = vadd.f32 %v2782_v34, %v1343_v28  ;;  %3086 = vst.msk [vmem:[%s3708_s3 + $0x70] sm:$0xff] %vm3071_vm2, %v3047_v52  ;;  %v2937_v9 = vmul.f32 0.001, %v2899_v23  ;;  %v2861_v53 = vadd.f32 %v3318_v37, %v2859_v24  ;;  %3089 = vst.msk [vmem:[%s3708_s3 + $0x88] sm:$0xff] %vm3071_vm2, %v3050_v55  ;;  %v2940_v59 = vmul.f32 0.001, %v2902_v50  ;;  %v2271_v1 = vpop.xlane.xlu0 %2270  ;;  %v2385_v12 = vpop.xlane.xlu1 %2384 }
 0x1fa   :  { %3088 = vst.msk [vmem:[%s3708_s3 + $0x80] sm:$0xff] %vm3071_vm2, %v3049_v15  ;;  %v2978_v20 = vsub.f32 %v2938_v6, %v3230_v19  ;;  %v2939_v17 = vmul.f32 0.001, %v2901_v49  ;;  %3091 = vst.msk [vmem:[%s3708_s3 + $0x98] sm:$0xff] %vm3071_vm2, %v3052_v46  ;;  %v3013_v37 = vsub.f32 0.0, %v2975_v56  ;;  %v2870_v5 = vsel %vm2804_vm1, %v1394_v14, 0.0 }
 0x1fb   :  { %v2784_v60 = vadd.f32 %v2783_v36, %v1344_v31  ;;  %v2977_v61 = vsub.f32 %v2937_v9, %v3230_v19  ;;  %v2942_v32 = vmul.f32 0.001, %v2904_v48  ;;  %v2863_v44 = vadd.f32 %v3325_v58, %v2861_v53  ;;  %v1396_v3 = vld [vmem:[#allocation3 + $0x2ab8] sm:$0xf]  ;;  %v1349_v23 = vld [vmem:[#allocation3 + $0x2940] sm:$0xff]  ;;  %v1350_v41 = vld [vmem:[#allocation3 + $0x2948] sm:$0xff] }
 0x1fc   :  { %v3016_v62 = vsub.f32 0.0, %v2978_v20  ;;  %v2980_v25 = vsub.f32 %v2940_v59, %v3230_v19  ;;  %v2979_v18 = vsub.f32 %v2939_v17, %v3230_v19  ;;  %v3051_v42 = vmul.f32 %v3013_v37, %v3493_v21  ;;  %v2906_v24 = vld [vmem:[%s3707_s2 + $0xd8] sm:$0xff]  ;;  %v1351_v55 = vld [vmem:[#allocation3 + $0x2950] sm:$0xff]  ;;  %v1353_v9 = vld [vmem:[#allocation3 + $0x2960] sm:$0xff] }
 0x1fd   :  { %v2785_v30 = vadd.f32 %v2784_v60, %v1345_v10  ;;  %v3015_v39 = vsub.f32 0.0, %v2977_v61  ;;  %v2982_v51 = vsub.f32 %v2942_v32, %v3230_v19  ;;  %v2865_v58 = vadd.f32 %v3328_v47, %v2863_v44  ;;  %v1352_v48 = vld [vmem:[#allocation3 + $0x2958] sm:$0xff]  ;;  %v1354_v10 = vld [vmem:[#allocation3 + $0x2968] sm:$0xff]  ;;  %v1355_v17 = vld [vmem:[#allocation3 + $0x2970] sm:$0xff] }
 0x1fe   :  { %v3054_v4 = vmul.f32 %v3016_v62, %v3505_v7  ;;  %v3018_v43 = vsub.f32 0.0, %v2980_v25  ;;  %v3017_v54 = vsub.f32 0.0, %v2979_v18  ;;  %3090 = vst.msk [vmem:[%s3708_s3 + $0x90] sm:$0xff] %vm3071_vm2, %v3051_v42  ;;  %v2941_v8 = vmul.f32 0.001, %v2903_v57  ;;  %v1356_v37 = vld [vmem:[#allocation3 + $0x2978] sm:$0xff] }
 0x1ff   :  { %v2786_v45 = vadd.f32 %v2785_v30, %v1346_v35  ;;  %v3053_v21 = vmul.f32 %v3015_v39, %v2195_v27  ;;  %v3020_v13 = vsub.f32 0.0, %v2982_v51  ;;  %v2867_v22 = vadd.f32 %v3711_v63, %v2865_v58  ;;  %v2905_v44 = vld [vmem:[%s3707_s2 + $0xd0] sm:$0xff]  ;;  %v1357_v35 = vld [vmem:[#allocation3 + $0x2980] sm:$0xff]  ;;  %v1358_v18 = vld [vmem:[#allocation3 + $0x2988] sm:$0xff] }
 0x200   :  { %3093 = vst.msk [vmem:[%s3708_s3 + $0xa8] sm:$0xff] %vm3071_vm2, %v3054_v4  ;;  %v3056_v47 = vmul.f32 %v3018_v43, %v2309_v38  ;;  %v3055_v7 = vmul.f32 %v3017_v54, %v2271_v1  ;;  %v2981_v28 = vsub.f32 %v2941_v8, %v3230_v19  ;;  %v2872_v34 = vsel %vm2804_vm1, %v1395_v0, 0.0  ;;  %v1360_v42 = vld [vmem:[#allocation3 + $0x2998] sm:$0xff]  ;;  %v1359_v1 = vld [vmem:[#allocation3 + $0x2990] sm:$0xff]  ;;  %v2908_v54 = vld [vmem:[%s3707_s2 + $0xe8] sm:$0xff] }
 0x201   :  { %v2787_v29 = vadd.f32 %v2786_v45, %v1347_v16  ;;  %3092 = vst.msk [vmem:[%s3708_s3 + $0xa0] sm:$0xff] %vm3071_vm2, %v3053_v21  ;;  %v3058_v26 = vmul.f32 %v3020_v13, %v2385_v12  ;;  %v2869_v40 = vadd.f32 %v3712_v2, %v2867_v22  ;;  %v2875_v50 = vsel %vm2874_vm3, %v1396_v3, 0.0  ;;  %v2907_v0 = vld [vmem:[%s3707_s2 + $0xe0] sm:$0xff] }
 0x202   :  { %3095 = vst.msk [vmem:[%s3708_s3 + $0xb8] sm:$0xff] %vm3071_vm2, %v3056_v47  ;;  %3094 = vst.msk [vmem:[%s3708_s3 + $0xb0] sm:$0xff] %vm3071_vm2, %v3055_v7  ;;  %v3019_v27 = vsub.f32 0.0, %v2981_v28  ;;  %v2944_v46 = vmul.f32 0.001, %v2906_v24  ;;  %v2800_v14 = vsel %vm1431_vm0, %v1360_v42, 0.0 }
 0x203   :  { %v2788_v52 = vadd.f32 %v2787_v29, %v1348_v33  ;;  %3097 = vst.msk [vmem:[%s3708_s3 + $0xc8] sm:$0xff] %vm3071_vm2, %v3058_v26  ;;  %v2871_v11 = vadd.f32 %v2870_v5, %v2869_v40  ;;  %v2943_v30 = vmul.f32 0.001, %v2905_v44  ;;  %v2946_v21 = vmul.f32 0.001, %v2908_v54  ;;  %v2910_v5 = vld [vmem:[%s3707_s2 + $0xf8] sm:$0xff] }
 0x204   :  { %v2984_v20 = vsub.f32 %v2944_v46, %v3230_v19  ;;  %v2945_v33 = vmul.f32 0.001, %v2907_v0  ;;  %v2948_v26 = vmul.f32 0.001, %v2910_v5  ;;  %v2909_v40 = vld [vmem:[%s3707_s2 + $0xf0] sm:$0xff] }
 0x205   :  { %v2789_v49 = vadd.f32 %v2788_v52, %v1349_v23  ;;  %v2873_v31 = vadd.f32 %v2872_v34, %v2871_v11  ;;  %v2347_v6 = vpop.xlane.xlu0 %2346  ;;  %v2983_v58 = vsub.f32 %v2943_v30, %v3230_v19  ;;  %v2986_v13 = vsub.f32 %v2946_v21, %v3230_v19 }
 0x206   :  { %v3057_v36 = vmul.f32 %v3019_v27, %v2347_v6  ;;  %v3022_v61 = vsub.f32 0.0, %v2984_v20  ;;  %v2985_v47 = vsub.f32 %v2945_v33, %v3230_v19  ;;  %v2988_v3 = vsub.f32 %v2948_v26, %v3230_v19  ;;  %v2912_v27 = vld [vmem:[%s3707_s2 + $0x108] sm:$0xff] }
 0x207   :  { %v2790_v15 = vadd.f32 %v2789_v49, %v1350_v41  ;;  %v2876_v38 = vadd.f32 %v2875_v50, %v2873_v31  ;;  %v3021_v43 = vsub.f32 0.0, %v2983_v58  ;;  %v3024_v8 = vsub.f32 0.0, %v2986_v13 }
 0x208   :  { %3096 = vst.msk [vmem:[%s3708_s3 + $0xc0] sm:$0xff] %vm3071_vm2, %v3057_v36  ;;  %v3023_v7 = vsub.f32 0.0, %v2985_v47  ;;  %v3026_v2 = vsub.f32 0.0, %v2988_v3  ;;  %v2947_v52 = vmul.f32 0.001, %v2909_v40 }
 0x209   :  { %v2791_v56 = vadd.f32 %v2790_v15, %v1351_v55  ;;  %2877 = vadd.xlane.f32.xlu1 %v2876_v38  ;;  %v2950_v24 = vmul.f32 0.001, %v2912_v27  ;;  %v2911_v15 = vld [vmem:[%s3707_s2 + $0x100] sm:$0xff] }
 0x20a   :  { %v2987_v11 = vsub.f32 %v2947_v52, %v3230_v19 }
 0x20b   :  { %v2792_v53 = vadd.f32 %v2791_v56, %v1352_v48  ;;  %v2990_v31 = vsub.f32 %v2950_v24, %v3230_v19  ;;  %v2949_v48 = vmul.f32 0.001, %v2911_v15  ;;  %v2914_v56 = vld [vmem:[%s3707_s2 + $0x118] sm:$0xff] }
 0x20c   :  { %v3025_v41 = vsub.f32 0.0, %v2987_v11 }
 0x20d   :  { %v2793_v59 = vadd.f32 %v2792_v53, %v1353_v9  ;;  %v3028_v55 = vsub.f32 0.0, %v2990_v31  ;;  %v2989_v36 = vsub.f32 %v2949_v48, %v3230_v19 }
 0x20f   :  { %v2794_v60 = vadd.f32 %v2793_v59, %v1354_v10  ;;  %v3027_v46 = vsub.f32 0.0, %v2989_v36  ;;  %v2952_v10 = vmul.f32 0.001, %v2914_v56 }
 0x211   :  { %v2795_v32 = vadd.f32 %v2794_v60, %v1355_v17  ;;  %v2461_v25 = vpop.xlane.xlu1 %2460  ;;  %v2992_v20 = vsub.f32 %v2952_v10, %v3230_v19  ;;  %v2913_v17 = vld [vmem:[%s3707_s2 + $0x110] sm:$0xff] }
 0x212   :  { %v3060_v57 = vmul.f32 %v3022_v61, %v2461_v25  ;;  %v2951_v61 = vmul.f32 0.001, %v2913_v17  ;;  %v2916_v25 = vld [vmem:[%s3707_s2 + $0x128] sm:$0xf] }
 0x213   :  { %v2796_v62 = vadd.f32 %v2795_v32, %v1356_v37  ;;  %v3030_v59 = vsub.f32 0.0, %v2992_v20 }
 0x214   :  { %3099 = vst.msk [vmem:[%s3708_s3 + $0xd8] sm:$0xff] %vm3071_vm2, %v3060_v57  ;;  %v2991_v32 = vsub.f32 %v2951_v61, %v3230_v19 }
 0x215   :  { %v2797_v39 = vadd.f32 %v2796_v62, %v1357_v35 }
 0x216   :  { %v3029_v44 = vsub.f32 0.0, %v2991_v32 }
 0x217   :  { %v2798_v51 = vadd.f32 %v2797_v39, %v1358_v18  ;;  %v2954_v18 = vmul.f32 0.001, %v2916_v25 }
 0x219   :  { %v2799_v16 = vadd.f32 %v2798_v51, %v1359_v1  ;;  %v2994_v57 = vsub.f32 %v2954_v18, %v3230_v19  ;;  %v2915_v1 = vld [vmem:[%s3707_s2 + $0x120] sm:$0xff] }
 0x21a   :  { %v2953_v51 = vmul.f32 0.001, %v2915_v1 }
 0x21b   :  { %v2801_v4 = vadd.f32 %v2800_v14, %v2799_v16  ;;  %v3032_v30 = vsub.f32 0.0, %v2994_v57 }
 0x21c   :  { %v2993_v14 = vsub.f32 %v2953_v51, %v3230_v19 }
 0x21d   :  { %2802 = vadd.xlane.f32.xlu0 %v2801_v4 }
 0x21e   :  { %v2423_v12 = vpop.xlane.xlu0 %2422  ;;  %v3031_v58 = vsub.f32 0.0, %v2993_v14 }
 0x21f   :  { %v3059_v45 = vmul.f32 %v3021_v43, %v2423_v12 }
 0x221   :  { %3098 = vst.msk [vmem:[%s3708_s3 + $0xd0] sm:$0xff] %vm3071_vm2, %v3059_v45 }
 0x22a   :  { %v2537_v63 = vpop.xlane.xlu1 %2536 }
 0x22b   :  { %v3062_v22 = vmul.f32 %v3024_v8, %v2537_v63 }
 0x22d   :  { %3101 = vst.msk [vmem:[%s3708_s3 + $0xe8] sm:$0xff] %vm3071_vm2, %v3062_v22 }
 0x236   :  { %v2499_v29 = vpop.xlane.xlu0 %2498 }
 0x237   :  { %v3061_v28 = vmul.f32 %v3023_v7, %v2499_v29 }
 0x239   :  { %3100 = vst.msk [vmem:[%s3708_s3 + $0xe0] sm:$0xff] %vm3071_vm2, %v3061_v28 }
 0x241   :  { %v2613_v23 = vpop.xlane.xlu1 %2612 }
 0x242   :  { %v3064_v34 = vmul.f32 %v3026_v2, %v2613_v23 }
 0x244   :  { %3103 = vst.msk [vmem:[%s3708_s3 + $0xf8] sm:$0xff] %vm3071_vm2, %v3064_v34 }
 0x24d   :  { %v2575_v50 = vpop.xlane.xlu0 %2574 }
 0x24e   :  { %v3063_v49 = vmul.f32 %v3025_v41, %v2575_v50 }
 0x250   :  { %3102 = vst.msk [vmem:[%s3708_s3 + $0xf0] sm:$0xff] %vm3071_vm2, %v3063_v49 }
 0x259   :  { %v2689_v6 = vpop.xlane.xlu1 %2688 }
 0x25a   :  { %v3066_v38 = vmul.f32 %v3028_v55, %v2689_v6 }
 0x25c   :  { %3105 = vst.msk [vmem:[%s3708_s3 + $0x108] sm:$0xff] %vm3071_vm2, %v3066_v38 }
 0x266   :  { %v2651_v9 = vpop.xlane.xlu0 %2650 }
 0x267   :  { %v3065_v53 = vmul.f32 %v3027_v46, %v2651_v9 }
 0x269   :  { %3104 = vst.msk [vmem:[%s3708_s3 + $0x100] sm:$0xff] %vm3071_vm2, %v3065_v53 }
 0x273   :  { %v2765_v60 = vpop.xlane.xlu1 %2764 }
 0x274   :  { %v3068_v37 = vmul.f32 %v3030_v59, %v2765_v60 }
 0x276   :  { %3107 = vst.msk [vmem:[%s3708_s3 + $0x118] sm:$0xff] %vm3071_vm2, %v3068_v37 }
 0x27f   :  { %v2727_v35 = vpop.xlane.xlu0 %2726 }
 0x280   :  { %v3067_v62 = vmul.f32 %v3029_v44, %v2727_v35 }
 0x282   :  { %3106 = vst.msk [vmem:[%s3708_s3 + $0x110] sm:$0xff] %vm3071_vm2, %v3067_v62 }
 0x296   :  { %v2878_v42 = vpop.xlane.xlu1 %2877 }
 0x297   :  { %v3070_v39 = vmul.f32 %v3032_v30, %v2878_v42 }
 0x299   :  { %3110 = vst.msk [vmem:[%s3708_s3 + $0x128] sm:$0xf] %vm3109_vm4, %v3070_v39 }
 0x2aa   :  { %v2803_v16 = vpop.xlane.xlu0 %2802 }
 0x2ab   :  { %v3069_v4 = vmul.f32 %v3031_v58, %v2803_v16 }
 0x2ad   :  { %3108 = vst.msk [vmem:[%s3708_s3 + $0x120] sm:$0xff] %vm3071_vm2, %v3069_v4 }
 0x2ae   :  { %3115 = vsyncpa [#allocation4], 1 }

</bundles_post_ra>
